<compile_context>
chip_gen: v5e
topology: v5e:2x2
jax: 0.10.0
libtpu: 0.0.40
codegen_flags: <defaults>
</compile_context>

<pallas_src>
import functools

import jax
import jax.numpy as jnp
from jax.experimental import pallas as pl
from jax.experimental.pallas import tpu as pltpu

RELU_SHIFT = 1e-10


def _round_up(x, m):
    return ((x + m - 1) // m) * m


# ---------------------------------------------------------------------------
# Kernel 1: fused Linear + relu-shift + per-sample normalization
#   y = x @ Wp + b ; y = relu(y - eps) + eps ; mask padded cols ; y /= row_sum(y)
# ---------------------------------------------------------------------------
def _linear_norm_kernel(x_ref, w_ref, b_ref, o_ref, *, k_real):
    y = jnp.dot(x_ref[...], w_ref[...], preferred_element_type=jnp.float32)  # (B, Kp)
    y = y + b_ref[...]                                   # (B, Kp) + (1, Kp)
    y = jnp.maximum(y - RELU_SHIFT, 0.0) + RELU_SHIFT    # relu(y - eps) + eps
    col = jax.lax.broadcasted_iota(jnp.int32, y.shape, 1)
    y = jnp.where(col < k_real, y, 0.0)                  # padded cols -> exactly 0
    norm = jnp.sum(y, axis=1, keepdims=True)             # == sum over (C,KH,KW)
    o_ref[...] = y / norm


# ---------------------------------------------------------------------------
# Kernel 2: conv2d(prev_image, cdna_kerns) via in-kernel im2col + MXU matmul.
# Grid iterates over the image batch N ("parallel" -> megacore-sharded on v7x).
# ---------------------------------------------------------------------------
def _make_conv_kernel(B, C, H, W, KH, KW, p, Kp):
    Hp, Wp = H + 2 * p, W + 2 * p
    Ho, Wo = Hp - KH + 1, Wp - KW + 1
    CKK = C * KH * KW
    WIDE = Ho * Wp                              # real wide row length
    WIDEP = max(128, _round_up(WIDE, 128))      # lane-dense (multiple of 128)
    # flattened padded channel length: largest im2col slice must stay in-bounds
    L = (KH - 1) * Wp + (KW - 1) + WIDEP

    def conv_kernel(img_ref, kerns_ref, o_ref, pad_ref, patch_ref):
        # img_ref:   (1, C, H, W)   unpadded image block (padding done here)
        # kerns_ref: (B, Kp)        normalized CDNA kernels (taps flat, zero-padded)
        # o_ref:     (1, B, WIDEP)  wide conv output (lane-dense)
        # pad_ref:   (C, L)         zero-padded image, flattened per channel (VMEM)
        # patch_ref: (Kp, WIDEP)    im2col matrix, one lane-contiguous row per tap

        # 1) zero-pad inside the kernel: no wrapper-side jnp.pad HBM round trip.
        #    (re-zeroed every grid step: scratch is per-core, so a program_id==0
        #     guard would break under megacore sharding.)
        pad_ref[...] = jnp.zeros_like(pad_ref)
        for c in range(C):
            for y in range(H):
                dst = (p + y) * Wp + p
                pad_ref[c:c + 1, dst:dst + W] = img_ref[0, c, y:y + 1, :]

        # 2) keep padded tap rows exactly zero so the aligned 128-deep
        #    contraction stays NaN-free (kern cols >= CKK are zero too).
        if Kp > CKK:
            patch_ref[CKK:, :] = jnp.zeros((Kp - CKK, WIDEP), jnp.float32)

        # 3) "wide" im2col: every tap row is one contiguous lane slice of the
        #    flattened padded channel -> no in-register reshapes; WIDEP-wide rows
        #    make every store an unmasked lane-dense vst.
        for c in range(C):
            for i in range(KH):
                for j in range(KW):
                    row = (c * KH + i) * KW + j
                    src = i * Wp + j
                    patch_ref[row:row + 1, :] = pad_ref[c:c + 1, src:src + WIDEP]

        # 4) single MXU matmul: (B, Kp) @ (Kp, WIDEP) -> (B, WIDEP); lane-dense store.
        o_ref[0] = jnp.dot(kerns_ref[...], patch_ref[...],
                           preferred_element_type=jnp.float32)

    return conv_kernel, Ho, Wo, Wp, WIDE, WIDEP, L


# ---------------------------------------------------------------------------
# Jitted forward: two pallas_calls + fused slice/reshape glue.
# ---------------------------------------------------------------------------
def _cdna_forward(prev_image, cdna_input, w_t_pad, bias_pad, *, C, KH, KW, K, Kp):
    B = cdna_input.shape[0]
    N, _, H, W = prev_image.shape

    # ---- Pallas kernel 1: linear + relu-shift + normalize (128-lane padded) ----
    # TODO(synk): if the caller ever has multiple timesteps, stack them here so the
    # matmul M-dim is >= 8 and the weight stream is amortized over more rows.
    kerns_pad = pl.pallas_call(
        functools.partial(_linear_norm_kernel, k_real=K),
        out_shape=jax.ShapeDtypeStruct((B, Kp), jnp.float32),
        in_specs=[pl.BlockSpec(memory_space=pltpu.MemorySpace.VMEM)] * 3,
        out_specs=pl.BlockSpec(memory_space=pltpu.MemorySpace.VMEM),
    )(cdna_input, w_t_pad, bias_pad)
    cdna_kerns = kerns_pad[:, :K].reshape(B, C, KH, KW)

    # ---- Pallas kernel 2: im2col + MXU conv with the per-sample CDNA kernels ----
    p = (KH - 1) // 2
    conv_kernel, Ho, Wo, Wp, WIDE, WIDEP, L = _make_conv_kernel(
        B, C, H, W, KH, KW, p, Kp)

    out_wide = pl.pallas_call(
        conv_kernel,
        out_shape=jax.ShapeDtypeStruct((N, B, WIDEP), jnp.float32),
        grid=(N,),
        in_specs=[
            pl.BlockSpec((1, C, H, W), lambda n: (n, 0, 0, 0)),
            pl.BlockSpec((B, Kp), lambda n: (0, 0)),      # resident across the grid
        ],
        out_specs=pl.BlockSpec((1, B, WIDEP), lambda n: (n, 0, 0)),
        scratch_shapes=[
            pltpu.VMEM((C, L), jnp.float32),       # flattened zero-padded image
            pltpu.VMEM((Kp, WIDEP), jnp.float32),  # im2col patch matrix
        ],
        # N axis sharded across v7x's two TensorCores; harmless on v5e/v6e.
        compiler_params=pltpu.CompilerParams(dimension_semantics=("parallel",)),
    )(prev_image, kerns_pad)

    # Drop lane padding + "wrap" columns (x >= Wo), restore NCHW; torch.split glue.
    transformed_full = out_wide[:, :, :WIDE].reshape(N, B, Ho, Wp)[:, :, :, :Wo]
    transformed = tuple(transformed_full[:, b:b + 1] for b in range(B))
    return transformed, cdna_kerns


class CDNAPallas:
    def __init__(self, num_masks, color_channels, kernel_size, z_dim=128, key=None):
        self.num_masks = num_masks
        self.color_channels = color_channels
        self.kernel_size = kernel_size
        in_features = 7 * 7 * 4 * z_dim
        out_features = kernel_size[0] * kernel_size[1] * color_channels
        self.out_features = out_features
        if key is None:
            key = jax.random.PRNGKey(0)
        kw, kb = jax.random.split(key)
        # deterministic synthetic params (PyTorch Linear: weight (out, in), bias (out,))
        self.weight = (jax.random.normal(kw, (out_features, in_features), jnp.float32)
                       * 0.02)
        self.bias = jax.random.normal(kb, (out_features,), jnp.float32) * 0.01
        # transposed + zero-padded to a lane-aligned feature dim (multiple of 128)
        self.Kp = max(128, _round_up(out_features, 128))
        self.w_t_pad = (jnp.zeros((in_features, self.Kp), jnp.float32)
                        .at[:, :out_features].set(self.weight.T))
        self.bias_pad = (jnp.zeros((1, self.Kp), jnp.float32)
                         .at[:, :out_features].set(self.bias))
        self._fwd = jax.jit(functools.partial(
            _cdna_forward,
            C=color_channels, KH=kernel_size[0], KW=kernel_size[1],
            K=out_features, Kp=self.Kp))

    def forward(self, prev_image, cdna_input):
        assert prev_image.shape[1] == self.color_channels
        return self._fwd(prev_image, cdna_input, self.w_t_pad, self.bias_pad)


# ---------------------------------------------------------------------------
# Pure-JAX reference (mirrors the PyTorch forward) for correctness checking.
# ---------------------------------------------------------------------------
def _reference(prev_image, cdna_input, weight, bias, C, KH, KW):
    B = cdna_input.shape[0]
    y = cdna_input @ weight.T + bias
    k = y.reshape(B, -1, KH, KW)
    k = jnp.maximum(k - RELU_SHIFT, 0.0) + RELU_SHIFT
    k = k / jnp.sum(k, axis=(1, 2, 3), keepdims=True)
    k = k.reshape(B, C, KH, KW)
    p = (KH - 1) // 2
    out = jax.lax.conv_general_dilated(
        prev_image, k, window_strides=(1, 1), padding=[(p, p), (p, p)],
        dimension_numbers=("NCHW", "OIHW", "NCHW"))
    return out, k


if __name__ == "__main__":
    num_masks = 2
    color_channels = 3
    kernel_size = (5, 5)
    z_dim = 8                      # in_features = 7*7*4*8 = 1568 (small synthetic)
    B = 2                          # batch
    H = W = 16

    key = jax.random.PRNGKey(0)
    k_param, k_img, k_z = jax.random.split(key, 3)

    model = CDNAPallas(num_masks, color_channels, kernel_size, z_dim=z_dim, key=k_param)

    prev_image = jax.random.normal(k_img, (B, color_channels, H, W), jnp.float32)
    cdna_input = jax.random.normal(k_z, (B, 7 * 7 * 4 * z_dim), jnp.float32)

    transformed, cdna_kerns = model.forward(prev_image, cdna_input)
    transformed = jax.block_until_ready(transformed)
    cdna_kerns = jax.block_until_ready(cdna_kerns)

    ref_out, ref_k = _reference(prev_image, cdna_input, model.weight, model.bias,
                                color_channels, *kernel_size)
    assert jnp.allclose(cdna_kerns, ref_k, atol=1e-5, rtol=1e-5), "kernel params mismatch"
    out_full = jnp.concatenate(transformed, axis=1)
    assert out_full.shape == ref_out.shape
    assert jnp.allclose(out_full, ref_out, atol=1e-4, rtol=1e-4), "conv output mismatch"

    print("KERNEL_OK")
</pallas_src>

<mosaic_0001>
module attributes {stable_mosaic.version = 11 : i64} {
  func.func @_linear_norm_kernel(%arg0: memref<2x1568xf32, #tpu.memory_space<vmem>>, %arg1: memref<1568x128xf32, #tpu.memory_space<vmem>>, %arg2: memref<1x128xf32, #tpu.memory_space<vmem>>, %arg3: memref<2x128xf32, #tpu.memory_space<vmem>>) attributes {dimension_semantics = [], scalar_prefetch = 0 : i64, scratch_operands = 0 : i64, tpu.core_type = #tpu.core_type<tc>} {
    %c0 = arith.constant 0 : index
    %c0_0 = arith.constant 0 : index
    %0 = vector.load %arg0[%c0, %c0_0] : memref<2x1568xf32, #tpu.memory_space<vmem>>, vector<2x1568xf32>
    %c0_1 = arith.constant 0 : index
    %c0_2 = arith.constant 0 : index
    %1 = vector.load %arg1[%c0_1, %c0_2] : memref<1568x128xf32, #tpu.memory_space<vmem>>, vector<1568x128xf32>
    %cst = arith.constant dense<0.000000e+00> : vector<2x128xf32>
    %2 = tpu.matmul %0, %1, %cst {dimension_numbers = #tpu.dot_dimension_numbers<[1], [0], [0], [1], [0, 0, 1, 1], [], []>} : vector<2x1568xf32>, vector<1568x128xf32>, vector<2x128xf32> -> vector<2x128xf32>
    %c0_3 = arith.constant 0 : index
    %c0_4 = arith.constant 0 : index
    %3 = vector.load %arg2[%c0_3, %c0_4] : memref<1x128xf32, #tpu.memory_space<vmem>>, vector<1x128xf32>
    %4 = vector.broadcast %3 : vector<1x128xf32> to vector<2x128xf32>
    %5 = arith.addf %2, %4 : vector<2x128xf32>
    %cst_5 = arith.constant 1.000000e-10 : f32
    %6 = vector.broadcast %cst_5 : f32 to vector<2x128xf32>
    %7 = arith.subf %5, %6 : vector<2x128xf32>
    %cst_6 = arith.constant 0.000000e+00 : f32
    %8 = vector.broadcast %cst_6 : f32 to vector<2x128xf32>
    %9 = arith.maximumf %7, %8 : vector<2x128xf32>
    %cst_7 = arith.constant 1.000000e-10 : f32
    %10 = vector.broadcast %cst_7 : f32 to vector<2x128xf32>
    %11 = arith.addf %9, %10 : vector<2x128xf32>
    %12 = tpu.iota {dimensions = array<i32: 1>} : vector<2x128xi32>
    %c75_i32 = arith.constant 75 : i32
    %13 = vector.broadcast %c75_i32 : i32 to vector<2x128xi32>
    %14 = arith.cmpi slt, %12, %13 : vector<2x128xi32>
    %cst_8 = arith.constant 0.000000e+00 : f32
    %15 = vector.broadcast %cst_8 : f32 to vector<2x128xf32>
    %16 = arith.select %14, %11, %15 : vector<2x128xi1>, vector<2x128xf32>
    %cst_9 = arith.constant dense<0.000000e+00> : vector<2xf32>
    %17 = vector.multi_reduction <add>, %16, %cst_9 [1] : vector<2x128xf32> to vector<2xf32>
    %18 = vector.shape_cast %17 : vector<2xf32> to vector<2x1xf32>
    %19 = vector.broadcast %18 : vector<2x1xf32> to vector<2x128xf32>
    %20 = arith.divf %16, %19 : vector<2x128xf32>
    %c0_10 = arith.constant 0 : index
    %c0_11 = arith.constant 0 : index
    %21 = vector.load %arg3[%c0_10, %c0_11] : memref<2x128xf32, #tpu.memory_space<vmem>>, vector<2x128xf32>
    tpu.vector_store %arg3[%c0_10, %c0_11], %20 {strides = array<i32>} : memref<2x128xf32, #tpu.memory_space<vmem>>, vector<2x128xf32>,
    return
  }
}

module attributes {stable_mosaic.version = 11 : i64} {
  func.func @conv_kernel(%arg0: i32, %arg1: memref<1x3x16x16xf32, #tpu.memory_space<vmem>>, %arg2: memref<2x128xf32, #tpu.memory_space<vmem>>, %arg3: memref<1x2x384xf32, #tpu.memory_space<vmem>>, %arg4: memref<3x468xf32, #tpu.memory_space<vmem>>, %arg5: memref<128x384xf32, #tpu.memory_space<vmem>>) attributes {dimension_semantics = [#tpu.dimension_semantics<parallel>], iteration_bounds = array<i64: 2>, scalar_prefetch = 0 : i64, scratch_operands = 2 : i64, tpu.core_type = #tpu.core_type<tc>, window_params = [{transform_indices = @transform_0, window_bounds = array<i64: 1, 3, 16, 16>}, {pipeline_mode = #tpu.pipeline_mode<synchronous>, transform_indices = @transform_1, window_bounds = array<i64: 2, 128>}, {transform_indices = @transform_2, window_bounds = array<i64: 1, 2, 384>}]} {
    %cst = arith.constant 0.000000e+00 : f32
    %0 = vector.broadcast %cst : f32 to vector<3x468xf32>
    %c0 = arith.constant 0 : index
    %c0_0 = arith.constant 0 : index
    %1 = vector.load %arg4[%c0, %c0_0] : memref<3x468xf32, #tpu.memory_space<vmem>>, vector<3x468xf32>
    tpu.vector_store %arg4[%c0, %c0_0], %0 {strides = array<i32>} : memref<3x468xf32, #tpu.memory_space<vmem>>, vector<3x468xf32>,
    %c0_1 = arith.constant 0 : index
    %c0_2 = arith.constant 0 : index
    %c0_3 = arith.constant 0 : index
    %c0_4 = arith.constant 0 : index
    %2 = vector.load %arg1[%c0_1, %c0_2, %c0_3, %c0_4] : memref<1x3x16x16xf32, #tpu.memory_space<vmem>>, vector<1x1x1x16xf32>
    %3 = vector.shape_cast %2 : vector<1x1x1x16xf32> to vector<1x16xf32>
    %c0_5 = arith.constant 0 : index
    %c42 = arith.constant 42 : index
    %4 = vector.load %arg4[%c0_5, %c42] : memref<3x468xf32, #tpu.memory_space<vmem>>, vector<1x16xf32>
    tpu.vector_store %arg4[%c0_5, %c42], %3 {strides = array<i32>} : memref<3x468xf32, #tpu.memory_space<vmem>>, vector<1x16xf32>,
    %c0_6 = arith.constant 0 : index
    %c0_7 = arith.constant 0 : index
    %c1 = arith.constant 1 : index
    %c0_8 = arith.constant 0 : index
    %5 = vector.load %arg1[%c0_6, %c0_7, %c1, %c0_8] : memref<1x3x16x16xf32, #tpu.memory_space<vmem>>, vector<1x1x1x16xf32>
    %6 = vector.shape_cast %5 : vector<1x1x1x16xf32> to vector<1x16xf32>
    %c0_9 = arith.constant 0 : index
    %c62 = arith.constant 62 : index
    %7 = vector.load %arg4[%c0_9, %c62] : memref<3x468xf32, #tpu.memory_space<vmem>>, vector<1x16xf32>
    tpu.vector_store %arg4[%c0_9, %c62], %6 {strides = array<i32>} : memref<3x468xf32, #tpu.memory_space<vmem>>, vector<1x16xf32>,
    %c0_10 = arith.constant 0 : index
    %c0_11 = arith.constant 0 : index
    %c2 = arith.constant 2 : index
    %c0_12 = arith.constant 0 : index
    %8 = vector.load %arg1[%c0_10, %c0_11, %c2, %c0_12] : memref<1x3x16x16xf32, #tpu.memory_space<vmem>>, vector<1x1x1x16xf32>
    %9 = vector.shape_cast %8 : vector<1x1x1x16xf32> to vector<1x16xf32>
    %c0_13 = arith.constant 0 : index
    %c82 = arith.constant 82 : index
    %10 = vector.load %arg4[%c0_13, %c82] : memref<3x468xf32, #tpu.memory_space<vmem>>, vector<1x16xf32>
    tpu.vector_store %arg4[%c0_13, %c82], %9 {strides = array<i32>} : memref<3x468xf32, #tpu.memory_space<vmem>>, vector<1x16xf32>,
    %c0_14 = arith.constant 0 : index
    %c0_15 = arith.constant 0 : index
    %c3 = arith.constant 3 : index
    %c0_16 = arith.constant 0 : index
    %11 = vector.load %arg1[%c0_14, %c0_15, %c3, %c0_16] : memref<1x3x16x16xf32, #tpu.memory_space<vmem>>, vector<1x1x1x16xf32>
    %12 = vector.shape_cast %11 : vector<1x1x1x16xf32> to vector<1x16xf32>
    %c0_17 = arith.constant 0 : index
    %c102 = arith.constant 102 : index
    %13 = vector.load %arg4[%c0_17, %c102] : memref<3x468xf32, #tpu.memory_space<vmem>>, vector<1x16xf32>
    tpu.vector_store %arg4[%c0_17, %c102], %12 {strides = array<i32>} : memref<3x468xf32, #tpu.memory_space<vmem>>, vector<1x16xf32>,
    %c0_18 = arith.constant 0 : index
    %c0_19 = arith.constant 0 : index
    %c4 = arith.constant 4 : index
    %c0_20 = arith.constant 0 : index
    %14 = vector.load %arg1[%c0_18, %c0_19, %c4, %c0_20] : memref<1x3x16x16xf32, #tpu.memory_space<vmem>>, vector<1x1x1x16xf32>
    %15 = vector.shape_cast %14 : vector<1x1x1x16xf32> to vector<1x16xf32>
    %c0_21 = arith.constant 0 : index
    %c122 = arith.constant 122 : index
    %16 = vector.load %arg4[%c0_21, %c122] : memref<3x468xf32, #tpu.memory_space<vmem>>, vector<1x16xf32>
    tpu.vector_store %arg4[%c0_21, %c122], %15 {strides = array<i32>} : memref<3x468xf32, #tpu.memory_space<vmem>>, vector<1x16xf32>,
    %c0_22 = arith.constant 0 : index
    %c0_23 = arith.constant 0 : index
    %c5 = arith.constant 5 : index
    %c0_24 = arith.constant 0 : index
    %17 = vector.load %arg1[%c0_22, %c0_23, %c5, %c0_24] : memref<1x3x16x16xf32, #tpu.memory_space<vmem>>, vector<1x1x1x16xf32>
    %18 = vector.shape_cast %17 : vector<1x1x1x16xf32> to vector<1x16xf32>
    %c0_25 = arith.constant 0 : index
    %c142 = arith.constant 142 : index
    %19 = vector.load %arg4[%c0_25, %c142] : memref<3x468xf32, #tpu.memory_space<vmem>>, vector<1x16xf32>
    tpu.vector_store %arg4[%c0_25, %c142], %18 {strides = array<i32>} : memref<3x468xf32, #tpu.memory_space<vmem>>, vector<1x16xf32>,
    %c0_26 = arith.constant 0 : index
    %c0_27 = arith.constant 0 : index
    %c6 = arith.constant 6 : index
    %c0_28 = arith.constant 0 : index
    %20 = vector.load %arg1[%c0_26, %c0_27, %c6, %c0_28] : memref<1x3x16x16xf32, #tpu.memory_space<vmem>>, vector<1x1x1x16xf32>
    %21 = vector.shape_cast %20 : vector<1x1x1x16xf32> to vector<1x16xf32>
    %c0_29 = arith.constant 0 : index
    %c162 = arith.constant 162 : index
    %22 = vector.load %arg4[%c0_29, %c162] : memref<3x468xf32, #tpu.memory_space<vmem>>, vector<1x16xf32>
    tpu.vector_store %arg4[%c0_29, %c162], %21 {strides = array<i32>} : memref<3x468xf32, #tpu.memory_space<vmem>>, vector<1x16xf32>,
    %c0_30 = arith.constant 0 : index
    %c0_31 = arith.constant 0 : index
    %c7 = arith.constant 7 : index
    %c0_32 = arith.constant 0 : index
    %23 = vector.load %arg1[%c0_30, %c0_31, %c7, %c0_32] : memref<1x3x16x16xf32, #tpu.memory_space<vmem>>, vector<1x1x1x16xf32>
    %24 = vector.shape_cast %23 : vector<1x1x1x16xf32> to vector<1x16xf32>
    %c0_33 = arith.constant 0 : index
    %c182 = arith.constant 182 : index
    %25 = vector.load %arg4[%c0_33, %c182] : memref<3x468xf32, #tpu.memory_space<vmem>>, vector<1x16xf32>
    tpu.vector_store %arg4[%c0_33, %c182], %24 {strides = array<i32>} : memref<3x468xf32, #tpu.memory_space<vmem>>, vector<1x16xf32>,
    %c0_34 = arith.constant 0 : index
    %c0_35 = arith.constant 0 : index
    %c8 = arith.constant 8 : index
    %c0_36 = arith.constant 0 : index
    %26 = vector.load %arg1[%c0_34, %c0_35, %c8, %c0_36] : memref<1x3x16x16xf32, #tpu.memory_space<vmem>>, vector<1x1x1x16xf32>
    %27 = vector.shape_cast %26 : vector<1x1x1x16xf32> to vector<1x16xf32>
    %c0_37 = arith.constant 0 : index
    %c202 = arith.constant 202 : index
    %28 = vector.load %arg4[%c0_37, %c202] : memref<3x468xf32, #tpu.memory_space<vmem>>, vector<1x16xf32>
    tpu.vector_store %arg4[%c0_37, %c202], %27 {strides = array<i32>} : memref<3x468xf32, #tpu.memory_space<vmem>>, vector<1x16xf32>,
    %c0_38 = arith.constant 0 : index
    %c0_39 = arith.constant 0 : index
    %c9 = arith.constant 9 : index
    %c0_40 = arith.constant 0 : index
    %29 = vector.load %arg1[%c0_38, %c0_39, %c9, %c0_40] : memref<1x3x16x16xf32, #tpu.memory_space<vmem>>, vector<1x1x1x16xf32>
    %30 = vector.shape_cast %29 : vector<1x1x1x16xf32> to vector<1x16xf32>
    %c0_41 = arith.constant 0 : index
    %c222 = arith.constant 222 : index
    %31 = vector.load %arg4[%c0_41, %c222] : memref<3x468xf32, #tpu.memory_space<vmem>>, vector<1x16xf32>
    tpu.vector_store %arg4[%c0_41, %c222], %30 {strides = array<i32>} : memref<3x468xf32, #tpu.memory_space<vmem>>, vector<1x16xf32>,
    %c0_42 = arith.constant 0 : index
    %c0_43 = arith.constant 0 : index
    %c10 = arith.constant 10 : index
    %c0_44 = arith.constant 0 : index
    %32 = vector.load %arg1[%c0_42, %c0_43, %c10, %c0_44] : memref<1x3x16x16xf32, #tpu.memory_space<vmem>>, vector<1x1x1x16xf32>
    %33 = vector.shape_cast %32 : vector<1x1x1x16xf32> to vector<1x16xf32>
    %c0_45 = arith.constant 0 : index
    %c242 = arith.constant 242 : index
    %34 = vector.load %arg4[%c0_45, %c242] : memref<3x468xf32, #tpu.memory_space<vmem>>, vector<1x16xf32>
    tpu.vector_store %arg4[%c0_45, %c242], %33 {strides = array<i32>} : memref<3x468xf32, #tpu.memory_space<vmem>>, vector<1x16xf32>,
    %c0_46 = arith.constant 0 : index
    %c0_47 = arith.constant 0 : index
    %c11 = arith.constant 11 : index
    %c0_48 = arith.constant 0 : index
    %35 = vector.load %arg1[%c0_46, %c0_47, %c11, %c0_48] : memref<1x3x16x16xf32, #tpu.memory_space<vmem>>, vector<1x1x1x16xf32>
    %36 = vector.shape_cast %35 : vector<1x1x1x16xf32> to vector<1x16xf32>
    %c0_49 = arith.constant 0 : index
    %c262 = arith.constant 262 : index
    %37 = vector.load %arg4[%c0_49, %c262] : memref<3x468xf32, #tpu.memory_space<vmem>>, vector<1x16xf32>
    tpu.vector_store %arg4[%c0_49, %c262], %36 {strides = array<i32>} : memref<3x468xf32, #tpu.memory_space<vmem>>, vector<1x16xf32>,
    %c0_50 = arith.constant 0 : index
    %c0_51 = arith.constant 0 : index
    %c12 = arith.constant 12 : index
    %c0_52 = arith.constant 0 : index
    %38 = vector.load %arg1[%c0_50, %c0_51, %c12, %c0_52] : memref<1x3x16x16xf32, #tpu.memory_space<vmem>>, vector<1x1x1x16xf32>
    %39 = vector.shape_cast %38 : vector<1x1x1x16xf32> to vector<1x16xf32>
    %c0_53 = arith.constant 0 : index
    %c282 = arith.constant 282 : index
    %40 = vector.load %arg4[%c0_53, %c282] : memref<3x468xf32, #tpu.memory_space<vmem>>, vector<1x16xf32>
    tpu.vector_store %arg4[%c0_53, %c282], %39 {strides = array<i32>} : memref<3x468xf32, #tpu.memory_space<vmem>>, vector<1x16xf32>,
    %c0_54 = arith.constant 0 : index
    %c0_55 = arith.constant 0 : index
    %c13 = arith.constant 13 : index
    %c0_56 = arith.constant 0 : index
    %41 = vector.load %arg1[%c0_54, %c0_55, %c13, %c0_56] : memref<1x3x16x16xf32, #tpu.memory_space<vmem>>, vector<1x1x1x16xf32>
    %42 = vector.shape_cast %41 : vector<1x1x1x16xf32> to vector<1x16xf32>
    %c0_57 = arith.constant 0 : index
    %c302 = arith.constant 302 : index
    %43 = vector.load %arg4[%c0_57, %c302] : memref<3x468xf32, #tpu.memory_space<vmem>>, vector<1x16xf32>
    tpu.vector_store %arg4[%c0_57, %c302], %42 {strides = array<i32>} : memref<3x468xf32, #tpu.memory_space<vmem>>, vector<1x16xf32>,
    %c0_58 = arith.constant 0 : index
    %c0_59 = arith.constant 0 : index
    %c14 = arith.constant 14 : index
    %c0_60 = arith.constant 0 : index
    %44 = vector.load %arg1[%c0_58, %c0_59, %c14, %c0_60] : memref<1x3x16x16xf32, #tpu.memory_space<vmem>>, vector<1x1x1x16xf32>
    %45 = vector.shape_cast %44 : vector<1x1x1x16xf32> to vector<1x16xf32>
    %c0_61 = arith.constant 0 : index
    %c322 = arith.constant 322 : index
    %46 = vector.load %arg4[%c0_61, %c322] : memref<3x468xf32, #tpu.memory_space<vmem>>, vector<1x16xf32>
    tpu.vector_store %arg4[%c0_61, %c322], %45 {strides = array<i32>} : memref<3x468xf32, #tpu.memory_space<vmem>>, vector<1x16xf32>,
    %c0_62 = arith.constant 0 : index
    %c0_63 = arith.constant 0 : index
    %c15 = arith.constant 15 : index
    %c0_64 = arith.constant 0 : index
    %47 = vector.load %arg1[%c0_62, %c0_63, %c15, %c0_64] : memref<1x3x16x16xf32, #tpu.memory_space<vmem>>, vector<1x1x1x16xf32>
    %48 = vector.shape_cast %47 : vector<1x1x1x16xf32> to vector<1x16xf32>
    %c0_65 = arith.constant 0 : index
    %c342 = arith.constant 342 : index
    %49 = vector.load %arg4[%c0_65, %c342] : memref<3x468xf32, #tpu.memory_space<vmem>>, vector<1x16xf32>
    tpu.vector_store %arg4[%c0_65, %c342], %48 {strides = array<i32>} : memref<3x468xf32, #tpu.memory_space<vmem>>, vector<1x16xf32>,
    %c0_66 = arith.constant 0 : index
    %c1_67 = arith.constant 1 : index
    %c0_68 = arith.constant 0 : index
    %c0_69 = arith.constant 0 : index
    %50 = vector.load %arg1[%c0_66, %c1_67, %c0_68, %c0_69] : memref<1x3x16x16xf32, #tpu.memory_space<vmem>>, vector<1x1x1x16xf32>
    %51 = vector.shape_cast %50 : vector<1x1x1x16xf32> to vector<1x16xf32>
    %c1_70 = arith.constant 1 : index
    %c42_71 = arith.constant 42 : index
    %52 = vector.load %arg4[%c1_70, %c42_71] : memref<3x468xf32, #tpu.memory_space<vmem>>, vector<1x16xf32>
    tpu.vector_store %arg4[%c1_70, %c42_71], %51 {strides = array<i32>} : memref<3x468xf32, #tpu.memory_space<vmem>>, vector<1x16xf32>,
    %c0_72 = arith.constant 0 : index
    %c1_73 = arith.constant 1 : index
    %c1_74 = arith.constant 1 : index
    %c0_75 = arith.constant 0 : index
    %53 = vector.load %arg1[%c0_72, %c1_73, %c1_74, %c0_75] : memref<1x3x16x16xf32, #tpu.memory_space<vmem>>, vector<1x1x1x16xf32>
    %54 = vector.shape_cast %53 : vector<1x1x1x16xf32> to vector<1x16xf32>
    %c1_76 = arith.constant 1 : index
    %c62_77 = arith.constant 62 : index
    %55 = vector.load %arg4[%c1_76, %c62_77] : memref<3x468xf32, #tpu.memory_space<vmem>>, vector<1x16xf32>
    tpu.vector_store %arg4[%c1_76, %c62_77], %54 {strides = array<i32>} : memref<3x468xf32, #tpu.memory_space<vmem>>, vector<1x16xf32>,
    %c0_78 = arith.constant 0 : index
    %c1_79 = arith.constant 1 : index
    %c2_80 = arith.constant 2 : index
    %c0_81 = arith.constant 0 : index
    %56 = vector.load %arg1[%c0_78, %c1_79, %c2_80, %c0_81] : memref<1x3x16x16xf32, #tpu.memory_space<vmem>>, vector<1x1x1x16xf32>
    %57 = vector.shape_cast %56 : vector<1x1x1x16xf32> to vector<1x16xf32>
    %c1_82 = arith.constant 1 : index
    %c82_83 = arith.constant 82 : index
    %58 = vector.load %arg4[%c1_82, %c82_83] : memref<3x468xf32, #tpu.memory_space<vmem>>, vector<1x16xf32>
    tpu.vector_store %arg4[%c1_82, %c82_83], %57 {strides = array<i32>} : memref<3x468xf32, #tpu.memory_space<vmem>>, vector<1x16xf32>,
    %c0_84 = arith.constant 0 : index
    %c1_85 = arith.constant 1 : index
    %c3_86 = arith.constant 3 : index
    %c0_87 = arith.constant 0 : index
    %59 = vector.load %arg1[%c0_84, %c1_85, %c3_86, %c0_87] : memref<1x3x16x16xf32, #tpu.memory_space<vmem>>, vector<1x1x1x16xf32>
    %60 = vector.shape_cast %59 : vector<1x1x1x16xf32> to vector<1x16xf32>
    %c1_88 = arith.constant 1 : index
    %c102_89 = arith.constant 102 : index
    %61 = vector.load %arg4[%c1_88, %c102_89] : memref<3x468xf32, #tpu.memory_space<vmem>>, vector<1x16xf32>
    tpu.vector_store %arg4[%c1_88, %c102_89], %60 {strides = array<i32>} : memref<3x468xf32, #tpu.memory_space<vmem>>, vector<1x16xf32>,
    %c0_90 = arith.constant 0 : index
    %c1_91 = arith.constant 1 : index
    %c4_92 = arith.constant 4 : index
    %c0_93 = arith.constant 0 : index
    %62 = vector.load %arg1[%c0_90, %c1_91, %c4_92, %c0_93] : memref<1x3x16x16xf32, #tpu.memory_space<vmem>>, vector<1x1x1x16xf32>
    %63 = vector.shape_cast %62 : vector<1x1x1x16xf32> to vector<1x16xf32>
    %c1_94 = arith.constant 1 : index
    %c122_95 = arith.constant 122 : index
    %64 = vector.load %arg4[%c1_94, %c122_95] : memref<3x468xf32, #tpu.memory_space<vmem>>, vector<1x16xf32>
    tpu.vector_store %arg4[%c1_94, %c122_95], %63 {strides = array<i32>} : memref<3x468xf32, #tpu.memory_space<vmem>>, vector<1x16xf32>,
    %c0_96 = arith.constant 0 : index
    %c1_97 = arith.constant 1 : index
    %c5_98 = arith.constant 5 : index
    %c0_99 = arith.constant 0 : index
    %65 = vector.load %arg1[%c0_96, %c1_97, %c5_98, %c0_99] : memref<1x3x16x16xf32, #tpu.memory_space<vmem>>, vector<1x1x1x16xf32>
    %66 = vector.shape_cast %65 : vector<1x1x1x16xf32> to vector<1x16xf32>
    %c1_100 = arith.constant 1 : index
    %c142_101 = arith.constant 142 : index
    %67 = vector.load %arg4[%c1_100, %c142_101] : memref<3x468xf32, #tpu.memory_space<vmem>>, vector<1x16xf32>
    tpu.vector_store %arg4[%c1_100, %c142_101], %66 {strides = array<i32>} : memref<3x468xf32, #tpu.memory_space<vmem>>, vector<1x16xf32>,
    %c0_102 = arith.constant 0 : index
    %c1_103 = arith.constant 1 : index
    %c6_104 = arith.constant 6 : index
    %c0_105 = arith.constant 0 : index
    %68 = vector.load %arg1[%c0_102, %c1_103, %c6_104, %c0_105] : memref<1x3x16x16xf32, #tpu.memory_space<vmem>>, vector<1x1x1x16xf32>
    %69 = vector.shape_cast %68 : vector<1x1x1x16xf32> to vector<1x16xf32>
    %c1_106 = arith.constant 1 : index
    %c162_107 = arith.constant 162 : index
    %70 = vector.load %arg4[%c1_106, %c162_107] : memref<3x468xf32, #tpu.memory_space<vmem>>, vector<1x16xf32>
    tpu.vector_store %arg4[%c1_106, %c162_107], %69 {strides = array<i32>} : memref<3x468xf32, #tpu.memory_space<vmem>>, vector<1x16xf32>,
    %c0_108 = arith.constant 0 : index
    %c1_109 = arith.constant 1 : index
    %c7_110 = arith.constant 7 : index
    %c0_111 = arith.constant 0 : index
    %71 = vector.load %arg1[%c0_108, %c1_109, %c7_110, %c0_111] : memref<1x3x16x16xf32, #tpu.memory_space<vmem>>, vector<1x1x1x16xf32>
    %72 = vector.shape_cast %71 : vector<1x1x1x16xf32> to vector<1x16xf32>
    %c1_112 = arith.constant 1 : index
    %c182_113 = arith.constant 182 : index
    %73 = vector.load %arg4[%c1_112, %c182_113] : memref<3x468xf32, #tpu.memory_space<vmem>>, vector<1x16xf32>
    tpu.vector_store %arg4[%c1_112, %c182_113], %72 {strides = array<i32>} : memref<3x468xf32, #tpu.memory_space<vmem>>, vector<1x16xf32>,
    %c0_114 = arith.constant 0 : index
    %c1_115 = arith.constant 1 : index
    %c8_116 = arith.constant 8 : index
    %c0_117 = arith.constant 0 : index
    %74 = vector.load %arg1[%c0_114, %c1_115, %c8_116, %c0_117] : memref<1x3x16x16xf32, #tpu.memory_space<vmem>>, vector<1x1x1x16xf32>
    %75 = vector.shape_cast %74 : vector<1x1x1x16xf32> to vector<1x16xf32>
    %c1_118 = arith.constant 1 : index
    %c202_119 = arith.constant 202 : index
    %76 = vector.load %arg4[%c1_118, %c202_119] : memref<3x468xf32, #tpu.memory_space<vmem>>, vector<1x16xf32>
    tpu.vector_store %arg4[%c1_118, %c202_119], %75 {strides = array<i32>} : memref<3x468xf32, #tpu.memory_space<vmem>>, vector<1x16xf32>,
    %c0_120 = arith.constant 0 : index
    %c1_121 = arith.constant 1 : index
    %c9_122 = arith.constant 9 : index
    %c0_123 = arith.constant 0 : index
    %77 = vector.load %arg1[%c0_120, %c1_121, %c9_122, %c0_123] : memref<1x3x16x16xf32, #tpu.memory_space<vmem>>, vector<1x1x1x16xf32>
    %78 = vector.shape_cast %77 : vector<1x1x1x16xf32> to vector<1x16xf32>
    %c1_124 = arith.constant 1 : index
    %c222_125 = arith.constant 222 : index
    %79 = vector.load %arg4[%c1_124, %c222_125] : memref<3x468xf32, #tpu.memory_space<vmem>>, vector<1x16xf32>
    tpu.vector_store %arg4[%c1_124, %c222_125], %78 {strides = array<i32>} : memref<3x468xf32, #tpu.memory_space<vmem>>, vector<1x16xf32>,
    %c0_126 = arith.constant 0 : index
    %c1_127 = arith.constant 1 : index
    %c10_128 = arith.constant 10 : index
    %c0_129 = arith.constant 0 : index
    %80 = vector.load %arg1[%c0_126, %c1_127, %c10_128, %c0_129] : memref<1x3x16x16xf32, #tpu.memory_space<vmem>>, vector<1x1x1x16xf32>
    %81 = vector.shape_cast %80 : vector<1x1x1x16xf32> to vector<1x16xf32>
    %c1_130 = arith.constant 1 : index
    %c242_131 = arith.constant 242 : index
    %82 = vector.load %arg4[%c1_130, %c242_131] : memref<3x468xf32, #tpu.memory_space<vmem>>, vector<1x16xf32>
    tpu.vector_store %arg4[%c1_130, %c242_131], %81 {strides = array<i32>} : memref<3x468xf32, #tpu.memory_space<vmem>>, vector<1x16xf32>,
    %c0_132 = arith.constant 0 : index
    %c1_133 = arith.constant 1 : index
    %c11_134 = arith.constant 11 : index
    %c0_135 = arith.constant 0 : index
    %83 = vector.load %arg1[%c0_132, %c1_133, %c11_134, %c0_135] : memref<1x3x16x16xf32, #tpu.memory_space<vmem>>, vector<1x1x1x16xf32>
    %84 = vector.shape_cast %83 : vector<1x1x1x16xf32> to vector<1x16xf32>
    %c1_136 = arith.constant 1 : index
    %c262_137 = arith.constant 262 : index
    %85 = vector.load %arg4[%c1_136, %c262_137] : memref<3x468xf32, #tpu.memory_space<vmem>>, vector<1x16xf32>
    tpu.vector_store %arg4[%c1_136, %c262_137], %84 {strides = array<i32>} : memref<3x468xf32, #tpu.memory_space<vmem>>, vector<1x16xf32>,
    %c0_138 = arith.constant 0 : index
    %c1_139 = arith.constant 1 : index
    %c12_140 = arith.constant 12 : index
    %c0_141 = arith.constant 0 : index
    %86 = vector.load %arg1[%c0_138, %c1_139, %c12_140, %c0_141] : memref<1x3x16x16xf32, #tpu.memory_space<vmem>>, vector<1x1x1x16xf32>
    %87 = vector.shape_cast %86 : vector<1x1x1x16xf32> to vector<1x16xf32>
    %c1_142 = arith.constant 1 : index
    %c282_143 = arith.constant 282 : index
    %88 = vector.load %arg4[%c1_142, %c282_143] : memref<3x468xf32, #tpu.memory_space<vmem>>, vector<1x16xf32>
    tpu.vector_store %arg4[%c1_142, %c282_143], %87 {strides = array<i32>} : memref<3x468xf32, #tpu.memory_space<vmem>>, vector<1x16xf32>,
    %c0_144 = arith.constant 0 : index
    %c1_145 = arith.constant 1 : index
    %c13_146 = arith.constant 13 : index
    %c0_147 = arith.constant 0 : index
    %89 = vector.load %arg1[%c0_144, %c1_145, %c13_146, %c0_147] : memref<1x3x16x16xf32, #tpu.memory_space<vmem>>, vector<1x1x1x16xf32>
    %90 = vector.shape_cast %89 : vector<1x1x1x16xf32> to vector<1x16xf32>
    %c1_148 = arith.constant 1 : index
    %c302_149 = arith.constant 302 : index
    %91 = vector.load %arg4[%c1_148, %c302_149] : memref<3x468xf32, #tpu.memory_space<vmem>>, vector<1x16xf32>
    tpu.vector_store %arg4[%c1_148, %c302_149], %90 {strides = array<i32>} : memref<3x468xf32, #tpu.memory_space<vmem>>, vector<1x16xf32>,
    %c0_150 = arith.constant 0 : index
    %c1_151 = arith.constant 1 : index
    %c14_152 = arith.constant 14 : index
    %c0_153 = arith.constant 0 : index
    %92 = vector.load %arg1[%c0_150, %c1_151, %c14_152, %c0_153] : memref<1x3x16x16xf32, #tpu.memory_space<vmem>>, vector<1x1x1x16xf32>
    %93 = vector.shape_cast %92 : vector<1x1x1x16xf32> to vector<1x16xf32>
    %c1_154 = arith.constant 1 : index
    %c322_155 = arith.constant 322 : index
    %94 = vector.load %arg4[%c1_154, %c322_155] : memref<3x468xf32, #tpu.memory_space<vmem>>, vector<1x16xf32>
    tpu.vector_store %arg4[%c1_154, %c322_155], %93 {strides = array<i32>} : memref<3x468xf32, #tpu.memory_space<vmem>>, vector<1x16xf32>,
    %c0_156 = arith.constant 0 : index
    %c1_157 = arith.constant 1 : index
    %c15_158 = arith.constant 15 : index
    %c0_159 = arith.constant 0 : index
    %95 = vector.load %arg1[%c0_156, %c1_157, %c15_158, %c0_159] : memref<1x3x16x16xf32, #tpu.memory_space<vmem>>, vector<1x1x1x16xf32>
    %96 = vector.shape_cast %95 : vector<1x1x1x16xf32> to vector<1x16xf32>
    %c1_160 = arith.constant 1 : index
    %c342_161 = arith.constant 342 : index
    %97 = vector.load %arg4[%c1_160, %c342_161] : memref<3x468xf32, #tpu.memory_space<vmem>>, vector<1x16xf32>
    tpu.vector_store %arg4[%c1_160, %c342_161], %96 {strides = array<i32>} : memref<3x468xf32, #tpu.memory_space<vmem>>, vector<1x16xf32>,
    %c0_162 = arith.constant 0 : index
    %c2_163 = arith.constant 2 : index
    %c0_164 = arith.constant 0 : index
    %c0_165 = arith.constant 0 : index
    %98 = vector.load %arg1[%c0_162, %c2_163, %c0_164, %c0_165] : memref<1x3x16x16xf32, #tpu.memory_space<vmem>>, vector<1x1x1x16xf32>
    %99 = vector.shape_cast %98 : vector<1x1x1x16xf32> to vector<1x16xf32>
    %c2_166 = arith.constant 2 : index
    %c42_167 = arith.constant 42 : index
    %100 = vector.load %arg4[%c2_166, %c42_167] : memref<3x468xf32, #tpu.memory_space<vmem>>, vector<1x16xf32>
    tpu.vector_store %arg4[%c2_166, %c42_167], %99 {strides = array<i32>} : memref<3x468xf32, #tpu.memory_space<vmem>>, vector<1x16xf32>,
    %c0_168 = arith.constant 0 : index
    %c2_169 = arith.constant 2 : index
    %c1_170 = arith.constant 1 : index
    %c0_171 = arith.constant 0 : index
    %101 = vector.load %arg1[%c0_168, %c2_169, %c1_170, %c0_171] : memref<1x3x16x16xf32, #tpu.memory_space<vmem>>, vector<1x1x1x16xf32>
    %102 = vector.shape_cast %101 : vector<1x1x1x16xf32> to vector<1x16xf32>
    %c2_172 = arith.constant 2 : index
    %c62_173 = arith.constant 62 : index
    %103 = vector.load %arg4[%c2_172, %c62_173] : memref<3x468xf32, #tpu.memory_space<vmem>>, vector<1x16xf32>
    tpu.vector_store %arg4[%c2_172, %c62_173], %102 {strides = array<i32>} : memref<3x468xf32, #tpu.memory_space<vmem>>, vector<1x16xf32>,
    %c0_174 = arith.constant 0 : index
    %c2_175 = arith.constant 2 : index
    %c2_176 = arith.constant 2 : index
    %c0_177 = arith.constant 0 : index
    %104 = vector.load %arg1[%c0_174, %c2_175, %c2_176, %c0_177] : memref<1x3x16x16xf32, #tpu.memory_space<vmem>>, vector<1x1x1x16xf32>
    %105 = vector.shape_cast %104 : vector<1x1x1x16xf32> to vector<1x16xf32>
    %c2_178 = arith.constant 2 : index
    %c82_179 = arith.constant 82 : index
    %106 = vector.load %arg4[%c2_178, %c82_179] : memref<3x468xf32, #tpu.memory_space<vmem>>, vector<1x16xf32>
    tpu.vector_store %arg4[%c2_178, %c82_179], %105 {strides = array<i32>} : memref<3x468xf32, #tpu.memory_space<vmem>>, vector<1x16xf32>,
    %c0_180 = arith.constant 0 : index
    %c2_181 = arith.constant 2 : index
    %c3_182 = arith.constant 3 : index
    %c0_183 = arith.constant 0 : index
    %107 = vector.load %arg1[%c0_180, %c2_181, %c3_182, %c0_183] : memref<1x3x16x16xf32, #tpu.memory_space<vmem>>, vector<1x1x1x16xf32>
    %108 = vector.shape_cast %107 : vector<1x1x1x16xf32> to vector<1x16xf32>
    %c2_184 = arith.constant 2 : index
    %c102_185 = arith.constant 102 : index
    %109 = vector.load %arg4[%c2_184, %c102_185] : memref<3x468xf32, #tpu.memory_space<vmem>>, vector<1x16xf32>
    tpu.vector_store %arg4[%c2_184, %c102_185], %108 {strides = array<i32>} : memref<3x468xf32, #tpu.memory_space<vmem>>, vector<1x16xf32>,
    %c0_186 = arith.constant 0 : index
    %c2_187 = arith.constant 2 : index
    %c4_188 = arith.constant 4 : index
    %c0_189 = arith.constant 0 : index
    %110 = vector.load %arg1[%c0_186, %c2_187, %c4_188, %c0_189] : memref<1x3x16x16xf32, #tpu.memory_space<vmem>>, vector<1x1x1x16xf32>
    %111 = vector.shape_cast %110 : vector<1x1x1x16xf32> to vector<1x16xf32>
    %c2_190 = arith.constant 2 : index
    %c122_191 = arith.constant 122 : index
    %112 = vector.load %arg4[%c2_190, %c122_191] : memref<3x468xf32, #tpu.memory_space<vmem>>, vector<1x16xf32>
    tpu.vector_store %arg4[%c2_190, %c122_191], %111 {strides = array<i32>} : memref<3x468xf32, #tpu.memory_space<vmem>>, vector<1x16xf32>,
    %c0_192 = arith.constant 0 : index
    %c2_193 = arith.constant 2 : index
    %c5_194 = arith.constant 5 : index
    %c0_195 = arith.constant 0 : index
    %113 = vector.load %arg1[%c0_192, %c2_193, %c5_194, %c0_195] : memref<1x3x16x16xf32, #tpu.memory_space<vmem>>, vector<1x1x1x16xf32>
    %114 = vector.shape_cast %113 : vector<1x1x1x16xf32> to vector<1x16xf32>
    %c2_196 = arith.constant 2 : index
    %c142_197 = arith.constant 142 : index
    %115 = vector.load %arg4[%c2_196, %c142_197] : memref<3x468xf32, #tpu.memory_space<vmem>>, vector<1x16xf32>
    tpu.vector_store %arg4[%c2_196, %c142_197], %114 {strides = array<i32>} : memref<3x468xf32, #tpu.memory_space<vmem>>, vector<1x16xf32>,
    %c0_198 = arith.constant 0 : index
    %c2_199 = arith.constant 2 : index
    %c6_200 = arith.constant 6 : index
    %c0_201 = arith.constant 0 : index
    %116 = vector.load %arg1[%c0_198, %c2_199, %c6_200, %c0_201] : memref<1x3x16x16xf32, #tpu.memory_space<vmem>>, vector<1x1x1x16xf32>
    %117 = vector.shape_cast %116 : vector<1x1x1x16xf32> to vector<1x16xf32>
    %c2_202 = arith.constant 2 : index
    %c162_203 = arith.constant 162 : index
    %118 = vector.load %arg4[%c2_202, %c162_203] : memref<3x468xf32, #tpu.memory_space<vmem>>, vector<1x16xf32>
    tpu.vector_store %arg4[%c2_202, %c162_203], %117 {strides = array<i32>} : memref<3x468xf32, #tpu.memory_space<vmem>>, vector<1x16xf32>,
    %c0_204 = arith.constant 0 : index
    %c2_205 = arith.constant 2 : index
    %c7_206 = arith.constant 7 : index
    %c0_207 = arith.constant 0 : index
    %119 = vector.load %arg1[%c0_204, %c2_205, %c7_206, %c0_207] : memref<1x3x16x16xf32, #tpu.memory_space<vmem>>, vector<1x1x1x16xf32>
    %120 = vector.shape_cast %119 : vector<1x1x1x16xf32> to vector<1x16xf32>
    %c2_208 = arith.constant 2 : index
    %c182_209 = arith.constant 182 : index
    %121 = vector.load %arg4[%c2_208, %c182_209] : memref<3x468xf32, #tpu.memory_space<vmem>>, vector<1x16xf32>
    tpu.vector_store %arg4[%c2_208, %c182_209], %120 {strides = array<i32>} : memref<3x468xf32, #tpu.memory_space<vmem>>, vector<1x16xf32>,
    %c0_210 = arith.constant 0 : index
    %c2_211 = arith.constant 2 : index
    %c8_212 = arith.constant 8 : index
    %c0_213 = arith.constant 0 : index
    %122 = vector.load %arg1[%c0_210, %c2_211, %c8_212, %c0_213] : memref<1x3x16x16xf32, #tpu.memory_space<vmem>>, vector<1x1x1x16xf32>
    %123 = vector.shape_cast %122 : vector<1x1x1x16xf32> to vector<1x16xf32>
    %c2_214 = arith.constant 2 : index
    %c202_215 = arith.constant 202 : index
    %124 = vector.load %arg4[%c2_214, %c202_215] : memref<3x468xf32, #tpu.memory_space<vmem>>, vector<1x16xf32>
    tpu.vector_store %arg4[%c2_214, %c202_215], %123 {strides = array<i32>} : memref<3x468xf32, #tpu.memory_space<vmem>>, vector<1x16xf32>,
    %c0_216 = arith.constant 0 : index
    %c2_217 = arith.constant 2 : index
    %c9_218 = arith.constant 9 : index
    %c0_219 = arith.constant 0 : index
    %125 = vector.load %arg1[%c0_216, %c2_217, %c9_218, %c0_219] : memref<1x3x16x16xf32, #tpu.memory_space<vmem>>, vector<1x1x1x16xf32>
    %126 = vector.shape_cast %125 : vector<1x1x1x16xf32> to vector<1x16xf32>
    %c2_220 = arith.constant 2 : index
    %c222_221 = arith.constant 222 : index
    %127 = vector.load %arg4[%c2_220, %c222_221] : memref<3x468xf32, #tpu.memory_space<vmem>>, vector<1x16xf32>
    tpu.vector_store %arg4[%c2_220, %c222_221], %126 {strides = array<i32>} : memref<3x468xf32, #tpu.memory_space<vmem>>, vector<1x16xf32>,
    %c0_222 = arith.constant 0 : index
    %c2_223 = arith.constant 2 : index
    %c10_224 = arith.constant 10 : index
    %c0_225 = arith.constant 0 : index
    %128 = vector.load %arg1[%c0_222, %c2_223, %c10_224, %c0_225] : memref<1x3x16x16xf32, #tpu.memory_space<vmem>>, vector<1x1x1x16xf32>
    %129 = vector.shape_cast %128 : vector<1x1x1x16xf32> to vector<1x16xf32>
    %c2_226 = arith.constant 2 : index
    %c242_227 = arith.constant 242 : index
    %130 = vector.load %arg4[%c2_226, %c242_227] : memref<3x468xf32, #tpu.memory_space<vmem>>, vector<1x16xf32>
    tpu.vector_store %arg4[%c2_226, %c242_227], %129 {strides = array<i32>} : memref<3x468xf32, #tpu.memory_space<vmem>>, vector<1x16xf32>,
    %c0_228 = arith.constant 0 : index
    %c2_229 = arith.constant 2 : index
    %c11_230 = arith.constant 11 : index
    %c0_231 = arith.constant 0 : index
    %131 = vector.load %arg1[%c0_228, %c2_229, %c11_230, %c0_231] : memref<1x3x16x16xf32, #tpu.memory_space<vmem>>, vector<1x1x1x16xf32>
    %132 = vector.shape_cast %131 : vector<1x1x1x16xf32> to vector<1x16xf32>
    %c2_232 = arith.constant 2 : index
    %c262_233 = arith.constant 262 : index
    %133 = vector.load %arg4[%c2_232, %c262_233] : memref<3x468xf32, #tpu.memory_space<vmem>>, vector<1x16xf32>
    tpu.vector_store %arg4[%c2_232, %c262_233], %132 {strides = array<i32>} : memref<3x468xf32, #tpu.memory_space<vmem>>, vector<1x16xf32>,
    %c0_234 = arith.constant 0 : index
    %c2_235 = arith.constant 2 : index
    %c12_236 = arith.constant 12 : index
    %c0_237 = arith.constant 0 : index
    %134 = vector.load %arg1[%c0_234, %c2_235, %c12_236, %c0_237] : memref<1x3x16x16xf32, #tpu.memory_space<vmem>>, vector<1x1x1x16xf32>
    %135 = vector.shape_cast %134 : vector<1x1x1x16xf32> to vector<1x16xf32>
    %c2_238 = arith.constant 2 : index
    %c282_239 = arith.constant 282 : index
    %136 = vector.load %arg4[%c2_238, %c282_239] : memref<3x468xf32, #tpu.memory_space<vmem>>, vector<1x16xf32>
    tpu.vector_store %arg4[%c2_238, %c282_239], %135 {strides = array<i32>} : memref<3x468xf32, #tpu.memory_space<vmem>>, vector<1x16xf32>,
    %c0_240 = arith.constant 0 : index
    %c2_241 = arith.constant 2 : index
    %c13_242 = arith.constant 13 : index
    %c0_243 = arith.constant 0 : index
    %137 = vector.load %arg1[%c0_240, %c2_241, %c13_242, %c0_243] : memref<1x3x16x16xf32, #tpu.memory_space<vmem>>, vector<1x1x1x16xf32>
    %138 = vector.shape_cast %137 : vector<1x1x1x16xf32> to vector<1x16xf32>
    %c2_244 = arith.constant 2 : index
    %c302_245 = arith.constant 302 : index
    %139 = vector.load %arg4[%c2_244, %c302_245] : memref<3x468xf32, #tpu.memory_space<vmem>>, vector<1x16xf32>
    tpu.vector_store %arg4[%c2_244, %c302_245], %138 {strides = array<i32>} : memref<3x468xf32, #tpu.memory_space<vmem>>, vector<1x16xf32>,
    %c0_246 = arith.constant 0 : index
    %c2_247 = arith.constant 2 : index
    %c14_248 = arith.constant 14 : index
    %c0_249 = arith.constant 0 : index
    %140 = vector.load %arg1[%c0_246, %c2_247, %c14_248, %c0_249] : memref<1x3x16x16xf32, #tpu.memory_space<vmem>>, vector<1x1x1x16xf32>
    %141 = vector.shape_cast %140 : vector<1x1x1x16xf32> to vector<1x16xf32>
    %c2_250 = arith.constant 2 : index
    %c322_251 = arith.constant 322 : index
    %142 = vector.load %arg4[%c2_250, %c322_251] : memref<3x468xf32, #tpu.memory_space<vmem>>, vector<1x16xf32>
    tpu.vector_store %arg4[%c2_250, %c322_251], %141 {strides = array<i32>} : memref<3x468xf32, #tpu.memory_space<vmem>>, vector<1x16xf32>,
    %c0_252 = arith.constant 0 : index
    %c2_253 = arith.constant 2 : index
    %c15_254 = arith.constant 15 : index
    %c0_255 = arith.constant 0 : index
    %143 = vector.load %arg1[%c0_252, %c2_253, %c15_254, %c0_255] : memref<1x3x16x16xf32, #tpu.memory_space<vmem>>, vector<1x1x1x16xf32>
    %144 = vector.shape_cast %143 : vector<1x1x1x16xf32> to vector<1x16xf32>
    %c2_256 = arith.constant 2 : index
    %c342_257 = arith.constant 342 : index
    %145 = vector.load %arg4[%c2_256, %c342_257] : memref<3x468xf32, #tpu.memory_space<vmem>>, vector<1x16xf32>
    tpu.vector_store %arg4[%c2_256, %c342_257], %144 {strides = array<i32>} : memref<3x468xf32, #tpu.memory_space<vmem>>, vector<1x16xf32>,
    %cst_258 = arith.constant 0.000000e+00 : f32
    %146 = vector.broadcast %cst_258 : f32 to vector<53x384xf32>
    %c75 = arith.constant 75 : index
    %c0_259 = arith.constant 0 : index
    %147 = vector.load %arg5[%c75, %c0_259] : memref<128x384xf32, #tpu.memory_space<vmem>>, vector<53x384xf32>
    tpu.vector_store %arg5[%c75, %c0_259], %146 {strides = array<i32>} : memref<128x384xf32, #tpu.memory_space<vmem>>, vector<53x384xf32>,
    %c0_260 = arith.constant 0 : index
    %c0_261 = arith.constant 0 : index
    %148 = vector.load %arg4[%c0_260, %c0_261] : memref<3x468xf32, #tpu.memory_space<vmem>>, vector<1x384xf32>
    %c0_262 = arith.constant 0 : index
    %c0_263 = arith.constant 0 : index
    %149 = vector.load %arg5[%c0_262, %c0_263] : memref<128x384xf32, #tpu.memory_space<vmem>>, vector<1x384xf32>
    tpu.vector_store %arg5[%c0_262, %c0_263], %148 {strides = array<i32>} : memref<128x384xf32, #tpu.memory_space<vmem>>, vector<1x384xf32>,
    %c0_264 = arith.constant 0 : index
    %c1_265 = arith.constant 1 : index
    %150 = vector.load %arg4[%c0_264, %c1_265] : memref<3x468xf32, #tpu.memory_space<vmem>>, vector<1x384xf32>
    %c1_266 = arith.constant 1 : index
    %c0_267 = arith.constant 0 : index
    %151 = vector.load %arg5[%c1_266, %c0_267] : memref<128x384xf32, #tpu.memory_space<vmem>>, vector<1x384xf32>
    tpu.vector_store %arg5[%c1_266, %c0_267], %150 {strides = array<i32>} : memref<128x384xf32, #tpu.memory_space<vmem>>, vector<1x384xf32>,
    %c0_268 = arith.constant 0 : index
    %c2_269 = arith.constant 2 : index
    %152 = vector.load %arg4[%c0_268, %c2_269] : memref<3x468xf32, #tpu.memory_space<vmem>>, vector<1x384xf32>
    %c2_270 = arith.constant 2 : index
    %c0_271 = arith.constant 0 : index
    %153 = vector.load %arg5[%c2_270, %c0_271] : memref<128x384xf32, #tpu.memory_space<vmem>>, vector<1x384xf32>
    tpu.vector_store %arg5[%c2_270, %c0_271], %152 {strides = array<i32>} : memref<128x384xf32, #tpu.memory_space<vmem>>, vector<1x384xf32>,
    %c0_272 = arith.constant 0 : index
    %c3_273 = arith.constant 3 : index
    %154 = vector.load %arg4[%c0_272, %c3_273] : memref<3x468xf32, #tpu.memory_space<vmem>>, vector<1x384xf32>
    %c3_274 = arith.constant 3 : index
    %c0_275 = arith.constant 0 : index
    %155 = vector.load %arg5[%c3_274, %c0_275] : memref<128x384xf32, #tpu.memory_space<vmem>>, vector<1x384xf32>
    tpu.vector_store %arg5[%c3_274, %c0_275], %154 {strides = array<i32>} : memref<128x384xf32, #tpu.memory_space<vmem>>, vector<1x384xf32>,
    %c0_276 = arith.constant 0 : index
    %c4_277 = arith.constant 4 : index
    %156 = vector.load %arg4[%c0_276, %c4_277] : memref<3x468xf32, #tpu.memory_space<vmem>>, vector<1x384xf32>
    %c4_278 = arith.constant 4 : index
    %c0_279 = arith.constant 0 : index
    %157 = vector.load %arg5[%c4_278, %c0_279] : memref<128x384xf32, #tpu.memory_space<vmem>>, vector<1x384xf32>
    tpu.vector_store %arg5[%c4_278, %c0_279], %156 {strides = array<i32>} : memref<128x384xf32, #tpu.memory_space<vmem>>, vector<1x384xf32>,
    %c0_280 = arith.constant 0 : index
    %c20 = arith.constant 20 : index
    %158 = vector.load %arg4[%c0_280, %c20] : memref<3x468xf32, #tpu.memory_space<vmem>>, vector<1x384xf32>
    %c5_281 = arith.constant 5 : index
    %c0_282 = arith.constant 0 : index
    %159 = vector.load %arg5[%c5_281, %c0_282] : memref<128x384xf32, #tpu.memory_space<vmem>>, vector<1x384xf32>
    tpu.vector_store %arg5[%c5_281, %c0_282], %158 {strides = array<i32>} : memref<128x384xf32, #tpu.memory_space<vmem>>, vector<1x384xf32>,
    %c0_283 = arith.constant 0 : index
    %c21 = arith.constant 21 : index
    %160 = vector.load %arg4[%c0_283, %c21] : memref<3x468xf32, #tpu.memory_space<vmem>>, vector<1x384xf32>
    %c6_284 = arith.constant 6 : index
    %c0_285 = arith.constant 0 : index
    %161 = vector.load %arg5[%c6_284, %c0_285] : memref<128x384xf32, #tpu.memory_space<vmem>>, vector<1x384xf32>
    tpu.vector_store %arg5[%c6_284, %c0_285], %160 {strides = array<i32>} : memref<128x384xf32, #tpu.memory_space<vmem>>, vector<1x384xf32>,
    %c0_286 = arith.constant 0 : index
    %c22 = arith.constant 22 : index
    %162 = vector.load %arg4[%c0_286, %c22] : memref<3x468xf32, #tpu.memory_space<vmem>>, vector<1x384xf32>
    %c7_287 = arith.constant 7 : index
    %c0_288 = arith.constant 0 : index
    %163 = vector.load %arg5[%c7_287, %c0_288] : memref<128x384xf32, #tpu.memory_space<vmem>>, vector<1x384xf32>
    tpu.vector_store %arg5[%c7_287, %c0_288], %162 {strides = array<i32>} : memref<128x384xf32, #tpu.memory_space<vmem>>, vector<1x384xf32>,
    %c0_289 = arith.constant 0 : index
    %c23 = arith.constant 23 : index
    %164 = vector.load %arg4[%c0_289, %c23] : memref<3x468xf32, #tpu.memory_space<vmem>>, vector<1x384xf32>
    %c8_290 = arith.constant 8 : index
    %c0_291 = arith.constant 0 : index
    %165 = vector.load %arg5[%c8_290, %c0_291] : memref<128x384xf32, #tpu.memory_space<vmem>>, vector<1x384xf32>
    tpu.vector_store %arg5[%c8_290, %c0_291], %164 {strides = array<i32>} : memref<128x384xf32, #tpu.memory_space<vmem>>, vector<1x384xf32>,
    %c0_292 = arith.constant 0 : index
    %c24 = arith.constant 24 : index
    %166 = vector.load %arg4[%c0_292, %c24] : memref<3x468xf32, #tpu.memory_space<vmem>>, vector<1x384xf32>
    %c9_293 = arith.constant 9 : index
    %c0_294 = arith.constant 0 : index
    %167 = vector.load %arg5[%c9_293, %c0_294] : memref<128x384xf32, #tpu.memory_space<vmem>>, vector<1x384xf32>
    tpu.vector_store %arg5[%c9_293, %c0_294], %166 {strides = array<i32>} : memref<128x384xf32, #tpu.memory_space<vmem>>, vector<1x384xf32>,
    %c0_295 = arith.constant 0 : index
    %c40 = arith.constant 40 : index
    %168 = vector.load %arg4[%c0_295, %c40] : memref<3x468xf32, #tpu.memory_space<vmem>>, vector<1x384xf32>
    %c10_296 = arith.constant 10 : index
    %c0_297 = arith.constant 0 : index
    %169 = vector.load %arg5[%c10_296, %c0_297] : memref<128x384xf32, #tpu.memory_space<vmem>>, vector<1x384xf32>
    tpu.vector_store %arg5[%c10_296, %c0_297], %168 {strides = array<i32>} : memref<128x384xf32, #tpu.memory_space<vmem>>, vector<1x384xf32>,
    %c0_298 = arith.constant 0 : index
    %c41 = arith.constant 41 : index
    %170 = vector.load %arg4[%c0_298, %c41] : memref<3x468xf32, #tpu.memory_space<vmem>>, vector<1x384xf32>
    %c11_299 = arith.constant 11 : index
    %c0_300 = arith.constant 0 : index
    %171 = vector.load %arg5[%c11_299, %c0_300] : memref<128x384xf32, #tpu.memory_space<vmem>>, vector<1x384xf32>
    tpu.vector_store %arg5[%c11_299, %c0_300], %170 {strides = array<i32>} : memref<128x384xf32, #tpu.memory_space<vmem>>, vector<1x384xf32>,
    %c0_301 = arith.constant 0 : index
    %c42_302 = arith.constant 42 : index
    %172 = vector.load %arg4[%c0_301, %c42_302] : memref<3x468xf32, #tpu.memory_space<vmem>>, vector<1x384xf32>
    %c12_303 = arith.constant 12 : index
    %c0_304 = arith.constant 0 : index
    %173 = vector.load %arg5[%c12_303, %c0_304] : memref<128x384xf32, #tpu.memory_space<vmem>>, vector<1x384xf32>
    tpu.vector_store %arg5[%c12_303, %c0_304], %172 {strides = array<i32>} : memref<128x384xf32, #tpu.memory_space<vmem>>, vector<1x384xf32>,
    %c0_305 = arith.constant 0 : index
    %c43 = arith.constant 43 : index
    %174 = vector.load %arg4[%c0_305, %c43] : memref<3x468xf32, #tpu.memory_space<vmem>>, vector<1x384xf32>
    %c13_306 = arith.constant 13 : index
    %c0_307 = arith.constant 0 : index
    %175 = vector.load %arg5[%c13_306, %c0_307] : memref<128x384xf32, #tpu.memory_space<vmem>>, vector<1x384xf32>
    tpu.vector_store %arg5[%c13_306, %c0_307], %174 {strides = array<i32>} : memref<128x384xf32, #tpu.memory_space<vmem>>, vector<1x384xf32>,
    %c0_308 = arith.constant 0 : index
    %c44 = arith.constant 44 : index
    %176 = vector.load %arg4[%c0_308, %c44] : memref<3x468xf32, #tpu.memory_space<vmem>>, vector<1x384xf32>
    %c14_309 = arith.constant 14 : index
    %c0_310 = arith.constant 0 : index
    %177 = vector.load %arg5[%c14_309, %c0_310] : memref<128x384xf32, #tpu.memory_space<vmem>>, vector<1x384xf32>
    tpu.vector_store %arg5[%c14_309, %c0_310], %176 {strides = array<i32>} : memref<128x384xf32, #tpu.memory_space<vmem>>, vector<1x384xf32>,
    %c0_311 = arith.constant 0 : index
    %c60 = arith.constant 60 : index
    %178 = vector.load %arg4[%c0_311, %c60] : memref<3x468xf32, #tpu.memory_space<vmem>>, vector<1x384xf32>
    %c15_312 = arith.constant 15 : index
    %c0_313 = arith.constant 0 : index
    %179 = vector.load %arg5[%c15_312, %c0_313] : memref<128x384xf32, #tpu.memory_space<vmem>>, vector<1x384xf32>
    tpu.vector_store %arg5[%c15_312, %c0_313], %178 {strides = array<i32>} : memref<128x384xf32, #tpu.memory_space<vmem>>, vector<1x384xf32>,
    %c0_314 = arith.constant 0 : index
    %c61 = arith.constant 61 : index
    %180 = vector.load %arg4[%c0_314, %c61] : memref<3x468xf32, #tpu.memory_space<vmem>>, vector<1x384xf32>
    %c16 = arith.constant 16 : index
    %c0_315 = arith.constant 0 : index
    %181 = vector.load %arg5[%c16, %c0_315] : memref<128x384xf32, #tpu.memory_space<vmem>>, vector<1x384xf32>
    tpu.vector_store %arg5[%c16, %c0_315], %180 {strides = array<i32>} : memref<128x384xf32, #tpu.memory_space<vmem>>, vector<1x384xf32>,
    %c0_316 = arith.constant 0 : index
    %c62_317 = arith.constant 62 : index
    %182 = vector.load %arg4[%c0_316, %c62_317] : memref<3x468xf32, #tpu.memory_space<vmem>>, vector<1x384xf32>
    %c17 = arith.constant 17 : index
    %c0_318 = arith.constant 0 : index
    %183 = vector.load %arg5[%c17, %c0_318] : memref<128x384xf32, #tpu.memory_space<vmem>>, vector<1x384xf32>
    tpu.vector_store %arg5[%c17, %c0_318], %182 {strides = array<i32>} : memref<128x384xf32, #tpu.memory_space<vmem>>, vector<1x384xf32>,
    %c0_319 = arith.constant 0 : index
    %c63 = arith.constant 63 : index
    %184 = vector.load %arg4[%c0_319, %c63] : memref<3x468xf32, #tpu.memory_space<vmem>>, vector<1x384xf32>
    %c18 = arith.constant 18 : index
    %c0_320 = arith.constant 0 : index
    %185 = vector.load %arg5[%c18, %c0_320] : memref<128x384xf32, #tpu.memory_space<vmem>>, vector<1x384xf32>
    tpu.vector_store %arg5[%c18, %c0_320], %184 {strides = array<i32>} : memref<128x384xf32, #tpu.memory_space<vmem>>, vector<1x384xf32>,
    %c0_321 = arith.constant 0 : index
    %c64 = arith.constant 64 : index
    %186 = vector.load %arg4[%c0_321, %c64] : memref<3x468xf32, #tpu.memory_space<vmem>>, vector<1x384xf32>
    %c19 = arith.constant 19 : index
    %c0_322 = arith.constant 0 : index
    %187 = vector.load %arg5[%c19, %c0_322] : memref<128x384xf32, #tpu.memory_space<vmem>>, vector<1x384xf32>
    tpu.vector_store %arg5[%c19, %c0_322], %186 {strides = array<i32>} : memref<128x384xf32, #tpu.memory_space<vmem>>, vector<1x384xf32>,
    %c0_323 = arith.constant 0 : index
    %c80 = arith.constant 80 : index
    %188 = vector.load %arg4[%c0_323, %c80] : memref<3x468xf32, #tpu.memory_space<vmem>>, vector<1x384xf32>
    %c20_324 = arith.constant 20 : index
    %c0_325 = arith.constant 0 : index
    %189 = vector.load %arg5[%c20_324, %c0_325] : memref<128x384xf32, #tpu.memory_space<vmem>>, vector<1x384xf32>
    tpu.vector_store %arg5[%c20_324, %c0_325], %188 {strides = array<i32>} : memref<128x384xf32, #tpu.memory_space<vmem>>, vector<1x384xf32>,
    %c0_326 = arith.constant 0 : index
    %c81 = arith.constant 81 : index
    %190 = vector.load %arg4[%c0_326, %c81] : memref<3x468xf32, #tpu.memory_space<vmem>>, vector<1x384xf32>
    %c21_327 = arith.constant 21 : index
    %c0_328 = arith.constant 0 : index
    %191 = vector.load %arg5[%c21_327, %c0_328] : memref<128x384xf32, #tpu.memory_space<vmem>>, vector<1x384xf32>
    tpu.vector_store %arg5[%c21_327, %c0_328], %190 {strides = array<i32>} : memref<128x384xf32, #tpu.memory_space<vmem>>, vector<1x384xf32>,
    %c0_329 = arith.constant 0 : index
    %c82_330 = arith.constant 82 : index
    %192 = vector.load %arg4[%c0_329, %c82_330] : memref<3x468xf32, #tpu.memory_space<vmem>>, vector<1x384xf32>
    %c22_331 = arith.constant 22 : index
    %c0_332 = arith.constant 0 : index
    %193 = vector.load %arg5[%c22_331, %c0_332] : memref<128x384xf32, #tpu.memory_space<vmem>>, vector<1x384xf32>
    tpu.vector_store %arg5[%c22_331, %c0_332], %192 {strides = array<i32>} : memref<128x384xf32, #tpu.memory_space<vmem>>, vector<1x384xf32>,
    %c0_333 = arith.constant 0 : index
    %c83 = arith.constant 83 : index
    %194 = vector.load %arg4[%c0_333, %c83] : memref<3x468xf32, #tpu.memory_space<vmem>>, vector<1x384xf32>
    %c23_334 = arith.constant 23 : index
    %c0_335 = arith.constant 0 : index
    %195 = vector.load %arg5[%c23_334, %c0_335] : memref<128x384xf32, #tpu.memory_space<vmem>>, vector<1x384xf32>
    tpu.vector_store %arg5[%c23_334, %c0_335], %194 {strides = array<i32>} : memref<128x384xf32, #tpu.memory_space<vmem>>, vector<1x384xf32>,
    %c0_336 = arith.constant 0 : index
    %c84 = arith.constant 84 : index
    %196 = vector.load %arg4[%c0_336, %c84] : memref<3x468xf32, #tpu.memory_space<vmem>>, vector<1x384xf32>
    %c24_337 = arith.constant 24 : index
    %c0_338 = arith.constant 0 : index
    %197 = vector.load %arg5[%c24_337, %c0_338] : memref<128x384xf32, #tpu.memory_space<vmem>>, vector<1x384xf32>
    tpu.vector_store %arg5[%c24_337, %c0_338], %196 {strides = array<i32>} : memref<128x384xf32, #tpu.memory_space<vmem>>, vector<1x384xf32>,
    %c1_339 = arith.constant 1 : index
    %c0_340 = arith.constant 0 : index
    %198 = vector.load %arg4[%c1_339, %c0_340] : memref<3x468xf32, #tpu.memory_space<vmem>>, vector<1x384xf32>
    %c25 = arith.constant 25 : index
    %c0_341 = arith.constant 0 : index
    %199 = vector.load %arg5[%c25, %c0_341] : memref<128x384xf32, #tpu.memory_space<vmem>>, vector<1x384xf32>
    tpu.vector_store %arg5[%c25, %c0_341], %198 {strides = array<i32>} : memref<128x384xf32, #tpu.memory_space<vmem>>, vector<1x384xf32>,
    %c1_342 = arith.constant 1 : index
    %c1_343 = arith.constant 1 : index
    %200 = vector.load %arg4[%c1_342, %c1_343] : memref<3x468xf32, #tpu.memory_space<vmem>>, vector<1x384xf32>
    %c26 = arith.constant 26 : index
    %c0_344 = arith.constant 0 : index
    %201 = vector.load %arg5[%c26, %c0_344] : memref<128x384xf32, #tpu.memory_space<vmem>>, vector<1x384xf32>
    tpu.vector_store %arg5[%c26, %c0_344], %200 {strides = array<i32>} : memref<128x384xf32, #tpu.memory_space<vmem>>, vector<1x384xf32>,
    %c1_345 = arith.constant 1 : index
    %c2_346 = arith.constant 2 : index
    %202 = vector.load %arg4[%c1_345, %c2_346] : memref<3x468xf32, #tpu.memory_space<vmem>>, vector<1x384xf32>
    %c27 = arith.constant 27 : index
    %c0_347 = arith.constant 0 : index
    %203 = vector.load %arg5[%c27, %c0_347] : memref<128x384xf32, #tpu.memory_space<vmem>>, vector<1x384xf32>
    tpu.vector_store %arg5[%c27, %c0_347], %202 {strides = array<i32>} : memref<128x384xf32, #tpu.memory_space<vmem>>, vector<1x384xf32>,
    %c1_348 = arith.constant 1 : index
    %c3_349 = arith.constant 3 : index
    %204 = vector.load %arg4[%c1_348, %c3_349] : memref<3x468xf32, #tpu.memory_space<vmem>>, vector<1x384xf32>
    %c28 = arith.constant 28 : index
    %c0_350 = arith.constant 0 : index
    %205 = vector.load %arg5[%c28, %c0_350] : memref<128x384xf32, #tpu.memory_space<vmem>>, vector<1x384xf32>
    tpu.vector_store %arg5[%c28, %c0_350], %204 {strides = array<i32>} : memref<128x384xf32, #tpu.memory_space<vmem>>, vector<1x384xf32>,
    %c1_351 = arith.constant 1 : index
    %c4_352 = arith.constant 4 : index
    %206 = vector.load %arg4[%c1_351, %c4_352] : memref<3x468xf32, #tpu.memory_space<vmem>>, vector<1x384xf32>
    %c29 = arith.constant 29 : index
    %c0_353 = arith.constant 0 : index
    %207 = vector.load %arg5[%c29, %c0_353] : memref<128x384xf32, #tpu.memory_space<vmem>>, vector<1x384xf32>
    tpu.vector_store %arg5[%c29, %c0_353], %206 {strides = array<i32>} : memref<128x384xf32, #tpu.memory_space<vmem>>, vector<1x384xf32>,
    %c1_354 = arith.constant 1 : index
    %c20_355 = arith.constant 20 : index
    %208 = vector.load %arg4[%c1_354, %c20_355] : memref<3x468xf32, #tpu.memory_space<vmem>>, vector<1x384xf32>
    %c30 = arith.constant 30 : index
    %c0_356 = arith.constant 0 : index
    %209 = vector.load %arg5[%c30, %c0_356] : memref<128x384xf32, #tpu.memory_space<vmem>>, vector<1x384xf32>
    tpu.vector_store %arg5[%c30, %c0_356], %208 {strides = array<i32>} : memref<128x384xf32, #tpu.memory_space<vmem>>, vector<1x384xf32>,
    %c1_357 = arith.constant 1 : index
    %c21_358 = arith.constant 21 : index
    %210 = vector.load %arg4[%c1_357, %c21_358] : memref<3x468xf32, #tpu.memory_space<vmem>>, vector<1x384xf32>
    %c31 = arith.constant 31 : index
    %c0_359 = arith.constant 0 : index
    %211 = vector.load %arg5[%c31, %c0_359] : memref<128x384xf32, #tpu.memory_space<vmem>>, vector<1x384xf32>
    tpu.vector_store %arg5[%c31, %c0_359], %210 {strides = array<i32>} : memref<128x384xf32, #tpu.memory_space<vmem>>, vector<1x384xf32>,
    %c1_360 = arith.constant 1 : index
    %c22_361 = arith.constant 22 : index
    %212 = vector.load %arg4[%c1_360, %c22_361] : memref<3x468xf32, #tpu.memory_space<vmem>>, vector<1x384xf32>
    %c32 = arith.constant 32 : index
    %c0_362 = arith.constant 0 : index
    %213 = vector.load %arg5[%c32, %c0_362] : memref<128x384xf32, #tpu.memory_space<vmem>>, vector<1x384xf32>
    tpu.vector_store %arg5[%c32, %c0_362], %212 {strides = array<i32>} : memref<128x384xf32, #tpu.memory_space<vmem>>, vector<1x384xf32>,
    %c1_363 = arith.constant 1 : index
    %c23_364 = arith.constant 23 : index
    %214 = vector.load %arg4[%c1_363, %c23_364] : memref<3x468xf32, #tpu.memory_space<vmem>>, vector<1x384xf32>
    %c33 = arith.constant 33 : index
    %c0_365 = arith.constant 0 : index
    %215 = vector.load %arg5[%c33, %c0_365] : memref<128x384xf32, #tpu.memory_space<vmem>>, vector<1x384xf32>
    tpu.vector_store %arg5[%c33, %c0_365], %214 {strides = array<i32>} : memref<128x384xf32, #tpu.memory_space<vmem>>, vector<1x384xf32>,
    %c1_366 = arith.constant 1 : index
    %c24_367 = arith.constant 24 : index
    %216 = vector.load %arg4[%c1_366, %c24_367] : memref<3x468xf32, #tpu.memory_space<vmem>>, vector<1x384xf32>
    %c34 = arith.constant 34 : index
    %c0_368 = arith.constant 0 : index
    %217 = vector.load %arg5[%c34, %c0_368] : memref<128x384xf32, #tpu.memory_space<vmem>>, vector<1x384xf32>
    tpu.vector_store %arg5[%c34, %c0_368], %216 {strides = array<i32>} : memref<128x384xf32, #tpu.memory_space<vmem>>, vector<1x384xf32>,
    %c1_369 = arith.constant 1 : index
    %c40_370 = arith.constant 40 : index
    %218 = vector.load %arg4[%c1_369, %c40_370] : memref<3x468xf32, #tpu.memory_space<vmem>>, vector<1x384xf32>
    %c35 = arith.constant 35 : index
    %c0_371 = arith.constant 0 : index
    %219 = vector.load %arg5[%c35, %c0_371] : memref<128x384xf32, #tpu.memory_space<vmem>>, vector<1x384xf32>
    tpu.vector_store %arg5[%c35, %c0_371], %218 {strides = array<i32>} : memref<128x384xf32, #tpu.memory_space<vmem>>, vector<1x384xf32>,
    %c1_372 = arith.constant 1 : index
    %c41_373 = arith.constant 41 : index
    %220 = vector.load %arg4[%c1_372, %c41_373] : memref<3x468xf32, #tpu.memory_space<vmem>>, vector<1x384xf32>
    %c36 = arith.constant 36 : index
    %c0_374 = arith.constant 0 : index
    %221 = vector.load %arg5[%c36, %c0_374] : memref<128x384xf32, #tpu.memory_space<vmem>>, vector<1x384xf32>
    tpu.vector_store %arg5[%c36, %c0_374], %220 {strides = array<i32>} : memref<128x384xf32, #tpu.memory_space<vmem>>, vector<1x384xf32>,
    %c1_375 = arith.constant 1 : index
    %c42_376 = arith.constant 42 : index
    %222 = vector.load %arg4[%c1_375, %c42_376] : memref<3x468xf32, #tpu.memory_space<vmem>>, vector<1x384xf32>
    %c37 = arith.constant 37 : index
    %c0_377 = arith.constant 0 : index
    %223 = vector.load %arg5[%c37, %c0_377] : memref<128x384xf32, #tpu.memory_space<vmem>>, vector<1x384xf32>
    tpu.vector_store %arg5[%c37, %c0_377], %222 {strides = array<i32>} : memref<128x384xf32, #tpu.memory_space<vmem>>, vector<1x384xf32>,
    %c1_378 = arith.constant 1 : index
    %c43_379 = arith.constant 43 : index
    %224 = vector.load %arg4[%c1_378, %c43_379] : memref<3x468xf32, #tpu.memory_space<vmem>>, vector<1x384xf32>
    %c38 = arith.constant 38 : index
    %c0_380 = arith.constant 0 : index
    %225 = vector.load %arg5[%c38, %c0_380] : memref<128x384xf32, #tpu.memory_space<vmem>>, vector<1x384xf32>
    tpu.vector_store %arg5[%c38, %c0_380], %224 {strides = array<i32>} : memref<128x384xf32, #tpu.memory_space<vmem>>, vector<1x384xf32>,
    %c1_381 = arith.constant 1 : index
    %c44_382 = arith.constant 44 : index
    %226 = vector.load %arg4[%c1_381, %c44_382] : memref<3x468xf32, #tpu.memory_space<vmem>>, vector<1x384xf32>
    %c39 = arith.constant 39 : index
    %c0_383 = arith.constant 0 : index
    %227 = vector.load %arg5[%c39, %c0_383] : memref<128x384xf32, #tpu.memory_space<vmem>>, vector<1x384xf32>
    tpu.vector_store %arg5[%c39, %c0_383], %226 {strides = array<i32>} : memref<128x384xf32, #tpu.memory_space<vmem>>, vector<1x384xf32>,
    %c1_384 = arith.constant 1 : index
    %c60_385 = arith.constant 60 : index
    %228 = vector.load %arg4[%c1_384, %c60_385] : memref<3x468xf32, #tpu.memory_space<vmem>>, vector<1x384xf32>
    %c40_386 = arith.constant 40 : index
    %c0_387 = arith.constant 0 : index
    %229 = vector.load %arg5[%c40_386, %c0_387] : memref<128x384xf32, #tpu.memory_space<vmem>>, vector<1x384xf32>
    tpu.vector_store %arg5[%c40_386, %c0_387], %228 {strides = array<i32>} : memref<128x384xf32, #tpu.memory_space<vmem>>, vector<1x384xf32>,
    %c1_388 = arith.constant 1 : index
    %c61_389 = arith.constant 61 : index
    %230 = vector.load %arg4[%c1_388, %c61_389] : memref<3x468xf32, #tpu.memory_space<vmem>>, vector<1x384xf32>
    %c41_390 = arith.constant 41 : index
    %c0_391 = arith.constant 0 : index
    %231 = vector.load %arg5[%c41_390, %c0_391] : memref<128x384xf32, #tpu.memory_space<vmem>>, vector<1x384xf32>
    tpu.vector_store %arg5[%c41_390, %c0_391], %230 {strides = array<i32>} : memref<128x384xf32, #tpu.memory_space<vmem>>, vector<1x384xf32>,
    %c1_392 = arith.constant 1 : index
    %c62_393 = arith.constant 62 : index
    %232 = vector.load %arg4[%c1_392, %c62_393] : memref<3x468xf32, #tpu.memory_space<vmem>>, vector<1x384xf32>
    %c42_394 = arith.constant 42 : index
    %c0_395 = arith.constant 0 : index
    %233 = vector.load %arg5[%c42_394, %c0_395] : memref<128x384xf32, #tpu.memory_space<vmem>>, vector<1x384xf32>
    tpu.vector_store %arg5[%c42_394, %c0_395], %232 {strides = array<i32>} : memref<128x384xf32, #tpu.memory_space<vmem>>, vector<1x384xf32>,
    %c1_396 = arith.constant 1 : index
    %c63_397 = arith.constant 63 : index
    %234 = vector.load %arg4[%c1_396, %c63_397] : memref<3x468xf32, #tpu.memory_space<vmem>>, vector<1x384xf32>
    %c43_398 = arith.constant 43 : index
    %c0_399 = arith.constant 0 : index
    %235 = vector.load %arg5[%c43_398, %c0_399] : memref<128x384xf32, #tpu.memory_space<vmem>>, vector<1x384xf32>
    tpu.vector_store %arg5[%c43_398, %c0_399], %234 {strides = array<i32>} : memref<128x384xf32, #tpu.memory_space<vmem>>, vector<1x384xf32>,
    %c1_400 = arith.constant 1 : index
    %c64_401 = arith.constant 64 : index
    %236 = vector.load %arg4[%c1_400, %c64_401] : memref<3x468xf32, #tpu.memory_space<vmem>>, vector<1x384xf32>
    %c44_402 = arith.constant 44 : index
    %c0_403 = arith.constant 0 : index
    %237 = vector.load %arg5[%c44_402, %c0_403] : memref<128x384xf32, #tpu.memory_space<vmem>>, vector<1x384xf32>
    tpu.vector_store %arg5[%c44_402, %c0_403], %236 {strides = array<i32>} : memref<128x384xf32, #tpu.memory_space<vmem>>, vector<1x384xf32>,
    %c1_404 = arith.constant 1 : index
    %c80_405 = arith.constant 80 : index
    %238 = vector.load %arg4[%c1_404, %c80_405] : memref<3x468xf32, #tpu.memory_space<vmem>>, vector<1x384xf32>
    %c45 = arith.constant 45 : index
    %c0_406 = arith.constant 0 : index
    %239 = vector.load %arg5[%c45, %c0_406] : memref<128x384xf32, #tpu.memory_space<vmem>>, vector<1x384xf32>
    tpu.vector_store %arg5[%c45, %c0_406], %238 {strides = array<i32>} : memref<128x384xf32, #tpu.memory_space<vmem>>, vector<1x384xf32>,
    %c1_407 = arith.constant 1 : index
    %c81_408 = arith.constant 81 : index
    %240 = vector.load %arg4[%c1_407, %c81_408] : memref<3x468xf32, #tpu.memory_space<vmem>>, vector<1x384xf32>
    %c46 = arith.constant 46 : index
    %c0_409 = arith.constant 0 : index
    %241 = vector.load %arg5[%c46, %c0_409] : memref<128x384xf32, #tpu.memory_space<vmem>>, vector<1x384xf32>
    tpu.vector_store %arg5[%c46, %c0_409], %240 {strides = array<i32>} : memref<128x384xf32, #tpu.memory_space<vmem>>, vector<1x384xf32>,
    %c1_410 = arith.constant 1 : index
    %c82_411 = arith.constant 82 : index
    %242 = vector.load %arg4[%c1_410, %c82_411] : memref<3x468xf32, #tpu.memory_space<vmem>>, vector<1x384xf32>
    %c47 = arith.constant 47 : index
    %c0_412 = arith.constant 0 : index
    %243 = vector.load %arg5[%c47, %c0_412] : memref<128x384xf32, #tpu.memory_space<vmem>>, vector<1x384xf32>
    tpu.vector_store %arg5[%c47, %c0_412], %242 {strides = array<i32>} : memref<128x384xf32, #tpu.memory_space<vmem>>, vector<1x384xf32>,
    %c1_413 = arith.constant 1 : index
    %c83_414 = arith.constant 83 : index
    %244 = vector.load %arg4[%c1_413, %c83_414] : memref<3x468xf32, #tpu.memory_space<vmem>>, vector<1x384xf32>
    %c48 = arith.constant 48 : index
    %c0_415 = arith.constant 0 : index
    %245 = vector.load %arg5[%c48, %c0_415] : memref<128x384xf32, #tpu.memory_space<vmem>>, vector<1x384xf32>
    tpu.vector_store %arg5[%c48, %c0_415], %244 {strides = array<i32>} : memref<128x384xf32, #tpu.memory_space<vmem>>, vector<1x384xf32>,
    %c1_416 = arith.constant 1 : index
    %c84_417 = arith.constant 84 : index
    %246 = vector.load %arg4[%c1_416, %c84_417] : memref<3x468xf32, #tpu.memory_space<vmem>>, vector<1x384xf32>
    %c49 = arith.constant 49 : index
    %c0_418 = arith.constant 0 : index
    %247 = vector.load %arg5[%c49, %c0_418] : memref<128x384xf32, #tpu.memory_space<vmem>>, vector<1x384xf32>
    tpu.vector_store %arg5[%c49, %c0_418], %246 {strides = array<i32>} : memref<128x384xf32, #tpu.memory_space<vmem>>, vector<1x384xf32>,
    %c2_419 = arith.constant 2 : index
    %c0_420 = arith.constant 0 : index
    %248 = vector.load %arg4[%c2_419, %c0_420] : memref<3x468xf32, #tpu.memory_space<vmem>>, vector<1x384xf32>
    %c50 = arith.constant 50 : index
    %c0_421 = arith.constant 0 : index
    %249 = vector.load %arg5[%c50, %c0_421] : memref<128x384xf32, #tpu.memory_space<vmem>>, vector<1x384xf32>
    tpu.vector_store %arg5[%c50, %c0_421], %248 {strides = array<i32>} : memref<128x384xf32, #tpu.memory_space<vmem>>, vector<1x384xf32>,
    %c2_422 = arith.constant 2 : index
    %c1_423 = arith.constant 1 : index
    %250 = vector.load %arg4[%c2_422, %c1_423] : memref<3x468xf32, #tpu.memory_space<vmem>>, vector<1x384xf32>
    %c51 = arith.constant 51 : index
    %c0_424 = arith.constant 0 : index
    %251 = vector.load %arg5[%c51, %c0_424] : memref<128x384xf32, #tpu.memory_space<vmem>>, vector<1x384xf32>
    tpu.vector_store %arg5[%c51, %c0_424], %250 {strides = array<i32>} : memref<128x384xf32, #tpu.memory_space<vmem>>, vector<1x384xf32>,
    %c2_425 = arith.constant 2 : index
    %c2_426 = arith.constant 2 : index
    %252 = vector.load %arg4[%c2_425, %c2_426] : memref<3x468xf32, #tpu.memory_space<vmem>>, vector<1x384xf32>
    %c52 = arith.constant 52 : index
    %c0_427 = arith.constant 0 : index
    %253 = vector.load %arg5[%c52, %c0_427] : memref<128x384xf32, #tpu.memory_space<vmem>>, vector<1x384xf32>
    tpu.vector_store %arg5[%c52, %c0_427], %252 {strides = array<i32>} : memref<128x384xf32, #tpu.memory_space<vmem>>, vector<1x384xf32>,
    %c2_428 = arith.constant 2 : index
    %c3_429 = arith.constant 3 : index
    %254 = vector.load %arg4[%c2_428, %c3_429] : memref<3x468xf32, #tpu.memory_space<vmem>>, vector<1x384xf32>
    %c53 = arith.constant 53 : index
    %c0_430 = arith.constant 0 : index
    %255 = vector.load %arg5[%c53, %c0_430] : memref<128x384xf32, #tpu.memory_space<vmem>>, vector<1x384xf32>
    tpu.vector_store %arg5[%c53, %c0_430], %254 {strides = array<i32>} : memref<128x384xf32, #tpu.memory_space<vmem>>, vector<1x384xf32>,
    %c2_431 = arith.constant 2 : index
    %c4_432 = arith.constant 4 : index
    %256 = vector.load %arg4[%c2_431, %c4_432] : memref<3x468xf32, #tpu.memory_space<vmem>>, vector<1x384xf32>
    %c54 = arith.constant 54 : index
    %c0_433 = arith.constant 0 : index
    %257 = vector.load %arg5[%c54, %c0_433] : memref<128x384xf32, #tpu.memory_space<vmem>>, vector<1x384xf32>
    tpu.vector_store %arg5[%c54, %c0_433], %256 {strides = array<i32>} : memref<128x384xf32, #tpu.memory_space<vmem>>, vector<1x384xf32>,
    %c2_434 = arith.constant 2 : index
    %c20_435 = arith.constant 20 : index
    %258 = vector.load %arg4[%c2_434, %c20_435] : memref<3x468xf32, #tpu.memory_space<vmem>>, vector<1x384xf32>
    %c55 = arith.constant 55 : index
    %c0_436 = arith.constant 0 : index
    %259 = vector.load %arg5[%c55, %c0_436] : memref<128x384xf32, #tpu.memory_space<vmem>>, vector<1x384xf32>
    tpu.vector_store %arg5[%c55, %c0_436], %258 {strides = array<i32>} : memref<128x384xf32, #tpu.memory_space<vmem>>, vector<1x384xf32>,
    %c2_437 = arith.constant 2 : index
    %c21_438 = arith.constant 21 : index
    %260 = vector.load %arg4[%c2_437, %c21_438] : memref<3x468xf32, #tpu.memory_space<vmem>>, vector<1x384xf32>
    %c56 = arith.constant 56 : index
    %c0_439 = arith.constant 0 : index
    %261 = vector.load %arg5[%c56, %c0_439] : memref<128x384xf32, #tpu.memory_space<vmem>>, vector<1x384xf32>
    tpu.vector_store %arg5[%c56, %c0_439], %260 {strides = array<i32>} : memref<128x384xf32, #tpu.memory_space<vmem>>, vector<1x384xf32>,
    %c2_440 = arith.constant 2 : index
    %c22_441 = arith.constant 22 : index
    %262 = vector.load %arg4[%c2_440, %c22_441] : memref<3x468xf32, #tpu.memory_space<vmem>>, vector<1x384xf32>
    %c57 = arith.constant 57 : index
    %c0_442 = arith.constant 0 : index
    %263 = vector.load %arg5[%c57, %c0_442] : memref<128x384xf32, #tpu.memory_space<vmem>>, vector<1x384xf32>
    tpu.vector_store %arg5[%c57, %c0_442], %262 {strides = array<i32>} : memref<128x384xf32, #tpu.memory_space<vmem>>, vector<1x384xf32>,
    %c2_443 = arith.constant 2 : index
    %c23_444 = arith.constant 23 : index
    %264 = vector.load %arg4[%c2_443, %c23_444] : memref<3x468xf32, #tpu.memory_space<vmem>>, vector<1x384xf32>
    %c58 = arith.constant 58 : index
    %c0_445 = arith.constant 0 : index
    %265 = vector.load %arg5[%c58, %c0_445] : memref<128x384xf32, #tpu.memory_space<vmem>>, vector<1x384xf32>
    tpu.vector_store %arg5[%c58, %c0_445], %264 {strides = array<i32>} : memref<128x384xf32, #tpu.memory_space<vmem>>, vector<1x384xf32>,
    %c2_446 = arith.constant 2 : index
    %c24_447 = arith.constant 24 : index
    %266 = vector.load %arg4[%c2_446, %c24_447] : memref<3x468xf32, #tpu.memory_space<vmem>>, vector<1x384xf32>
    %c59 = arith.constant 59 : index
    %c0_448 = arith.constant 0 : index
    %267 = vector.load %arg5[%c59, %c0_448] : memref<128x384xf32, #tpu.memory_space<vmem>>, vector<1x384xf32>
    tpu.vector_store %arg5[%c59, %c0_448], %266 {strides = array<i32>} : memref<128x384xf32, #tpu.memory_space<vmem>>, vector<1x384xf32>,
    %c2_449 = arith.constant 2 : index
    %c40_450 = arith.constant 40 : index
    %268 = vector.load %arg4[%c2_449, %c40_450] : memref<3x468xf32, #tpu.memory_space<vmem>>, vector<1x384xf32>
    %c60_451 = arith.constant 60 : index
    %c0_452 = arith.constant 0 : index
    %269 = vector.load %arg5[%c60_451, %c0_452] : memref<128x384xf32, #tpu.memory_space<vmem>>, vector<1x384xf32>
    tpu.vector_store %arg5[%c60_451, %c0_452], %268 {strides = array<i32>} : memref<128x384xf32, #tpu.memory_space<vmem>>, vector<1x384xf32>,
    %c2_453 = arith.constant 2 : index
    %c41_454 = arith.constant 41 : index
    %270 = vector.load %arg4[%c2_453, %c41_454] : memref<3x468xf32, #tpu.memory_space<vmem>>, vector<1x384xf32>
    %c61_455 = arith.constant 61 : index
    %c0_456 = arith.constant 0 : index
    %271 = vector.load %arg5[%c61_455, %c0_456] : memref<128x384xf32, #tpu.memory_space<vmem>>, vector<1x384xf32>
    tpu.vector_store %arg5[%c61_455, %c0_456], %270 {strides = array<i32>} : memref<128x384xf32, #tpu.memory_space<vmem>>, vector<1x384xf32>,
    %c2_457 = arith.constant 2 : index
    %c42_458 = arith.constant 42 : index
    %272 = vector.load %arg4[%c2_457, %c42_458] : memref<3x468xf32, #tpu.memory_space<vmem>>, vector<1x384xf32>
    %c62_459 = arith.constant 62 : index
    %c0_460 = arith.constant 0 : index
    %273 = vector.load %arg5[%c62_459, %c0_460] : memref<128x384xf32, #tpu.memory_space<vmem>>, vector<1x384xf32>
    tpu.vector_store %arg5[%c62_459, %c0_460], %272 {strides = array<i32>} : memref<128x384xf32, #tpu.memory_space<vmem>>, vector<1x384xf32>,
    %c2_461 = arith.constant 2 : index
    %c43_462 = arith.constant 43 : index
    %274 = vector.load %arg4[%c2_461, %c43_462] : memref<3x468xf32, #tpu.memory_space<vmem>>, vector<1x384xf32>
    %c63_463 = arith.constant 63 : index
    %c0_464 = arith.constant 0 : index
    %275 = vector.load %arg5[%c63_463, %c0_464] : memref<128x384xf32, #tpu.memory_space<vmem>>, vector<1x384xf32>
    tpu.vector_store %arg5[%c63_463, %c0_464], %274 {strides = array<i32>} : memref<128x384xf32, #tpu.memory_space<vmem>>, vector<1x384xf32>,
    %c2_465 = arith.constant 2 : index
    %c44_466 = arith.constant 44 : index
    %276 = vector.load %arg4[%c2_465, %c44_466] : memref<3x468xf32, #tpu.memory_space<vmem>>, vector<1x384xf32>
    %c64_467 = arith.constant 64 : index
    %c0_468 = arith.constant 0 : index
    %277 = vector.load %arg5[%c64_467, %c0_468] : memref<128x384xf32, #tpu.memory_space<vmem>>, vector<1x384xf32>
    tpu.vector_store %arg5[%c64_467, %c0_468], %276 {strides = array<i32>} : memref<128x384xf32, #tpu.memory_space<vmem>>, vector<1x384xf32>,
    %c2_469 = arith.constant 2 : index
    %c60_470 = arith.constant 60 : index
    %278 = vector.load %arg4[%c2_469, %c60_470] : memref<3x468xf32, #tpu.memory_space<vmem>>, vector<1x384xf32>
    %c65 = arith.constant 65 : index
    %c0_471 = arith.constant 0 : index
    %279 = vector.load %arg5[%c65, %c0_471] : memref<128x384xf32, #tpu.memory_space<vmem>>, vector<1x384xf32>
    tpu.vector_store %arg5[%c65, %c0_471], %278 {strides = array<i32>} : memref<128x384xf32, #tpu.memory_space<vmem>>, vector<1x384xf32>,
    %c2_472 = arith.constant 2 : index
    %c61_473 = arith.constant 61 : index
    %280 = vector.load %arg4[%c2_472, %c61_473] : memref<3x468xf32, #tpu.memory_space<vmem>>, vector<1x384xf32>
    %c66 = arith.constant 66 : index
    %c0_474 = arith.constant 0 : index
    %281 = vector.load %arg5[%c66, %c0_474] : memref<128x384xf32, #tpu.memory_space<vmem>>, vector<1x384xf32>
    tpu.vector_store %arg5[%c66, %c0_474], %280 {strides = array<i32>} : memref<128x384xf32, #tpu.memory_space<vmem>>, vector<1x384xf32>,
    %c2_475 = arith.constant 2 : index
    %c62_476 = arith.constant 62 : index
    %282 = vector.load %arg4[%c2_475, %c62_476] : memref<3x468xf32, #tpu.memory_space<vmem>>, vector<1x384xf32>
    %c67 = arith.constant 67 : index
    %c0_477 = arith.constant 0 : index
    %283 = vector.load %arg5[%c67, %c0_477] : memref<128x384xf32, #tpu.memory_space<vmem>>, vector<1x384xf32>
    tpu.vector_store %arg5[%c67, %c0_477], %282 {strides = array<i32>} : memref<128x384xf32, #tpu.memory_space<vmem>>, vector<1x384xf32>,
    %c2_478 = arith.constant 2 : index
    %c63_479 = arith.constant 63 : index
    %284 = vector.load %arg4[%c2_478, %c63_479] : memref<3x468xf32, #tpu.memory_space<vmem>>, vector<1x384xf32>
    %c68 = arith.constant 68 : index
    %c0_480 = arith.constant 0 : index
    %285 = vector.load %arg5[%c68, %c0_480] : memref<128x384xf32, #tpu.memory_space<vmem>>, vector<1x384xf32>
    tpu.vector_store %arg5[%c68, %c0_480], %284 {strides = array<i32>} : memref<128x384xf32, #tpu.memory_space<vmem>>, vector<1x384xf32>,
    %c2_481 = arith.constant 2 : index
    %c64_482 = arith.constant 64 : index
    %286 = vector.load %arg4[%c2_481, %c64_482] : memref<3x468xf32, #tpu.memory_space<vmem>>, vector<1x384xf32>
    %c69 = arith.constant 69 : index
    %c0_483 = arith.constant 0 : index
    %287 = vector.load %arg5[%c69, %c0_483] : memref<128x384xf32, #tpu.memory_space<vmem>>, vector<1x384xf32>
    tpu.vector_store %arg5[%c69, %c0_483], %286 {strides = array<i32>} : memref<128x384xf32, #tpu.memory_space<vmem>>, vector<1x384xf32>,
    %c2_484 = arith.constant 2 : index
    %c80_485 = arith.constant 80 : index
    %288 = vector.load %arg4[%c2_484, %c80_485] : memref<3x468xf32, #tpu.memory_space<vmem>>, vector<1x384xf32>
    %c70 = arith.constant 70 : index
    %c0_486 = arith.constant 0 : index
    %289 = vector.load %arg5[%c70, %c0_486] : memref<128x384xf32, #tpu.memory_space<vmem>>, vector<1x384xf32>
    tpu.vector_store %arg5[%c70, %c0_486], %288 {strides = array<i32>} : memref<128x384xf32, #tpu.memory_space<vmem>>, vector<1x384xf32>,
    %c2_487 = arith.constant 2 : index
    %c81_488 = arith.constant 81 : index
    %290 = vector.load %arg4[%c2_487, %c81_488] : memref<3x468xf32, #tpu.memory_space<vmem>>, vector<1x384xf32>
    %c71 = arith.constant 71 : index
    %c0_489 = arith.constant 0 : index
    %291 = vector.load %arg5[%c71, %c0_489] : memref<128x384xf32, #tpu.memory_space<vmem>>, vector<1x384xf32>
    tpu.vector_store %arg5[%c71, %c0_489], %290 {strides = array<i32>} : memref<128x384xf32, #tpu.memory_space<vmem>>, vector<1x384xf32>,
    %c2_490 = arith.constant 2 : index
    %c82_491 = arith.constant 82 : index
    %292 = vector.load %arg4[%c2_490, %c82_491] : memref<3x468xf32, #tpu.memory_space<vmem>>, vector<1x384xf32>
    %c72 = arith.constant 72 : index
    %c0_492 = arith.constant 0 : index
    %293 = vector.load %arg5[%c72, %c0_492] : memref<128x384xf32, #tpu.memory_space<vmem>>, vector<1x384xf32>
    tpu.vector_store %arg5[%c72, %c0_492], %292 {strides = array<i32>} : memref<128x384xf32, #tpu.memory_space<vmem>>, vector<1x384xf32>,
    %c2_493 = arith.constant 2 : index
    %c83_494 = arith.constant 83 : index
    %294 = vector.load %arg4[%c2_493, %c83_494] : memref<3x468xf32, #tpu.memory_space<vmem>>, vector<1x384xf32>
    %c73 = arith.constant 73 : index
    %c0_495 = arith.constant 0 : index
    %295 = vector.load %arg5[%c73, %c0_495] : memref<128x384xf32, #tpu.memory_space<vmem>>, vector<1x384xf32>
    tpu.vector_store %arg5[%c73, %c0_495], %294 {strides = array<i32>} : memref<128x384xf32, #tpu.memory_space<vmem>>, vector<1x384xf32>,
    %c2_496 = arith.constant 2 : index
    %c84_497 = arith.constant 84 : index
    %296 = vector.load %arg4[%c2_496, %c84_497] : memref<3x468xf32, #tpu.memory_space<vmem>>, vector<1x384xf32>
    %c74 = arith.constant 74 : index
    %c0_498 = arith.constant 0 : index
    %297 = vector.load %arg5[%c74, %c0_498] : memref<128x384xf32, #tpu.memory_space<vmem>>, vector<1x384xf32>
    tpu.vector_store %arg5[%c74, %c0_498], %296 {strides = array<i32>} : memref<128x384xf32, #tpu.memory_space<vmem>>, vector<1x384xf32>,
    %c0_499 = arith.constant 0 : index
    %c0_500 = arith.constant 0 : index
    %298 = vector.load %arg2[%c0_499, %c0_500] : memref<2x128xf32, #tpu.memory_space<vmem>>, vector<2x128xf32>
    %c0_501 = arith.constant 0 : index
    %c0_502 = arith.constant 0 : index
    %299 = vector.load %arg5[%c0_501, %c0_502] : memref<128x384xf32, #tpu.memory_space<vmem>>, vector<128x384xf32>
    %cst_503 = arith.constant dense<0.000000e+00> : vector<2x384xf32>
    %300 = tpu.matmul %298, %299, %cst_503 {dimension_numbers = #tpu.dot_dimension_numbers<[1], [0], [0], [1], [0, 0, 1, 1], [], []>} : vector<2x128xf32>, vector<128x384xf32>, vector<2x384xf32> -> vector<2x384xf32>
    %c0_504 = arith.constant 0 : index
    %c0_505 = arith.constant 0 : index
    %c0_506 = arith.constant 0 : index
    %301 = vector.load %arg3[%c0_504, %c0_505, %c0_506] : memref<1x2x384xf32, #tpu.memory_space<vmem>>, vector<1x2x384xf32>
    %302 = vector.shape_cast %301 : vector<1x2x384xf32> to vector<2x384xf32>
    %303 = vector.shape_cast %300 : vector<2x384xf32> to vector<1x2x384xf32>
    tpu.vector_store %arg3[%c0_504, %c0_505, %c0_506], %303 {strides = array<i32>} : memref<1x2x384xf32, #tpu.memory_space<vmem>>, vector<1x2x384xf32>,
    return
  }
  func.func @transform_0(%arg0: i32) -> (i32, i32, i32, i32) {
    %c0_i32 = arith.constant 0 : i32
    %c0_i32_0 = arith.constant 0 : i32
    %c0_i32_1 = arith.constant 0 : i32
    %c0_i32_2 = arith.constant 0 : i32
    return %arg0, %c0_i32, %c0_i32_0, %c0_i32_1 : i32, i32, i32, i32
  }
  func.func @transform_1(%arg0: i32) -> (i32, i32) {
    %c0_i32 = arith.constant 0 : i32
    %c0_i32_0 = arith.constant 0 : i32
    %c0_i32_1 = arith.constant 0 : i32
    return %c0_i32, %c0_i32_0 : i32, i32
  }
  func.func @transform_2(%arg0: i32) -> (i32, i32, i32) {
    %c0_i32 = arith.constant 0 : i32
    %c0_i32_0 = arith.constant 0 : i32
    %c0_i32_1 = arith.constant 0 : i32
    return %arg0, %c0_i32, %c0_i32_0 : i32, i32, i32
  }
}

</mosaic_0001>

<bundles_post_ra>
// kernel: _cdna_forward.2
= control target key start
LH: loop header
LB: loop body
LE: loop exit
PB: predicated region body
PF: predicated region fallthrough
CT: control target
= control target key end

     0   :  { %8 = vsyncpa [#allocation3], 0  ;;  %s693_s0 = inlined_call_operand.hbm [shape: f32[2,1568], index: 0, kind: input, shape index: {}]   ;;  %s694_s1 = inlined_call_operand.hbm [shape: f32[1568,128], index: 1, kind: input, shape index: {}]   ;;  %s695_s2 = inlined_call_operand.vmem [shape: f32[1,128], index: 2, kind: input, shape index: {}]   ;;  %s696_s3 = inlined_call_operand.vmem [shape: f32[2,128], index: 3, kind: output, shape index: {}]  }
   0x1   :  { %s15_s14 = sshll.u32 %s693_s0, 4  ;;  %s16_s14 = int_to_ptr.hbm [resolvable:$true] %s15_s14 }
   0x2   :  { %9 = vsyncpa [#allocation5], 0  ;;  %s639_s15 = smov [#allocation2]   ;;  %s25_s19 = sshll.u32 %s694_s1, 4  ;;  %s26_s19 = int_to_ptr.hbm [resolvable:$true] %s25_s19 }
   0x3   :  { %s17_s16 = sshll.u32 %s639_s15, 4  ;;  %s640_s20 = smov [#allocation4]   ;;  %s18_s16 = int_to_ptr.vmem [resolvable:$true] %s17_s16 }
   0x4   :  { %20 = dma.hbm_to_vmem [thread:$0]  %s16_s14, 416, %s18_s16, [#allocation3]  }
   0x5   :  { %s27_s21 = sshll.u32 %s640_s20, 4  ;;  %s641_s22 = smov 128   ;;  %s28_s21 = int_to_ptr.vmem [resolvable:$true] %s27_s21 }
   0x6   :  { %s642_s23 = smov 8  }
   0x7   :  { %33 = dma.hbm_to_vmem [thread:$0]  %s26_s19, 25088, %s28_s21, [#allocation5], %s641_s22, %s641_s22, %s642_s23  }
   0x8   :  { %635 = dma.done.wait [#allocation3], 416  }
   0x9   :  { %636 = vsyncadd [#allocation3], 4294966880 }
   0xa   :  { %637 = dma.done.wait [#allocation5], 25088  }
   0xb   :  { %638 = vsyncadd [#allocation5], 4294942208  ;;  %v63_v0 = vld [vmem:[#allocation4 + $0x78] sm:$0xff]  ;;  %v62_v2 = vld [vmem:[#allocation4 + $0x70] sm:$0xff]  ;;  %vm282_vm0 = vcmask 261120   ;;  %vm552_vm2 = vcmask 1041408  }
   0xc   :  { %v95_v1 = vld [vmem:[#allocation4 + $0x178] sm:$0xff]  ;;  %285 = vmatpush.msra.mxu0 %v63_v0  ;;  %v94_v4 = vld [vmem:[#allocation4 + $0x170] sm:$0xff]  ;;  %v61_v6 = vld [vmem:[#allocation4 + $0x68] sm:$0xff] }
   0xd   :  { %325 = vmatpush.msra.mxu2 %v95_v1  ;;  %v79_v3 = vld [vmem:[#allocation4 + $0xf8] sm:$0xff]  ;;  %v78_v7 = vld [vmem:[#allocation4 + $0xf0] sm:$0xff]  ;;  %v93_v8 = vld [vmem:[#allocation4 + $0x168] sm:$0xff] }
   0xe   :  { %v111_v5 = vld [vmem:[#allocation4 + $0x1f8] sm:$0xff]  ;;  %305 = vmatpush.msra.mxu1 %v79_v3  ;;  %286 = vmatpush.msra.mxu0 %v62_v2  ;;  %v110_v9 = vld [vmem:[#allocation4 + $0x1f0] sm:$0xff]  ;;  %v77_v10 = vld [vmem:[#allocation4 + $0xe8] sm:$0xff] }
   0xf   :  { %345 = vmatpush.msra.mxu3 %v111_v5  ;;  %326 = vmatpush.msra.mxu2 %v94_v4  ;;  %v60_v11 = vld [vmem:[#allocation4 + $0x60] sm:$0xff]  ;;  %v109_v13 = vld [vmem:[#allocation4 + $0x1e8] sm:$0xff]  ;;  %v59_v16 = vld [vmem:[#allocation4 + $0x58] sm:$0xff] }
  0x10   :  { %306 = vmatpush.msra.mxu1 %v78_v7  ;;  %v92_v12 = vld [vmem:[#allocation4 + $0x160] sm:$0xff]  ;;  %287 = vmatpush.msra.mxu0 %v61_v6  ;;  %v91_v17 = vld [vmem:[#allocation4 + $0x158] sm:$0xff]  ;;  %v58_v20 = vld [vmem:[#allocation4 + $0x50] sm:$0xff] }
  0x11   :  { %346 = vmatpush.msra.mxu3 %v110_v9  ;;  %327 = vmatpush.msra.mxu2 %v93_v8  ;;  %v76_v14 = vld [vmem:[#allocation4 + $0xe0] sm:$0xff]  ;;  %v75_v18 = vld [vmem:[#allocation4 + $0xd8] sm:$0xff]  ;;  %v90_v21 = vld [vmem:[#allocation4 + $0x150] sm:$0xff] }
  0x12   :  { %v108_v15 = vld [vmem:[#allocation4 + $0x1e0] sm:$0xff]  ;;  %307 = vmatpush.msra.mxu1 %v77_v10  ;;  %288 = vmatpush.msra.mxu0 %v60_v11  ;;  %v107_v19 = vld [vmem:[#allocation4 + $0x1d8] sm:$0xff]  ;;  %v74_v22 = vld [vmem:[#allocation4 + $0xd0] sm:$0xff] }
  0x13   :  { %347 = vmatpush.msra.mxu3 %v109_v13  ;;  %328 = vmatpush.msra.mxu2 %v92_v12  ;;  %v106_v23 = vld [vmem:[#allocation4 + $0x1d0] sm:$0xff]  ;;  %v57_v24 = vld [vmem:[#allocation4 + $0x48] sm:$0xff]  ;;  %v56_v28 = vld [vmem:[#allocation4 + $0x40] sm:$0xff] }
  0x14   :  { %308 = vmatpush.msra.mxu1 %v76_v14  ;;  %289 = vmatpush.msra.mxu0 %v59_v16  ;;  %v89_v25 = vld [vmem:[#allocation4 + $0x148] sm:$0xff]  ;;  %v88_v29 = vld [vmem:[#allocation4 + $0x140] sm:$0xff]  ;;  %v55_v32 = vld [vmem:[#allocation4 + $0x38] sm:$0xff] }
  0x15   :  { %348 = vmatpush.msra.mxu3 %v108_v15  ;;  %329 = vmatpush.msra.mxu2 %v91_v17  ;;  %v73_v26 = vld [vmem:[#allocation4 + $0xc8] sm:$0xff]  ;;  %v72_v30 = vld [vmem:[#allocation4 + $0xc0] sm:$0xff]  ;;  %v87_v33 = vld [vmem:[#allocation4 + $0x138] sm:$0xff] }
  0x16   :  { %309 = vmatpush.msra.mxu1 %v75_v18  ;;  %290 = vmatpush.msra.mxu0 %v58_v20  ;;  %v105_v27 = vld [vmem:[#allocation4 + $0x1c8] sm:$0xff]  ;;  %v104_v31 = vld [vmem:[#allocation4 + $0x1c0] sm:$0xff]  ;;  %v71_v34 = vld [vmem:[#allocation4 + $0xb8] sm:$0xff] }
  0x17   :  { %349 = vmatpush.msra.mxu3 %v107_v19  ;;  %330 = vmatpush.msra.mxu2 %v90_v21  ;;  %v103_v35 = vld [vmem:[#allocation4 + $0x1b8] sm:$0xff]  ;;  %v54_v36 = vld [vmem:[#allocation4 + $0x30] sm:$0xff]  ;;  %v53_v40 = vld [vmem:[#allocation4 + $0x28] sm:$0xff] }
  0x18   :  { %310 = vmatpush.msra.mxu1 %v74_v22  ;;  %291 = vmatpush.msra.mxu0 %v57_v24  ;;  %v86_v37 = vld [vmem:[#allocation4 + $0x130] sm:$0xff]  ;;  %v85_v41 = vld [vmem:[#allocation4 + $0x128] sm:$0xff]  ;;  %v52_v44 = vld [vmem:[#allocation4 + $0x20] sm:$0xff] }
  0x19   :  { %350 = vmatpush.msra.mxu3 %v106_v23  ;;  %331 = vmatpush.msra.mxu2 %v89_v25  ;;  %v70_v38 = vld [vmem:[#allocation4 + $0xb0] sm:$0xff]  ;;  %v69_v42 = vld [vmem:[#allocation4 + $0xa8] sm:$0xff]  ;;  %v84_v45 = vld [vmem:[#allocation4 + $0x120] sm:$0xff] }
  0x1a   :  { %311 = vmatpush.msra.mxu1 %v73_v26  ;;  %292 = vmatpush.msra.mxu0 %v56_v28  ;;  %v102_v39 = vld [vmem:[#allocation4 + $0x1b0] sm:$0xff]  ;;  %v101_v43 = vld [vmem:[#allocation4 + $0x1a8] sm:$0xff]  ;;  %v68_v46 = vld [vmem:[#allocation4 + $0xa0] sm:$0xff] }
  0x1b   :  { %351 = vmatpush.msra.mxu3 %v105_v27  ;;  %332 = vmatpush.msra.mxu2 %v88_v29  ;;  %v100_v47 = vld [vmem:[#allocation4 + $0x1a0] sm:$0xff]  ;;  %v51_v48 = vld [vmem:[#allocation4 + $0x18] sm:$0xff]  ;;  %v50_v52 = vld [vmem:[#allocation4 + $0x10] sm:$0xff] }
  0x1c   :  { %312 = vmatpush.msra.mxu1 %v72_v30  ;;  %293 = vmatpush.msra.mxu0 %v55_v32  ;;  %v83_v49 = vld [vmem:[#allocation4 + $0x118] sm:$0xff]  ;;  %v82_v53 = vld [vmem:[#allocation4 + $0x110] sm:$0xff]  ;;  %v49_v56 = vld [vmem:[#allocation4 + $0x8] sm:$0xff] }
  0x1d   :  { %352 = vmatpush.msra.mxu3 %v104_v31  ;;  %333 = vmatpush.msra.mxu2 %v87_v33  ;;  %v67_v50 = vld [vmem:[#allocation4 + $0x98] sm:$0xff]  ;;  %v66_v54 = vld [vmem:[#allocation4 + $0x90] sm:$0xff]  ;;  %v81_v57 = vld [vmem:[#allocation4 + $0x108] sm:$0xff] }
  0x1e   :  { %313 = vmatpush.msra.mxu1 %v71_v34  ;;  %294 = vmatpush.msra.mxu0 %v54_v36  ;;  %v99_v51 = vld [vmem:[#allocation4 + $0x198] sm:$0xff]  ;;  %v98_v55 = vld [vmem:[#allocation4 + $0x190] sm:$0xff]  ;;  %v65_v58 = vld [vmem:[#allocation4 + $0x88] sm:$0xff] }
  0x1f   :  { %353 = vmatpush.msra.mxu3 %v103_v35  ;;  %334 = vmatpush.msra.mxu2 %v86_v37  ;;  %v97_v59 = vld [vmem:[#allocation4 + $0x188] sm:$0xff]  ;;  %v48_v60 = vld [vmem:[#allocation4] sm:$0xff]  ;;  %v127_v62 = vld [vmem:[#allocation4 + $0x278] sm:$0xff] }
  0x20   :  { %314 = vmatpush.msra.mxu1 %v70_v38  ;;  %295 = vmatpush.msra.mxu0 %v53_v40  ;;  %v80_v61 = vld [vmem:[#allocation4 + $0x100] sm:$0xff]  ;;  %v159_v63 = vld [vmem:[#allocation4 + $0x378] sm:$0xff]  ;;  %v126_v2 = vld [vmem:[#allocation4 + $0x270] sm:$0xff] }
  0x21   :  { %354 = vmatpush.msra.mxu3 %v102_v39  ;;  %335 = vmatpush.msra.mxu2 %v85_v41  ;;  %v64_v0 = vld [vmem:[#allocation4 + $0x80] sm:$0xff]  ;;  %v143_v3 = vld [vmem:[#allocation4 + $0x2f8] sm:$0xff]  ;;  %v158_v4 = vld [vmem:[#allocation4 + $0x370] sm:$0xff] }
  0x22   :  { %315 = vmatpush.msra.mxu1 %v69_v42  ;;  %296 = vmatpush.msra.mxu0 %v52_v44  ;;  %v96_v1 = vld [vmem:[#allocation4 + $0x180] sm:$0xff]  ;;  %v175_v5 = vld [vmem:[#allocation4 + $0x3f8] sm:$0xff]  ;;  %v125_v6 = vld [vmem:[#allocation4 + $0x268] sm:$0xff] }
  0x23   :  { %355 = vmatpush.msra.mxu3 %v101_v43  ;;  %336 = vmatpush.msra.mxu2 %v84_v45  ;;  %v142_v7 = vld [vmem:[#allocation4 + $0x2f0] sm:$0xff]  ;;  %v157_v8 = vld [vmem:[#allocation4 + $0x368] sm:$0xff]  ;;  %v124_v10 = vld [vmem:[#allocation4 + $0x260] sm:$0xff] }
  0x24   :  { %316 = vmatpush.msra.mxu1 %v68_v46  ;;  %297 = vmatpush.msra.mxu0 %v51_v48  ;;  %v174_v9 = vld [vmem:[#allocation4 + $0x3f0] sm:$0xff]  ;;  %v141_v11 = vld [vmem:[#allocation4 + $0x2e8] sm:$0xff]  ;;  %v156_v12 = vld [vmem:[#allocation4 + $0x360] sm:$0xff] }
  0x25   :  { %356 = vmatpush.msra.mxu3 %v100_v47  ;;  %337 = vmatpush.msra.mxu2 %v83_v49  ;;  %v173_v13 = vld [vmem:[#allocation4 + $0x3e8] sm:$0xff]  ;;  %v123_v14 = vld [vmem:[#allocation4 + $0x258] sm:$0xff]  ;;  %v140_v15 = vld [vmem:[#allocation4 + $0x2e0] sm:$0xff] }
  0x26   :  { %317 = vmatpush.msra.mxu1 %v67_v50  ;;  %298 = vmatpush.msra.mxu0 %v50_v52  ;;  %v155_v16 = vld [vmem:[#allocation4 + $0x358] sm:$0xff]  ;;  %v172_v17 = vld [vmem:[#allocation4 + $0x3e0] sm:$0xff]  ;;  %v122_v18 = vld [vmem:[#allocation4 + $0x250] sm:$0xff] }
  0x27   :  { %357 = vmatpush.msra.mxu3 %v99_v51  ;;  %338 = vmatpush.msra.mxu2 %v82_v53  ;;  %v139_v19 = vld [vmem:[#allocation4 + $0x2d8] sm:$0xff]  ;;  %v154_v20 = vld [vmem:[#allocation4 + $0x350] sm:$0xff]  ;;  %v121_v22 = vld [vmem:[#allocation4 + $0x248] sm:$0xff] }
  0x28   :  { %318 = vmatpush.msra.mxu1 %v66_v54  ;;  %299 = vmatpush.msra.mxu0 %v49_v56  ;;  %v171_v21 = vld [vmem:[#allocation4 + $0x3d8] sm:$0xff]  ;;  %v138_v23 = vld [vmem:[#allocation4 + $0x2d0] sm:$0xff]  ;;  %v153_v24 = vld [vmem:[#allocation4 + $0x348] sm:$0xff] }
  0x29   :  { %358 = vmatpush.msra.mxu3 %v98_v55  ;;  %339 = vmatpush.msra.mxu2 %v81_v57  ;;  %v170_v25 = vld [vmem:[#allocation4 + $0x3d0] sm:$0xff]  ;;  %v44_v26 = vld [vmem:[#allocation2] sm:$0xff]  ;;  %v119_v31 = vld [vmem:[#allocation4 + $0x238] sm:$0xff] }
  0x2a   :  { %319 = vmatpush.msra.mxu1 %v65_v58  ;;  %300 = vmatpush.msra.mxu0 %v48_v60  ;;  %v120_v27 = vld [vmem:[#allocation4 + $0x240] sm:$0xff]  ;;  %v137_v28 = vld [vmem:[#allocation4 + $0x2c8] sm:$0xff]  ;;  %252 = vst [vmem:[#allocation1] ss:$4 sm:$0xff] %v44_v26  ;;  %v151_v33 = vld [vmem:[#allocation4 + $0x338] sm:$0xff] }
  0x2b   :  { %359 = vmatpush.msra.mxu3 %v97_v59  ;;  %340 = vmatpush.msra.mxu2 %v80_v61  ;;  %v152_v29 = vld [vmem:[#allocation4 + $0x340] sm:$0xff]  ;;  %v169_v30 = vld [vmem:[#allocation4 + $0x3c8] sm:$0xff]  ;;  %v118_v35 = vld [vmem:[#allocation4 + $0x230] sm:$0xff] }
  0x2c   :  { %365 = vmatpush.msrb.mxu0 %v127_v62  ;;  %320 = vmatpush.msra.mxu1 %v64_v0  ;;  %v136_v32 = vld [vmem:[#allocation4 + $0x2c0] sm:$0xff]  ;;  %v135_v36 = vld [vmem:[#allocation4 + $0x2b8] sm:$0xff]  ;;  %v150_v37 = vld [vmem:[#allocation4 + $0x330] sm:$0xff] }
  0x2d   :  { %405 = vmatpush.msrb.mxu2 %v159_v63  ;;  %360 = vmatpush.msra.mxu3 %v96_v1  ;;  %v168_v34 = vld [vmem:[#allocation4 + $0x3c0] sm:$0xff]  ;;  %v167_v38 = vld [vmem:[#allocation4 + $0x3b8] sm:$0xff]  ;;  %v117_v39 = vld [vmem:[#allocation4 + $0x228] sm:$0xff] }
  0x2e   :  { %366 = vmatpush.msrb.mxu0 %v126_v2  ;;  %385 = vmatpush.msrb.mxu1 %v143_v3  ;;  %v134_v40 = vld [vmem:[#allocation4 + $0x2b0] sm:$0xff]  ;;  %v149_v41 = vld [vmem:[#allocation4 + $0x328] sm:$0xff]  ;;  %v116_v44 = vld [vmem:[#allocation4 + $0x220] sm:$0xff] }
  0x2f   :  { %406 = vmatpush.msrb.mxu2 %v158_v4  ;;  %425 = vmatpush.msrb.mxu3 %v175_v5  ;;  %v166_v42 = vld [vmem:[#allocation4 + $0x3b0] sm:$0xff]  ;;  %v133_v45 = vld [vmem:[#allocation4 + $0x2a8] sm:$0xff]  ;;  %v148_v47 = vld [vmem:[#allocation4 + $0x320] sm:$0xff] }
  0x30   :  { %367 = vmatpush.msrb.mxu0 %v125_v6  ;;  %386 = vmatpush.msrb.mxu1 %v142_v7  ;;  %v45_v43 = vld [vmem:[#allocation2 + $0x8] sm:$0xff]  ;;  %v46_v46 = vld [vmem:[#allocation2 + $0x10] sm:$0xff]  ;;  %v132_v54 = vld [vmem:[#allocation4 + $0x2a0] sm:$0xff] }
  0x31   :  { %407 = vmatpush.msrb.mxu2 %v157_v8  ;;  %426 = vmatpush.msrb.mxu3 %v174_v9  ;;  %254 = vst [vmem:[#allocation1 + $0x20] ss:$4 sm:$0xff] %v45_v43  ;;  %v255_v48 = vld.sshfl [vmem:[#allocation1] sm:$0xff pattern:$0x73625140]  ;;  %v165_v52 = vld [vmem:[#allocation4 + $0x3a8] sm:$0xff] }
  0x32   :  { %368 = vmatpush.msrb.mxu0 %v124_v10  ;;  %387 = vmatpush.msrb.mxu1 %v141_v11  ;;  %v257_v49 = vld.sshfl [vmem:[#allocation1 + $0x10] sm:$0xff pattern:$0x73625140]  ;;  %v669_v50 = vld.sshfl [vmem:[#allocation1 + $0x8] sm:$0xff pattern:$0x73625140] }
  0x33   :  { %408 = vmatpush.msrb.mxu2 %v156_v12  ;;  %427 = vmatpush.msrb.mxu3 %v173_v13  ;;  %v671_v51 = vld.sshfl [vmem:[#allocation1 + $0x18] sm:$0xff pattern:$0x73625140]  ;;  %v164_v56 = vld [vmem:[#allocation4 + $0x3a0] sm:$0xff]  ;;  %v113_v61 = vld [vmem:[#allocation4 + $0x208] sm:$0xff] }
  0x34   :  { %369 = vmatpush.msrb.mxu0 %v123_v14  ;;  %388 = vmatpush.msrb.mxu1 %v140_v15  ;;  %v115_v53 = vld [vmem:[#allocation4 + $0x218] sm:$0xff]  ;;  %263 = vst [vmem:[#allocation1] ss:$4 sm:$0xff] %v46_v46  ;;  %v114_v57 = vld [vmem:[#allocation4 + $0x210] sm:$0xff]  ;;  %v145_v4 = vld [vmem:[#allocation4 + $0x308] sm:$0xff] }
  0x35   :  { %409 = vmatpush.msrb.mxu2 %v155_v16  ;;  %428 = vmatpush.msrb.mxu3 %v172_v17  ;;  %v147_v55 = vld [vmem:[#allocation4 + $0x318] sm:$0xff]  ;;  %v146_v59 = vld [vmem:[#allocation4 + $0x310] sm:$0xff]  ;;  %v112_v6 = vld [vmem:[#allocation4 + $0x200] sm:$0xff] }
  0x36   :  { %370 = vmatpush.msrb.mxu0 %v122_v18  ;;  %389 = vmatpush.msrb.mxu1 %v139_v19  ;;  %v131_v58 = vld [vmem:[#allocation4 + $0x298] sm:$0xff]  ;;  %v130_v62 = vld [vmem:[#allocation4 + $0x290] sm:$0xff]  ;;  %v129_v7 = vld [vmem:[#allocation4 + $0x288] sm:$0xff] }
  0x37   :  { %410 = vmatpush.msrb.mxu2 %v154_v20  ;;  %429 = vmatpush.msrb.mxu3 %v171_v21  ;;  %v163_v60 = vld [vmem:[#allocation4 + $0x398] sm:$0xff]  ;;  %v162_v5 = vld [vmem:[#allocation4 + $0x390] sm:$0xff]  ;;  %v144_v8 = vld [vmem:[#allocation4 + $0x300] sm:$0xff] }
  0x38   :  { %371 = vmatpush.msrb.mxu0 %v121_v22  ;;  %390 = vmatpush.msrb.mxu1 %v138_v23  ;;  %v47_v63 = vld [vmem:[#allocation2 + $0x18] sm:$0x3]  ;;  %v673_v0 = vld.sshfl [vmem:[#allocation1 + $0x30] sm:$0xff pattern:$0x73625140]  ;;  %v128_v12 = vld [vmem:[#allocation4 + $0x280] sm:$0xff] }
  0x39   :  { %411 = vmatpush.msrb.mxu2 %v153_v24  ;;  %430 = vmatpush.msrb.mxu3 %v170_v25  ;;  %v675_v1 = vld.sshfl [vmem:[#allocation1 + $0x20] sm:$0xff pattern:$0x73625140]  ;;  %v677_v2 = vld.sshfl [vmem:[#allocation1 + $0x38] sm:$0xff pattern:$0x73625140] }
  0x3a   :  { %372 = vmatpush.msrb.mxu0 %v120_v27  ;;  %391 = vmatpush.msrb.mxu1 %v137_v28  ;;  %v679_v3 = vld.sshfl [vmem:[#allocation1 + $0x28] sm:$0xff pattern:$0x73625140]  ;;  %v191_v10 = vld [vmem:[#allocation4 + $0x478] sm:$0xff]  ;;  %v190_v14 = vld [vmem:[#allocation4 + $0x470] sm:$0xff] }
  0x3b   :  { %412 = vmatpush.msrb.mxu2 %v152_v29  ;;  %431 = vmatpush.msrb.mxu3 %v169_v30  ;;  %264 = vst [vmem:[#allocation1 + $0x20] ss:$4 sm:$0xff] %v47_v63  ;;  %v161_v9 = vld [vmem:[#allocation4 + $0x388] sm:$0xff]  ;;  %v223_v11 = vld [vmem:[#allocation4 + $0x578] sm:$0xff]  ;;  %v160_v13 = vld [vmem:[#allocation4 + $0x380] sm:$0xff] }
  0x3c   :  { %373 = vmatpush.msrb.mxu0 %v119_v31  ;;  %392 = vmatpush.msrb.mxu1 %v136_v32  ;;  %v207_v15 = vld [vmem:[#allocation4 + $0x4f8] sm:$0xff]  ;;  %v222_v16 = vld [vmem:[#allocation4 + $0x570] sm:$0xff]  ;;  %v189_v18 = vld [vmem:[#allocation4 + $0x468] sm:$0xff] }
  0x3d   :  { %413 = vmatpush.msrb.mxu2 %v151_v33  ;;  %432 = vmatpush.msrb.mxu3 %v168_v34  ;;  %v239_v17 = vld [vmem:[#allocation4 + $0x5f8] sm:$0xff]  ;;  %v206_v19 = vld [vmem:[#allocation4 + $0x4f0] sm:$0xff]  ;;  %v221_v20 = vld [vmem:[#allocation4 + $0x568] sm:$0xff] }
  0x3e   :  { %374 = vmatpush.msrb.mxu0 %v118_v35  ;;  %393 = vmatpush.msrb.mxu1 %v135_v36  ;;  %v238_v21 = vld [vmem:[#allocation4 + $0x5f0] sm:$0xff]  ;;  %v188_v22 = vld [vmem:[#allocation4 + $0x460] sm:$0xff]  ;;  %v205_v23 = vld [vmem:[#allocation4 + $0x4e8] sm:$0xff] }
  0x3f   :  { %414 = vmatpush.msrb.mxu2 %v150_v37  ;;  %433 = vmatpush.msrb.mxu3 %v167_v38  ;;  %v220_v24 = vld [vmem:[#allocation4 + $0x560] sm:$0xff]  ;;  %v237_v25 = vld [vmem:[#allocation4 + $0x5e8] sm:$0xff]  ;;  %v187_v26 = vld [vmem:[#allocation4 + $0x458] sm:$0xff] }
  0x40   :  { %375 = vmatpush.msrb.mxu0 %v117_v39  ;;  %394 = vmatpush.msrb.mxu1 %v134_v40  ;;  %v204_v27 = vld [vmem:[#allocation4 + $0x4e0] sm:$0xff]  ;;  %v219_v28 = vld [vmem:[#allocation4 + $0x558] sm:$0xff]  ;;  %v186_v30 = vld [vmem:[#allocation4 + $0x450] sm:$0xff] }
  0x41   :  { %415 = vmatpush.msrb.mxu2 %v149_v41  ;;  %434 = vmatpush.msrb.mxu3 %v166_v42  ;;  %v236_v29 = vld [vmem:[#allocation4 + $0x5e0] sm:$0xff]  ;;  %v203_v31 = vld [vmem:[#allocation4 + $0x4d8] sm:$0xff]  ;;  %v218_v32 = vld [vmem:[#allocation4 + $0x550] sm:$0xff] }
  0x42   :  { %376 = vmatpush.msrb.mxu0 %v116_v44  ;;  %395 = vmatpush.msrb.mxu1 %v133_v45  ;;  %v235_v33 = vld [vmem:[#allocation4 + $0x5d8] sm:$0xff]  ;;  %v185_v34 = vld [vmem:[#allocation4 + $0x448] sm:$0xff]  ;;  %v202_v35 = vld [vmem:[#allocation4 + $0x4d0] sm:$0xff] }
  0x43   :  { %416 = vmatpush.msrb.mxu2 %v148_v47  ;;  %435 = vmatpush.msrb.mxu3 %v165_v52  ;;  %v217_v36 = vld [vmem:[#allocation4 + $0x548] sm:$0xff]  ;;  %v234_v37 = vld [vmem:[#allocation4 + $0x5d0] sm:$0xff]  ;;  %v184_v38 = vld [vmem:[#allocation4 + $0x440] sm:$0xff] }
  0x44   :  { %377 = vmatpush.msrb.mxu0 %v115_v53  ;;  %396 = vmatpush.msrb.mxu1 %v132_v54  ;;  %v201_v39 = vld [vmem:[#allocation4 + $0x4c8] sm:$0xff]  ;;  %v216_v40 = vld [vmem:[#allocation4 + $0x540] sm:$0xff]  ;;  %v183_v42 = vld [vmem:[#allocation4 + $0x438] sm:$0xff] }
  0x45   :  { %417 = vmatpush.msrb.mxu2 %v147_v55  ;;  %436 = vmatpush.msrb.mxu3 %v164_v56  ;;  %v233_v41 = vld [vmem:[#allocation4 + $0x5c8] sm:$0xff]  ;;  %v200_v43 = vld [vmem:[#allocation4 + $0x4c0] sm:$0xff]  ;;  %v215_v44 = vld [vmem:[#allocation4 + $0x538] sm:$0xff] }
  0x46   :  { %378 = vmatpush.msrb.mxu0 %v114_v57  ;;  %397 = vmatpush.msrb.mxu1 %v131_v58  ;;  %v232_v45 = vld [vmem:[#allocation4 + $0x5c0] sm:$0xff]  ;;  %v182_v46 = vld [vmem:[#allocation4 + $0x430] sm:$0xff]  ;;  %v199_v47 = vld [vmem:[#allocation4 + $0x4b8] sm:$0xff] }
  0x47   :  { %418 = vmatpush.msrb.mxu2 %v146_v59  ;;  %437 = vmatpush.msrb.mxu3 %v163_v60  ;;  %v213_v52 = vld [vmem:[#allocation4 + $0x528] sm:$0xff]  ;;  %v230_v53 = vld [vmem:[#allocation4 + $0x5b0] sm:$0xff]  ;;  %v180_v54 = vld [vmem:[#allocation4 + $0x420] sm:$0xff] }
  0x48   :  { %379 = vmatpush.msrb.mxu0 %v113_v61  ;;  %398 = vmatpush.msrb.mxu1 %v130_v62  ;;  %v197_v55 = vld [vmem:[#allocation4 + $0x4a8] sm:$0xff]  ;;  %v212_v56 = vld [vmem:[#allocation4 + $0x520] sm:$0xff]  ;;  %v179_v58 = vld [vmem:[#allocation4 + $0x418] sm:$0xff] }
  0x49   :  { %419 = vmatpush.msrb.mxu2 %v145_v4  ;;  %438 = vmatpush.msrb.mxu3 %v162_v5  ;;  %v229_v57 = vld [vmem:[#allocation4 + $0x5a8] sm:$0xff]  ;;  %v196_v59 = vld [vmem:[#allocation4 + $0x4a0] sm:$0xff]  ;;  %v211_v60 = vld [vmem:[#allocation4 + $0x518] sm:$0xff] }
  0x4a   :  { %380 = vmatpush.msrb.mxu0 %v112_v6  ;;  %399 = vmatpush.msrb.mxu1 %v129_v7  ;;  %v228_v61 = vld [vmem:[#allocation4 + $0x5a0] sm:$0xff]  ;;  %v178_v62 = vld [vmem:[#allocation4 + $0x410] sm:$0xff]  ;;  %v195_v63 = vld [vmem:[#allocation4 + $0x498] sm:$0xff] }
  0x4b   :  { %420 = vmatpush.msrb.mxu2 %v144_v8  ;;  %439 = vmatpush.msrb.mxu3 %v161_v9  ;;  %v209_v4 = vld [vmem:[#allocation4 + $0x508] sm:$0xff]  ;;  %v226_v5 = vld [vmem:[#allocation4 + $0x590] sm:$0xff]  ;;  %v176_v6 = vld [vmem:[#allocation4 + $0x400] sm:$0xff] }
  0x4c   :  { %301 = vmatmul.f32.vlgmr.msra.gmra.mxu0 %v255_v48  ;;  %341 = vmatmul.f32.vlgmr.msra.gmra.mxu2 %v257_v49  ;;  %v214_v48 = vld [vmem:[#allocation4 + $0x530] sm:$0xff]  ;;  %v231_v49 = vld [vmem:[#allocation4 + $0x5b8] sm:$0xff]  ;;  %v193_v7 = vld [vmem:[#allocation4 + $0x488] sm:$0xff] }
  0x4d   :  { %445 = vmatpush.msra.mxu0 %v191_v10  ;;  %485 = vmatpush.msra.mxu2 %v223_v11  ;;  %v208_v8 = vld [vmem:[#allocation4 + $0x500] sm:$0xff]  ;;  %v225_v9 = vld [vmem:[#allocation4 + $0x588] sm:$0xff] }
  0x4e   :  { %400 = vmatpush.msrb.mxu1 %v128_v12  ;;  %440 = vmatpush.msrb.mxu3 %v160_v13  ;;  %v265_v10 = vld.sshfl [vmem:[#allocation1] sm:$0xff pattern:$0x73625140]  ;;  %v267_v11 = vld.sshfl [vmem:[#allocation1 + $0x10] sm:$0xff pattern:$0x73625140] }
  0x4f   :  { %321 = vmatmul.f32.vlgmr.msra.gmra.mxu1 %v669_v50  ;;  %361 = vmatmul.f32.vlgmr.msra.gmra.mxu3 %v671_v51  ;;  %v181_v50 = vld [vmem:[#allocation4 + $0x428] sm:$0xff]  ;;  %v198_v51 = vld [vmem:[#allocation4 + $0x4b0] sm:$0xff]  ;;  %v192_v12 = vld [vmem:[#allocation4 + $0x480] sm:$0xff] }
  0x50   :  { %446 = vmatpush.msra.mxu0 %v190_v14  ;;  %465 = vmatpush.msra.mxu1 %v207_v15  ;;  %v224_v13 = vld [vmem:[#allocation4 + $0x580] sm:$0xff]  ;;  %v268_v15 = vld.sshfl [vmem:[#allocation1 + $0x18] sm:$0xff pattern:$0x73625140] }
  0x51   :  { %486 = vmatpush.msra.mxu2 %v222_v16  ;;  %505 = vmatpush.msra.mxu3 %v239_v17  ;;  %v266_v14 = vld.sshfl [vmem:[#allocation1 + $0x8] sm:$0xff pattern:$0x73625140]  ;;  %v243_v16 = vld [vmem:[#allocation4 + $0x618] sm:$0xff]  ;;  %v242_v17 = vld [vmem:[#allocation4 + $0x610] sm:$0xff] }
  0x52   :  { %447 = vmatpush.msra.mxu0 %v189_v18  ;;  %466 = vmatpush.msra.mxu1 %v206_v19  ;;  %v241_v18 = vld [vmem:[#allocation4 + $0x608] sm:$0xff]  ;;  %v240_v19 = vld [vmem:[#allocation4 + $0x600] sm:$0xff] }
  0x53   :  { %487 = vmatpush.msra.mxu2 %v221_v20  ;;  %506 = vmatpush.msra.mxu3 %v238_v21  ;;  %v269_v20 = vld.sshfl [vmem:[#allocation1 + $0x20] sm:$0xff pattern:$0x73625140] }
  0x54   :  { %448 = vmatpush.msra.mxu0 %v188_v22  ;;  %467 = vmatpush.msra.mxu1 %v205_v23  ;;  %v584_v21 = vld [vmem:[%s695_s2] ss:$0 sm:$0xff] }
  0x55   :  { %488 = vmatpush.msra.mxu2 %v220_v24  ;;  %507 = vmatpush.msra.mxu3 %v237_v25 }
  0x56   :  { %421 = vmatmul.f32.vlgmr.msrb.gmra.mxu2 %v673_v0  ;;  %449 = vmatpush.msra.mxu0 %v187_v26  ;;  %v210_v0 = vld [vmem:[#allocation4 + $0x510] sm:$0xff] }
  0x57   :  { %468 = vmatpush.msra.mxu1 %v204_v27  ;;  %489 = vmatpush.msra.mxu2 %v219_v28 }
  0x58   :  { %508 = vmatpush.msra.mxu3 %v236_v29  ;;  %381 = vmatmul.f32.vlgmr.msrb.gmra.mxu0 %v675_v1  ;;  %v227_v1 = vld [vmem:[#allocation4 + $0x598] sm:$0xff] }
  0x59   :  { %441 = vmatmul.f32.vlgmr.msrb.gmra.mxu3 %v677_v2  ;;  %450 = vmatpush.msra.mxu0 %v186_v30  ;;  %v177_v2 = vld [vmem:[#allocation4 + $0x408] sm:$0xff] }
  0x5a   :  { %469 = vmatpush.msra.mxu1 %v203_v31  ;;  %490 = vmatpush.msra.mxu2 %v218_v32 }
  0x5b   :  { %509 = vmatpush.msra.mxu3 %v235_v33  ;;  %401 = vmatmul.f32.vlgmr.msrb.gmra.mxu1 %v679_v3  ;;  %v194_v3 = vld [vmem:[#allocation4 + $0x490] sm:$0xff] }
  0x5c   :  { %451 = vmatpush.msra.mxu0 %v185_v34  ;;  %470 = vmatpush.msra.mxu1 %v202_v35 }
  0x5d   :  { %491 = vmatpush.msra.mxu2 %v217_v36  ;;  %510 = vmatpush.msra.mxu3 %v234_v37 }
  0x5e   :  { %452 = vmatpush.msra.mxu0 %v184_v38  ;;  %471 = vmatpush.msra.mxu1 %v201_v39 }
  0x5f   :  { %492 = vmatpush.msra.mxu2 %v216_v40  ;;  %511 = vmatpush.msra.mxu3 %v233_v41 }
  0x60   :  { %453 = vmatpush.msra.mxu0 %v183_v42  ;;  %472 = vmatpush.msra.mxu1 %v200_v43 }
  0x61   :  { %493 = vmatpush.msra.mxu2 %v215_v44  ;;  %512 = vmatpush.msra.mxu3 %v232_v45  ;;  %v548_v45 = vlaneseq }
  0x62   :  { %454 = vmatpush.msra.mxu0 %v182_v46  ;;  %473 = vmatpush.msra.mxu1 %v199_v47 }
  0x63   :  { %494 = vmatpush.msra.mxu2 %v214_v48  ;;  %513 = vmatpush.msra.mxu3 %v231_v49  ;;  %v549_v49 = vand.u32 127, %v548_v45 }
  0x64   :  { %455 = vmatpush.msra.mxu0 %v181_v50  ;;  %474 = vmatpush.msra.mxu1 %v198_v51 }
  0x65   :  { %495 = vmatpush.msra.mxu2 %v213_v52  ;;  %514 = vmatpush.msra.mxu3 %v230_v53  ;;  %vm550_vm1 = vcmp.lt.s32.totalorder %v549_v49, 75 }
  0x66   :  { %456 = vmatpush.msra.mxu0 %v180_v54  ;;  %475 = vmatpush.msra.mxu1 %v197_v55 }
  0x67   :  { %496 = vmatpush.msra.mxu2 %v212_v56  ;;  %515 = vmatpush.msra.mxu3 %v229_v57 }
  0x68   :  { %457 = vmatpush.msra.mxu0 %v179_v58  ;;  %476 = vmatpush.msra.mxu1 %v196_v59 }
  0x69   :  { %497 = vmatpush.msra.mxu2 %v211_v60  ;;  %516 = vmatpush.msra.mxu3 %v228_v61 }
  0x6a   :  { %458 = vmatpush.msra.mxu0 %v178_v62  ;;  %477 = vmatpush.msra.mxu1 %v195_v63 }
  0x6b   :  { %498 = vmatpush.msra.mxu2 %v210_v0  ;;  %517 = vmatpush.msra.mxu3 %v227_v1 }
  0x6c   :  { %459 = vmatpush.msra.mxu0 %v177_v2  ;;  %478 = vmatpush.msra.mxu1 %v194_v3 }
  0x6d   :  { %499 = vmatpush.msra.mxu2 %v209_v4  ;;  %518 = vmatpush.msra.mxu3 %v226_v5 }
  0x6e   :  { %460 = vmatpush.msra.mxu0 %v176_v6  ;;  %479 = vmatpush.msra.mxu1 %v193_v7 }
  0x6f   :  { %500 = vmatpush.msra.mxu2 %v208_v8  ;;  %519 = vmatpush.msra.mxu3 %v225_v9 }
  0x70   :  { %461 = vmatmul.f32.vlgmr.msra.gmra.mxu0 %v265_v10  ;;  %501 = vmatmul.f32.vlgmr.msra.gmra.mxu2 %v267_v11 }
  0x71   :  { %480 = vmatpush.msra.mxu1 %v192_v12  ;;  %520 = vmatpush.msra.mxu3 %v224_v13 }
  0x72   :  { %481 = vmatmul.f32.vlgmr.msra.gmra.mxu1 %v266_v14  ;;  %521 = vmatmul.f32.vlgmr.msra.gmra.mxu3 %v268_v15 }
  0x73   :  { %537 = vmatpush.msrb.mxu0 %v243_v16 }
  0x75   :  { %538 = vmatpush.msrb.mxu0 %v242_v17 }
  0x77   :  { %539 = vmatpush.msrb.mxu0 %v241_v18 }
  0x79   :  { %540 = vmatpush.msrb.mxu0 %v240_v19 }
  0x7a   :  { %578 = vmatmul.msk.f32.vlgmr.msrb.gmra.mxu0 %vm282_vm0, %v269_v20 }
  0xc9   :  { %v302_v22 = vpop.f32.mrf.mxu0 }
  0xca   :  { %v303_v23 = vadd.f32 %v584_v21, %v302_v22 }
  0xcc   :  { %v322_v24 = vpop.f32.mrf.mxu1 }
  0xcd   :  { %v323_v25 = vadd.f32 %v322_v24, %v303_v23 }
  0xcf   :  { %v342_v26 = vpop.f32.mrf.mxu2 }
  0xd0   :  { %v343_v27 = vadd.f32 %v342_v26, %v323_v25 }
  0xd2   :  { %v362_v28 = vpop.f32.mrf.mxu3 }
  0xd3   :  { %v363_v29 = vadd.f32 %v362_v28, %v343_v27 }
  0xd5   :  { %v382_v30 = vpop.f32.mrf.mxu0 }
  0xd6   :  { %v383_v31 = vadd.f32 %v382_v30, %v363_v29 }
  0xd8   :  { %v402_v32 = vpop.f32.mrf.mxu1 }
  0xd9   :  { %v403_v33 = vadd.f32 %v402_v32, %v383_v31  ;;  %v422_v34 = vpop.f32.mrf.mxu2 }
  0xdb   :  { %v423_v35 = vadd.f32 %v422_v34, %v403_v33 }
  0xdc   :  { %v442_v36 = vpop.f32.mrf.mxu3 }
  0xdd   :  { %v443_v37 = vadd.f32 %v442_v36, %v423_v35 }
  0xed   :  { %v462_v38 = vpop.f32.mrf.mxu0 }
  0xee   :  { %v463_v39 = vadd.f32 %v462_v38, %v443_v37 }
  0xef   :  { %v482_v40 = vpop.f32.mrf.mxu1 }
  0xf0   :  { %v483_v41 = vadd.f32 %v482_v40, %v463_v39 }
  0xf3   :  { %v502_v42 = vpop.f32.mrf.mxu2 }
  0xf4   :  { %v503_v43 = vadd.f32 %v502_v42, %v483_v41 }
  0xf5   :  { %v522_v44 = vpop.f32.mrf.mxu3 }
  0xf6   :  { %v523_v46 = vadd.f32 %v522_v44, %v503_v43 }
  0xf7   :  { %v542_v47 = vpop.f32.mrf.mxu0 }
  0xf8   :  { %v543_v48 = vadd.f32 %v542_v47, %v523_v46 }
  0xfa   :  { %v579_v50 = vadd.f32 -1e-10, %v543_v48 }
  0xfc   :  { %v546_v51 = vmax.f32 %v579_v50, 0.0 }
  0xfe   :  { %v547_v52 = vadd.f32 1e-10, %v546_v51 }
 0x100   :  { %v551_v53 = vsel %vm550_vm1, %v547_v52, 0.0 }
 0x101   :  { %v553_v54 = vsel %vm552_vm2, %v551_v53, 0.0 }
 0x102   :  { %554 = vadd.xlane.f32.xlu0 %v553_v54 }
 0x175   :  { %v555_v55 = vpop.xlane.xlu0 %554 }
 0x176   :  { %585 = vrcp.f32 %v555_v55  ;;  %v567_v59 = vand.u32 2147483648, %v555_v55  ;;  %v565_v61 = vand.u32 2147483647, %v555_v55  ;;  %vm561_vm4 = vweird.f32 %v555_v55 }
 0x178   :  { %v568_v63 = vor.u32 1.1754944e-38, %v567_v59  ;;  %vm566_vm6 = vcmp.eq.f32.partialorder %v565_v61, 8.507059e+37 }
 0x17c   :  { %v586_v56 = vpop.eup %585 }
 0x17d   :  { %v557_v57 = vmul.f32 %v586_v56, %v555_v55  ;;  %vm562_vm3 = vweird.f32 %v586_v56 }
 0x17e   :  { %vm563_vm5 = vmor %vm561_vm4, %vm562_vm3 }
 0x17f   :  { %v558_v58 = vsub.f32 1.0, %v557_v57 }
 0x181   :  { %v559_v60 = vmul.f32 %v586_v56, %v558_v58 }
 0x183   :  { %v560_v62 = vadd.f32 %v586_v56, %v559_v60 }
 0x185   :  { %v564_v0 = vsel %vm563_vm5, %v586_v56, %v560_v62 }
 0x186   :  { %v569_v1 = vsel %vm566_vm6, %v568_v63, %v564_v0 }
 0x187   :  { %v570_v2 = vmul.f32 %v569_v1, %v551_v53 }
 0x189   :  { %571 = vst [vmem:[%s696_s3] sm:$0x3] %v570_v2 }
 0x18a   :  { %576 = vsyncpa [#allocation3], 1 }
 0x18b   :  { %577 = vsyncpa [#allocation5], 1 }

// kernel: _cdna_forward.3
= control target key start
LH: loop header
LB: loop body
LE: loop exit
PB: predicated region body
PF: predicated region fallthrough
CT: control target
= control target key end

     0   :  { %7 = vsyncpa [#allocation5], 0  ;;  %s2261_s0 = inlined_call_operand.hbm [shape: f32[2,3,16,16], index: 0, kind: input, shape index: {}]   ;;  %s2262_s1 = inlined_call_operand.vmem [shape: f32[2,128], index: 1, kind: input, shape index: {}]   ;;  %s2263_s2 = inlined_call_operand.vmem [shape: f32[2,2,384], index: 2, kind: output, shape index: {}]  }
   0x1   :  { %9 = vsyncpa [#allocation5 + $0x1], 0  ;;  %s1708_s9 = smov 0   ;;  %s1710_s10 = smov 0  }
   0x2   :  { %s1712_s11 = smov 0   ;;  %s1714_s12 = smov 0  }
   0x3 LB: > { %s1727_s13 = sadd.s32 4294967295, %s1651_s12   ;;  %s1730_s14 = sadd.s32 1, %s1651_s12   ;;  %s1651_s12 = sphi %s1714_s12, %s2321_s12   ;;  %s1647_s11 = sphi %s1712_s11, %s2320_s11   ;;  %s1643_s10 = sphi %s1710_s10, %s2319_s10   ;;  %s1639_s9 = sphi %s1708_s9, %s2318_s9  }
   0x4   : > { %s19_s15 = ssub.s32 %s1651_s12, %s1730_s14  ;;  %s22_s16 = sadd.s32 1, %s1647_s11 }
   0x5   : > { %p20_p0 = scmp.eq.s32.totalorder %s19_s15, 0  ;;  %p29_p1 = scmp.ne.s32.totalorder %s1647_s11, %s1643_s10 }
   0x6   : > { %p30_p2 = scmp.eq.s32.totalorder %s1651_s12, 0  ;;  %p35_p3 = scmp.ne.s32.totalorder %s1643_s10, %s1639_s9 }
   0x7   : > { %s1740_s17 = scalar_select %p20_p0, %s1647_s11, %s22_s16  }
   0x8   : > { %p31_p4 = por %p30_p2, %p29_p1  ;;  %p36_p5 = scmp.eq.s32.totalorder %s1727_s13, 0 }
   0x9   : > { %p1514_p6 = scmp.lt.s32.totalorder %s1651_s12, 2  ;;  %s109_s19 = sand.u32 1, %s1647_s11  }
   0xa   : > { %p1744_p7 = por %p36_p5, %p35_p3  ;;  %s1504_s20 = smul.u32 48, %s109_s19 }
   0xb   : > { %s1505_s21 = smul.u32 48, %s1651_s12  ;;  %p1750_p8 = pnand %p1514_p6, %p31_p4 }
   0xc   : > { %s113_s26 = scalar_lea.vmem [#allocation4], %s1504_s20  ;;  %p1468_p9 = scmp.ge.s32.totalorder %s1651_s12, 1 }
   0xd   : > { %s118_s25 = scalar_lea.hbm %s2261_s0, %s1505_s21  ;;  %s121_s27 = sshll.u32 %s113_s26, 4  ;;  %s122_s27 = int_to_ptr.vmem [resolvable:$true] %s121_s27 }
   0xe   : > { %s119_s28 = sshll.u32 %s118_s25, 4  ;;  %s110_s29 = scalar_lea.sflag [#allocation5], %s109_s19  ;;  %s120_s28 = int_to_ptr.hbm [resolvable:$true] %s119_s28 }
   0xf   : > { %s1587_s30 = sshra.s32 %s120_s28, 4  ;;  %p1591_p11 = pneg %p1750_p8  ;;  %s1588_s30 = int_to_ptr.hbm [resolvable:$true] %s1587_s30 }
  0x10   : > { %s1589_s3 = scalar_lea.hbm %s1588_s30, 48  ;;  %s1594_s6 = scalar_lea.hbm %s2261_s0, 96 }
  0x11   : > { %p1590_p10 = scmp.ne.s32.totalorder %s1588_s30, %s1589_s3  ;;  %p1595_p0 = scmp.lt.s32.totalorder %s1588_s30, %s2261_s0 }
  0x12   : > { %p1596_p1 = scmp.lt.s32.totalorder %s1594_s6, %s1589_s3 }
  0x13   : > { %p1592_p12 = pnand %p1591_p11, %p1590_p10 }
  0x14   : > { %p1597_p2 = por %p1596_p1, %p1595_p0 }
  0x15   : > { %p1593_p13 = pneg %p1592_p12 }
  0x17   : > { %p1598_p3 = pnand %p1597_p2, %p1593_p13 }
  0x19   : > { %1601 = shalt.err (!%p1598_p3)
}
  0x1a   : > { %s1653_s9 = smov 128   ;;  %s1654_s15 = smov 8  }
  0x1b   : > { %1513 = dma.hbm_to_vmem [thread:$0]  (!%p1750_p8), %s120_s28, 768, %s122_s27, %s110_s29, %s1653_s9, %s1653_s9, %s1654_s15  }
  0x1c   : > { %p129_p4 = scmp.lt.s32.totalorder %s1651_s12, 3 }
  0x1e   : > { %p130_p5 = pnand %p1468_p9, %p129_p4 }
  0x1f   : > { %s135_s16 = sand.u32 (!%p130_p5), 1, %s1643_s10  }
  0x20   : > { %133 = sbr.rel (%p130_p5) target bundleno = 727 (0x2d7), region = 28  ;;  %s136_s20 = scalar_lea.sflag (!%p130_p5), [#allocation5], %s135_s16 }
  0x21   : > { %s1506_s19 = smul.u32 (!%p130_p5), 48, %s135_s16 }
  0x23   : > { %s1772_s21 = scalar_lea.vmem (!%p130_p5), [#allocation4], %s1506_s19 }
  0x25   : > { %1634 = dma.done.wait (%p1744_p7), %s136_s20, 768  }
  0x26   : > { %1636 = vsyncadd (%p1744_p7), %s136_s20, 4294966528  ;;  %v185_v0 = vld [vmem:[%s1772_s21 + $0x2] sm:$0x1]  ;;  %v171_v1 = vld [vmem:[%s1772_s21] sm:$0x1]  ;;  %s1655_s12 = smov 82  }
  0x27   : > { %187 = vrot.lane.b32.xlu1 %v185_v0, %s1655_s12  ;;  %s1656_s22 = smov 42   ;;  %v199_v2 = vld [vmem:[%s1772_s21 + $0x4] sm:$0x1]  ;;  %s1657_s18 = smov 122   ;;  %v192_v3 = vld [vmem:[%s1772_s21 + $0x3] sm:$0x1] }
  0x28   : > { %173 = vrot.lane.b32.xlu0 %v171_v1, %s1656_s22  ;;  %201 = vrot.lane.b32.xlu2 %v199_v2, %s1657_s18  ;;  %v178_v4 = vld [vmem:[%s1772_s21 + $0x1] sm:$0x1]  ;;  %v211_v5 = vld [vmem:[%s1772_s21 + $0x5] sm:$0x1]  ;;  %s1658_s23 = smov 102   ;;  %s1659_s24 = smov 62  }
  0x29   : > { %s1660_s25 = smov 14   ;;  %v225_v6 = vld [vmem:[%s1772_s21 + $0x7] sm:$0x1]  ;;  %v218_v7 = vld [vmem:[%s1772_s21 + $0x6] sm:$0x1]  ;;  %s1661_s26 = smov 54  }
  0x2a   : > { %v232_v8 = vld [vmem:[%s1772_s21 + $0x8] sm:$0x1]  ;;  %s1662_s27 = smov 34   ;;  %s1663_s28 = smov 74   ;;  %v246_v9 = vld [vmem:[%s1772_s21 + $0xa] sm:$0x1] }
  0x2b   : > { %v239_v10 = vld [vmem:[%s1772_s21 + $0x9] sm:$0x1]  ;;  %v258_v11 = vld [vmem:[%s1772_s21 + $0xb] sm:$0x1]  ;;  %s1664_s29 = smov 114   ;;  %s1665_s30 = smov 94  }
  0x2c   : > { %s1666_s3 = smov 6   ;;  %v272_v12 = vld [vmem:[%s1772_s21 + $0xd] sm:$0x1]  ;;  %v265_v13 = vld [vmem:[%s1772_s21 + $0xc] sm:$0x1]  ;;  %s1667_s4 = smov 46  }
  0x2d   : > { %v279_v14 = vld [vmem:[%s1772_s21 + $0xe] sm:$0x1]  ;;  %s1668_s5 = smov 26   ;;  %s1669_s6 = smov 66   ;;  %v1470_v15 = vld [vmem:[%s1772_s21 + $0x10] sm:$0x1] }
  0x2e   : > { %v286_v16 = vld [vmem:[%s1772_s21 + $0xf] sm:$0x1]  ;;  %v1471_v17 = vld [vmem:[%s1772_s21 + $0x11] sm:$0x1]  ;;  %s1670_s7 = smov 86   ;;  %v1671_v33 = vmov 0.0  }
  0x2f   : > { %194 = vrot.lane.b32.xlu1 %v192_v3, %s1658_s23  ;;  %v1473_v18 = vld [vmem:[%s1772_s21 + $0x13] sm:$0x1]  ;;  %v1472_v19 = vld [vmem:[%s1772_s21 + $0x12] sm:$0x1]  ;;  %v1474_v20 = vld [vmem:[%s1772_s21 + $0x14] sm:$0x1]  ;;  %1326 = vmatpush.msra.mxu0 %v1671_v33 }
  0x30   : > { %180 = vrot.lane.b32.xlu0 %v178_v4, %s1659_s24  ;;  %213 = vrot.lane.b32.xlu2 %v211_v5, %s1660_s25  ;;  %v1476_v21 = vld [vmem:[%s1772_s21 + $0x16] sm:$0x1]  ;;  %v1475_v22 = vld [vmem:[%s1772_s21 + $0x15] sm:$0x1]  ;;  %166 = vst [vmem:[#allocation2] sm:$0x77] %v1671_v33 }
  0x31   : > { %v1477_v23 = vld [vmem:[%s1772_s21 + $0x17] sm:$0x1]  ;;  %v1479_v24 = vld [vmem:[%s1772_s21 + $0x19] sm:$0x1]  ;;  %v1478_v25 = vld [vmem:[%s1772_s21 + $0x18] sm:$0x1]  ;;  %1346 = vmatpush.msra.mxu1 %v1671_v33  ;;  %1366 = vmatpush.msra.mxu2 %v1671_v33 }
  0x32   : > { %v1480_v26 = vld [vmem:[%s1772_s21 + $0x1a] sm:$0x1]  ;;  %v1482_v27 = vld [vmem:[%s1772_s21 + $0x1c] sm:$0x1]  ;;  %v1481_v28 = vld [vmem:[%s1772_s21 + $0x1b] sm:$0x1]  ;;  %1327 = vmatpush.msra.mxu0 %v1671_v33 }
  0x33   : > { %v1483_v29 = vld [vmem:[%s1772_s21 + $0x1d] sm:$0x1]  ;;  %v1485_v30 = vld [vmem:[%s1772_s21 + $0x1f] sm:$0x1]  ;;  %v1484_v31 = vld [vmem:[%s1772_s21 + $0x1e] sm:$0x1]  ;;  %1347 = vmatpush.msra.mxu1 %v1671_v33  ;;  %1367 = vmatpush.msra.mxu2 %v1671_v33 }
  0x34   : > { %v1486_v32 = vld [vmem:[%s1772_s21 + $0x20] sm:$0x1]  ;;  %495 = vst [vmem:[#allocation3 + $0xd8] sm:$0xf8] %v1671_v33  ;;  %v1490_v34 = vld [vmem:[%s1772_s21 + $0x24] sm:$0x1]  ;;  %1328 = vmatpush.msra.mxu0 %v1671_v33 }
  0x35   : > { %496 = vst [vmem:[#allocation3 + $0xe0] sm:$0xf8] %v1671_v33  ;;  %v1487_v35 = vld [vmem:[%s1772_s21 + $0x21] sm:$0x1]  ;;  %v1488_v36 = vld [vmem:[%s1772_s21 + $0x22] sm:$0x1]  ;;  %1348 = vmatpush.msra.mxu1 %v1671_v33  ;;  %1368 = vmatpush.msra.mxu2 %v1671_v33 }
  0x36   : > { %497 = vst [vmem:[#allocation3 + $0xe8] sm:$0xf8] %v1671_v33  ;;  %1329 = vmatpush.msra.mxu0 %v1671_v33  ;;  %v1491_v38 = vld [vmem:[%s1772_s21 + $0x25] sm:$0x1]  ;;  %v1489_v39 = vld [vmem:[%s1772_s21 + $0x23] sm:$0x1] }
  0x37   : > { %227 = vrot.lane.b32.xlu1 %v225_v6, %s1661_s26  ;;  %1349 = vmatpush.msra.mxu1 %v1671_v33  ;;  %v1492_v40 = vld [vmem:[%s1772_s21 + $0x26] sm:$0x1]  ;;  %v1496_v42 = vld [vmem:[%s1772_s21 + $0x2a] sm:$0x1]  ;;  %v1493_v43 = vld [vmem:[%s1772_s21 + $0x27] sm:$0x1] }
  0x38   : > { %220 = vrot.lane.b32.xlu0 %v218_v7, %s1662_s27  ;;  %234 = vrot.lane.b32.xlu2 %v232_v8, %s1663_s28  ;;  %v1494_v44 = vld [vmem:[%s1772_s21 + $0x28] sm:$0x1]  ;;  %vm167_vm0 = vcmask 1042432   ;;  %vm168_vm1 = vcmask 686084   ;;  %v1495_v46 = vld [vmem:[%s1772_s21 + $0x29] sm:$0x1] }
  0x39   : > { %1369 = vmatpush.msra.mxu2 %v1671_v33  ;;  %1330 = vmatpush.msra.mxu0 %v1671_v33  ;;  %vm169_vm2 = vmor %vm168_vm1, %vm167_vm0  ;;  %v1497_v47 = vld [vmem:[%s1772_s21 + $0x2b] sm:$0x1]  ;;  %v1498_v48 = vld [vmem:[%s1772_s21 + $0x2c] sm:$0x1]  ;;  %vm176_vm3 = vcmask 467280   ;;  %vm183_vm4 = vcmask 631280  }
  0x3a   : > { %1350 = vmatpush.msra.mxu1 %v1671_v33  ;;  %170 = vst.msk [vmem:[#allocation2 + $0x8] sm:$0x77] %vm169_vm2, %v1671_v33  ;;  %v1499_v52 = vld [vmem:[%s1772_s21 + $0x2d] sm:$0x1]  ;;  %v1500_v53 = vld [vmem:[%s1772_s21 + $0x2e] sm:$0x1] }
  0x3b   : > { %1370 = vmatpush.msra.mxu2 %v1671_v33  ;;  %1331 = vmatpush.msra.mxu0 %v1671_v33  ;;  %v1501_v54 = vld [vmem:[%s1772_s21 + $0x2f] sm:$0x1]  ;;  %vm207_vm5 = vcmask 1041360   ;;  %vm208_vm6 = vcmask 77828   ;;  %vm190_vm7 = vcmask 795280   ;;  %vm2268_vm8 = vcmask 998400  }
  0x3c   : > { %1351 = vmatpush.msra.mxu1 %v1671_v33  ;;  %vm2267_vm9 = vcmask 959280   ;;  %vm1875_vm10 = vmor %vm208_vm6, %vm207_vm5  ;;  %vm2269_vm11 = vcmask 237680   ;;  %vm2266_vm12 = vcmask 401680   ;;  %vm2265_vm13 = vcmask 565680   ;;  %s1672_s8 = smov 125   ;;  %s1673_s9 = smov 126  }
  0x3d   : > { %1371 = vmatpush.msra.mxu2 %v1671_v33  ;;  %vm2264_vm14 = vcmask 729680   ;;  %vm244_vm15 = vcmask 893680   ;;  %vm254_vm0 = vcmask 1041296   ;;  %vm255_vm1 = vcmask 12292   ;;  %s1674_s15 = smov 127   ;;  %s1675_s16 = smov 124  }
  0x3e   : > { %vm251_vm2 = vcmask 932864   ;;  %vm1889_vm5 = vmor %vm255_vm1, %vm254_vm0  ;;  %vm263_vm6 = vcmask 172080   ;;  %vm291_vm0 = vcmask 828080   ;;  %vm2289_vm1 = vcmask 401680   ;;  %s1676_s19 = smov 45   ;;  %s1677_s20 = smov 44  }
  0x3f   : > { %248 = vrot.lane.b32.xlu1 %v246_v9, %s1664_s29  ;;  %s1678_s21 = smov 68   ;;  %p161_p6 = scmp.lt.s32.totalorder %s1727_s13, 1 }
  0x40   : > { %241 = vrot.lane.b32.xlu0 %v239_v10, %s1665_s30  ;;  %260 = vrot.lane.b32.xlu2 %v258_v11, %s1666_s3 }
  0x41   : > { %s2323_s13 = smov (!%p161_p6, %s1727_s13), 1 }
  0x47   : > { %274 = vrot.lane.b32.xlu1 %v272_v12, %s1667_s4 }
  0x48   : > { %267 = vrot.lane.b32.xlu0 %v265_v13, %s1668_s5  ;;  %281 = vrot.lane.b32.xlu2 %v279_v14, %s1669_s6 }
  0x4f   : > { %296 = vrot.lane.b32.xlu1 %v1470_v15, %s1656_s22 }
  0x50   : > { %288 = vrot.lane.b32.xlu0 %v286_v16, %s1670_s7  ;;  %302 = vrot.lane.b32.xlu2 %v1471_v17, %s1659_s24 }
  0x57   : > { %314 = vrot.lane.b32.xlu1 %v1473_v18, %s1658_s23 }
  0x58   : > { %308 = vrot.lane.b32.xlu0 %v1472_v19, %s1655_s12  ;;  %320 = vrot.lane.b32.xlu2 %v1474_v20, %s1657_s18 }
  0x5f   : > { %334 = vrot.lane.b32.xlu1 %v1476_v21, %s1662_s27 }
  0x60   : > { %328 = vrot.lane.b32.xlu0 %v1475_v22, %s1660_s25  ;;  %340 = vrot.lane.b32.xlu2 %v1477_v23, %s1661_s26 }
  0x67   : > { %352 = vrot.lane.b32.xlu1 %v1479_v24, %s1665_s30 }
  0x68   : > { %346 = vrot.lane.b32.xlu0 %v1478_v25, %s1663_s28  ;;  %358 = vrot.lane.b32.xlu2 %v1480_v26, %s1664_s29  ;;  %v517_v25 = vlaneseq }
  0x6f   : > { %372 = vrot.lane.b32.xlu1 %v1482_v27, %s1668_s5 }
  0x70   : > { %366 = vrot.lane.b32.xlu0 %v1481_v28, %s1666_s3  ;;  %378 = vrot.lane.b32.xlu2 %v1483_v29, %s1667_s4 }
  0x77   : > { %390 = vrot.lane.b32.xlu1 %v1485_v30, %s1670_s7 }
  0x78   : > { %384 = vrot.lane.b32.xlu0 %v1484_v31, %s1669_s6  ;;  %397 = vrot.lane.b32.xlu2 %v1486_v32, %s1656_s22  ;;  %s1680_s22 = smov 67  }
  0x7f   : > { %421 = vrot.lane.b32.xlu1 %v1490_v34, %s1657_s18  ;;  %s1681_s18 = smov 65  }
  0x80   : > { %403 = vrot.lane.b32.xlu0 %v1487_v35, %s1659_s24  ;;  %409 = vrot.lane.b32.xlu2 %v1488_v36, %s1655_s12  ;;  %s1679_s12 = smov 84   ;;  %s1683_s24 = smov 47  }
  0x82   : > { %v202_v37 = vpop.permute.xlu2 %201 }
  0x83   : > { %v203_v55 = vrot.slane %v202_v37, 4 }
  0x85   : > { %v205_v60 = vsel %vm2268_vm8, %v203_v55, %v202_v37 }
  0x87   : > { %429 = vrot.lane.b32.xlu1 %v1491_v38, %s1660_s25  ;;  %s1684_s25 = smov 48  }
  0x88   : > { %415 = vrot.lane.b32.xlu0 %v1489_v39, %s1658_s23  ;;  %435 = vrot.lane.b32.xlu2 %v1492_v40, %s1662_s27  ;;  %s1682_s23 = smov 64   ;;  %s1686_s27 = smov 105  }
  0x8a   : > { %v214_v41 = vpop.permute.xlu2 %213 }
  0x8f   : > { %459 = vrot.lane.b32.xlu1 %v1496_v42, %s1664_s29  ;;  %s1688_s29 = smov 104  }
  0x90   : > { %441 = vrot.lane.b32.xlu0 %v1493_v43, %s1661_s26  ;;  %447 = vrot.lane.b32.xlu2 %v1494_v44, %s1663_s28  ;;  %s2270_s26 = smov 107   ;;  %s1687_s28 = smov 106  }
  0x92   : > { %v235_v45 = vpop.permute.xlu2 %234 }
  0x97   : > { %467 = vrot.lane.b32.xlu1 %v1497_v47, %s1666_s3  ;;  %s1690_s3 = smov 88  }
  0x98   : > { %453 = vrot.lane.b32.xlu0 %v1495_v46, %s1665_s30  ;;  %473 = vrot.lane.b32.xlu2 %v1498_v48, %s1668_s5  ;;  %s1689_s30 = smov 87   ;;  %s1691_s5 = smov 85  }
  0x99   : > { %v188_v49 = vpop.permute.xlu1 %187 }
  0x9a   : > { %v174_v50 = vpop.permute.xlu0 %173  ;;  %v261_v51 = vpop.permute.xlu2 %260 }
  0x9b   : > { %177 = vst.msk [vmem:[#allocation2] sm:$0x1] %vm176_vm3, %v174_v50 }
  0x9f   : > { %485 = vrot.lane.b32.xlu1 %v1500_v53, %s1669_s6 }
  0xa0   : > { %479 = vrot.lane.b32.xlu0 %v1499_v52, %s1667_s4  ;;  %491 = vrot.lane.b32.xlu2 %v1501_v54, %s1670_s7 }
  0xa1   : > { %v195_v56 = vpop.permute.xlu1 %194 }
  0xa2   : > { %v181_v57 = vpop.permute.xlu0 %180  ;;  %v282_v59 = vpop.permute.xlu2 %281 }
  0xa3   : > { %184 = vst.msk [vmem:[#allocation2] sm:$0x1] %vm183_vm4, %v181_v57 }
  0xa4   : > { %191 = vst.msk [vmem:[#allocation2] sm:$0x1] %vm190_vm7, %v188_v49 }
  0xa5   : > { %198 = vst.msk [vmem:[#allocation2] sm:$0x1] %vm2267_vm9, %v195_v56 }
  0xa6   : > { %210 = vst.msk [vmem:[#allocation2] sm:$0x11] %vm1875_vm10, %v205_v60 }
  0xa7   : > { %217 = vst.msk [vmem:[#allocation2 + $0x4] sm:$0x1] %vm2269_vm11, %v214_v41 }
  0xa9   : > { %v228_v61 = vpop.permute.xlu1 %227 }
  0xaa   : > { %v221_v62 = vpop.permute.xlu0 %220  ;;  %v303_v63 = vpop.permute.xlu2 %302 }
  0xab   : > { %224 = vst.msk [vmem:[#allocation2 + $0x4] sm:$0x1] %vm2266_vm12, %v221_v62  ;;  %vm284_vm12 = vcmask 664080  }
  0xac   : > { %231 = vst.msk [vmem:[#allocation2 + $0x4] sm:$0x1] %vm2265_vm13, %v228_v61  ;;  %vm277_vm13 = vcmask 500080  }
  0xad   : > { %238 = vst.msk [vmem:[#allocation2 + $0x4] sm:$0x1] %vm2264_vm14, %v235_v45  ;;  %vm270_vm14 = vcmask 336080  }
  0xb1   : > { %v249_v0 = vpop.permute.xlu1 %248 }
  0xb2   : > { %v242_v1 = vpop.permute.xlu0 %241  ;;  %v250_v2 = vrot.slane %v249_v0, 4  ;;  %v321_v4 = vpop.permute.xlu2 %320 }
  0xb3   : > { %245 = vst.msk [vmem:[#allocation2 + $0x4] sm:$0x1] %vm244_vm15, %v242_v1  ;;  %v322_v12 = vrot.slane %v321_v4, 4 }
  0xb4   : > { %v252_v5 = vsel %vm251_vm2, %v250_v2, %v249_v0 }
  0xb5   : > { %257 = vst.msk [vmem:[#allocation2 + $0x4] sm:$0x11] %vm1889_vm5, %v252_v5  ;;  %v323_v13 = vsel %vm2268_vm8, %v322_v12, %v321_v4  ;;  %vm2291_vm8 = vcmask 729680  }
  0xb6   : > { %264 = vst.msk [vmem:[#allocation2 + $0x8] sm:$0x1] %vm263_vm6, %v261_v51 }
  0xb9   : > { %v275_v6 = vpop.permute.xlu1 %274 }
  0xba   : > { %v268_v7 = vpop.permute.xlu0 %267  ;;  %v341_v8 = vpop.permute.xlu2 %340 }
  0xbb   : > { %271 = vst.msk [vmem:[#allocation2 + $0x8] sm:$0x1] %vm270_vm14, %v268_v7 }
  0xbc   : > { %278 = vst.msk [vmem:[#allocation2 + $0x8] sm:$0x1] %vm277_vm13, %v275_v6 }
  0xbd   : > { %285 = vst.msk [vmem:[#allocation2 + $0x8] sm:$0x1] %vm284_vm12, %v282_v59 }
  0xc1   : > { %v297_v9 = vpop.permute.xlu1 %296 }
  0xc2   : > { %v289_v10 = vpop.permute.xlu0 %288  ;;  %299 = vst.msk [vmem:[#allocation2 + $0x1] sm:$0x1] %vm176_vm3, %v297_v9  ;;  %v359_v11 = vpop.permute.xlu2 %358 }
  0xc3   : > { %305 = vst.msk [vmem:[#allocation2 + $0x1] sm:$0x1] %vm183_vm4, %v303_v63  ;;  %v360_v24 = vrot.slane %v359_v11, 4 }
  0xc4   : > { %292 = vst.msk [vmem:[#allocation2 + $0x8] sm:$0x1] %vm291_vm0, %v289_v10 }
  0xc5   : > { %v361_v26 = vsel %vm251_vm2, %v360_v24, %v359_v11 }
  0xc9   : > { %v315_v14 = vpop.permute.xlu1 %314 }
  0xca   : > { %v309_v15 = vpop.permute.xlu0 %308  ;;  %v379_v17 = vpop.permute.xlu2 %378 }
  0xcb   : > { %311 = vst.msk [vmem:[#allocation2 + $0x1] sm:$0x1] %vm190_vm7, %v309_v15  ;;  %v545_v16 = vld [vmem:[#allocation2] ss:$4 sm:$0xf] }
  0xcc   : > { %317 = vst.msk [vmem:[#allocation2 + $0x1] sm:$0x1] %vm2267_vm9, %v315_v14  ;;  %547 = vrot.lane.b32.xlu2 %v545_v16, %s1672_s8  ;;  %v534_v18 = vld [vmem:[#allocation2] ss:$4 sm:$0xf]  ;;  %vm2290_vm9 = vcmask 565680  }
  0xcd   : > { %325 = vst.msk [vmem:[#allocation2 + $0x1] sm:$0x11] %vm1875_vm10, %v323_v13  ;;  %536 = vrot.lane.b32.xlu1 %v534_v18, %s1673_s9  ;;  %v523_v19 = vld [vmem:[#allocation2] ss:$4 sm:$0xf] }
  0xce   : > { %525 = vrot.lane.b32.xlu0 %v523_v19, %s1674_s15  ;;  %v556_v23 = vld [vmem:[#allocation2] ss:$4 sm:$0xf] }
  0xcf   : > { %v516_v30 = vld [vmem:[#allocation2] ss:$4 sm:$0x7] }
  0xd1   : > { %v335_v20 = vpop.permute.xlu1 %334 }
  0xd2   : > { %v329_v21 = vpop.permute.xlu0 %328  ;;  %v398_v22 = vpop.permute.xlu2 %397 }
  0xd3   : > { %331 = vst.msk [vmem:[#allocation2 + $0x5] sm:$0x1] %vm2269_vm11, %v329_v21  ;;  %vm1919_vm11 = vcmp.lt.s32.totalorder %v517_v25, 384 }
  0xd4   : > { %337 = vst.msk [vmem:[#allocation2 + $0x5] sm:$0x1] %vm2289_vm1, %v335_v20 }
  0xd5   : > { %343 = vst.msk [vmem:[#allocation2 + $0x5] sm:$0x1] %vm2290_vm9, %v341_v8  ;;  %vm2296_vm9 = vcmask 237680  }
  0xd6   : > { %400 = vst.msk [vmem:[#allocation2 + $0x2] sm:$0x1] %vm176_vm3, %v398_v22  ;;  %558 = vrot.lane.b32.xlu0 %v556_v23, %s1675_s16  ;;  %vm2294_vm3 = vcmask 998400  }
  0xd7   : > { %521 = vst.msk [vmem:[#allocation3] ss:$8 sm:$0x7] %vm1919_vm11, %v516_v30 }
  0xd9   : > { %v353_v27 = vpop.permute.xlu1 %352 }
  0xda   : > { %v347_v28 = vpop.permute.xlu0 %346  ;;  %v410_v33 = vpop.permute.xlu2 %409 }
  0xdb   : > { %349 = vst.msk [vmem:[#allocation2 + $0x5] sm:$0x1] %vm2291_vm8, %v347_v28  ;;  %vm2295_vm8 = vcmask 959280  }
  0xdc   : > { %355 = vst.msk [vmem:[#allocation2 + $0x5] sm:$0x1] %vm244_vm15, %v353_v27 }
  0xdd   : > { %363 = vst.msk [vmem:[#allocation2 + $0x5] sm:$0x11] %vm1889_vm5, %v361_v26 }
  0xe1   : > { %v373_v31 = vpop.permute.xlu1 %372 }
  0xe2   : > { %v367_v32 = vpop.permute.xlu0 %366  ;;  %v436_v38 = vpop.permute.xlu2 %435 }
  0xe3   : > { %369 = vst.msk [vmem:[#allocation2 + $0x9] sm:$0x1] %vm263_vm6, %v367_v32 }
  0xe4   : > { %375 = vst.msk [vmem:[#allocation2 + $0x9] sm:$0x1] %vm270_vm14, %v373_v31 }
  0xe5   : > { %381 = vst.msk [vmem:[#allocation2 + $0x9] sm:$0x1] %vm277_vm13, %v379_v17 }
  0xe9   : > { %v391_v34 = vpop.permute.xlu1 %390 }
  0xea   : > { %v385_v35 = vpop.permute.xlu0 %384  ;;  %v448_v43 = vpop.permute.xlu2 %447 }
  0xeb   : > { %387 = vst.msk [vmem:[#allocation2 + $0x9] sm:$0x1] %vm284_vm12, %v385_v35 }
  0xec   : > { %393 = vst.msk [vmem:[#allocation2 + $0x9] sm:$0x1] %vm291_vm0, %v391_v34 }
  0xf1   : > { %v422_v36 = vpop.permute.xlu1 %421 }
  0xf2   : > { %v404_v37 = vpop.permute.xlu0 %403  ;;  %v423_v39 = vrot.slane %v422_v36, 4  ;;  %v474_v48 = vpop.permute.xlu2 %473 }
  0xf3   : > { %406 = vst.msk [vmem:[#allocation2 + $0x2] sm:$0x1] %vm183_vm4, %v404_v37  ;;  %v788_v46 = vld [vmem:[#allocation2 + $0x1] ss:$4 sm:$0x7]  ;;  %vm2297_vm4 = vcmask 565680  }
  0xf4   : > { %412 = vst.msk [vmem:[#allocation2 + $0x2] sm:$0x1] %vm190_vm7, %v410_v33  ;;  %v424_v42 = vsel %vm2294_vm3, %v423_v39, %v422_v36  ;;  %vm2298_vm7 = vcmask 729680   ;;  %v1012_v22 = vld [vmem:[#allocation2 + $0x1] ss:$4 sm:$0xf] }
  0xf5   : > { %790 = vst.msk [vmem:[#allocation3 + $0x49] ss:$8 sm:$0x7] %vm1919_vm11, %v788_v46  ;;  %v1022_v24 = vld [vmem:[#allocation2 + $0x1] ss:$4 sm:$0xf] }
  0xf6   : > { %v932_v31 = vld [vmem:[#allocation2 + $0x1] ss:$4 sm:$0xf]  ;;  %vm781_vm3 = vcmask 359424  }
  0xf7   : > { %v952_v32 = vld [vmem:[#allocation2 + $0x1] ss:$4 sm:$0xf] }
  0xf8   : > { %v942_v33 = vld [vmem:[#allocation2 + $0x1] ss:$4 sm:$0xf] }
  0xf9   : > { %v430_v40 = vpop.permute.xlu1 %429  ;;  %v962_v34 = vld [vmem:[#allocation2 + $0x1] ss:$4 sm:$0xf] }
  0xfa   : > { %v416_v41 = vpop.permute.xlu0 %415  ;;  %v492_v52 = vpop.permute.xlu2 %491  ;;  %v982_v35 = vld [vmem:[#allocation2 + $0x1] ss:$4 sm:$0xf] }
  0xfb   : > { %418 = vst.msk [vmem:[#allocation2 + $0x2] sm:$0x1] %vm2295_vm8, %v416_v41  ;;  %v972_v36 = vld [vmem:[#allocation2 + $0x1] ss:$4 sm:$0xf]  ;;  %vm2274_vm8 = vcmask 859136  }
  0xfc   : > { %426 = vst.msk [vmem:[#allocation2 + $0x2] sm:$0x11] %vm1875_vm10, %v424_v42  ;;  %vm550_vm10 = vcmask 1022976   ;;  %v992_v37 = vld [vmem:[#allocation2 + $0x1] ss:$4 sm:$0xf] }
  0xfd   : > { %432 = vst.msk [vmem:[#allocation2 + $0x6] sm:$0x1] %vm2296_vm9, %v430_v40  ;;  %v1002_v39 = vld [vmem:[#allocation2 + $0x1] ss:$4 sm:$0xf]  ;;  %vm2272_vm9 = vcmask 687104  }
  0xfe   : > { %438 = vst.msk [vmem:[#allocation2 + $0x6] sm:$0x1] %vm2289_vm1, %v436_v38  ;;  %v852_v38 = vld [vmem:[#allocation2 + $0x1] ss:$4 sm:$0xf]  ;;  %vm693_vm1 = vcmask 547840  }
  0xff   : > { %v862_v40 = vld [vmem:[#allocation2 + $0x1] ss:$4 sm:$0xf] }
 0x100   : > { %v892_v46 = vld [vmem:[#allocation2 + $0x1] ss:$4 sm:$0xf] }
 0x101   : > { %v460_v44 = vpop.permute.xlu1 %459 }
 0x102   : > { %v442_v45 = vpop.permute.xlu0 %441  ;;  %v461_v47 = vrot.slane %v460_v44, 4 }
 0x103   : > { %444 = vst.msk [vmem:[#allocation2 + $0x6] sm:$0x1] %vm2297_vm4, %v442_v45  ;;  %v872_v45 = vld [vmem:[#allocation2 + $0x1] ss:$4 sm:$0xf]  ;;  %vm2273_vm4 = vcmask 711680  }
 0x104   : > { %450 = vst.msk [vmem:[#allocation2 + $0x6] sm:$0x1] %vm2298_vm7, %v448_v43  ;;  %v462_v51 = vsel %vm251_vm2, %v461_v47, %v460_v44  ;;  %v882_v44 = vld [vmem:[#allocation2 + $0x1] ss:$4 sm:$0xf]  ;;  %vm682_vm2 = vcmask 556032  }
 0x105   : > { %vm704_vm7 = vcmask 539648  }
 0x109   : > { %v468_v50 = vpop.permute.xlu1 %467 }
 0x10a   : > { %v454_v49 = vpop.permute.xlu0 %453 }
 0x10b   : > { %456 = vst.msk [vmem:[#allocation2 + $0x6] sm:$0x1] %vm244_vm15, %v454_v49  ;;  %vm2275_vm15 = vcmask 367616  }
 0x10c   : > { %464 = vst.msk [vmem:[#allocation2 + $0x6] sm:$0x11] %vm1889_vm5, %v462_v51  ;;  %v902_v51 = vld [vmem:[#allocation2 + $0x1] ss:$4 sm:$0xf]  ;;  %vm715_vm5 = vcmask 531456  }
 0x10d   : > { %470 = vst.msk [vmem:[#allocation2 + $0xa] sm:$0x1] %vm263_vm6, %v468_v50  ;;  %v912_v50 = vld [vmem:[#allocation2 + $0x1] ss:$4 sm:$0xf]  ;;  %vm748_vm6 = vcmask 384000  }
 0x10e   : > { %476 = vst.msk [vmem:[#allocation2 + $0xa] sm:$0x1] %vm270_vm14, %v474_v48  ;;  %vm561_vm14 = vcmask 1014784  }
 0x111   : > { %v486_v54 = vpop.permute.xlu1 %485 }
 0x112   : > { %v480_v53 = vpop.permute.xlu0 %479 }
 0x113   : > { %482 = vst.msk [vmem:[#allocation2 + $0xa] sm:$0x1] %vm277_vm13, %v480_v53  ;;  %vm528_vm13 = vcmask 1039360  }
 0x114   : > { %488 = vst.msk [vmem:[#allocation2 + $0xa] sm:$0x1] %vm284_vm12, %v486_v54  ;;  %vm2277_vm12 = vcmask 1031168  }
 0x115   : > { %494 = vst.msk [vmem:[#allocation2 + $0xa] sm:$0x1] %vm291_vm0, %v492_v52  ;;  %v922_v52 = vld [vmem:[#allocation2 + $0x1] ss:$4 sm:$0xf]  ;;  %vm2279_vm0 = vcmask 375808  }
 0x11c   : > { %v1257_v55 = vld [vmem:[#allocation2 + $0x2] ss:$4 sm:$0xf] }
 0x11d   : > { %v1247_v56 = vld [vmem:[#allocation2 + $0x2] ss:$4 sm:$0xf]  ;;  %1259 = vrot.lane.b32.xlu2 %v1257_v55, %s1676_s19 }
 0x11e   : > { %1249 = vrot.lane.b32.xlu1 %v1247_v56, %s1667_s4  ;;  %v1267_v57 = vld [vmem:[#allocation2 + $0x2] ss:$4 sm:$0xf]  ;;  %v792_v56 = vld [vmem:[#allocation2 + $0x1] ss:$4 sm:$0xf] }
 0x11f   : > { %1269 = vrot.lane.b32.xlu0 %v1267_v57, %s1677_s20  ;;  %v1177_v58 = vld [vmem:[#allocation2 + $0x2] ss:$4 sm:$0xf]  ;;  %v776_v57 = vld [vmem:[#allocation2] ss:$4 sm:$0xf] }
 0x120   : > { %v1167_v59 = vld [vmem:[#allocation2 + $0x2] ss:$4 sm:$0xf] }
 0x121   : > { %v1187_v60 = vld [vmem:[#allocation2 + $0x2] ss:$4 sm:$0xf] }
 0x122   : > { %v1033_v0 = vld [vmem:[#allocation2 + $0x2] ss:$4 sm:$0x7] }
 0x123   : > { %v1207_v1 = vld [vmem:[#allocation2 + $0x2] ss:$4 sm:$0xf]  ;;  %1035 = vst.msk [vmem:[#allocation3 + $0x92] ss:$8 sm:$0x7] %vm1919_vm11, %v1033_v0 }
 0x124   : > { %v1197_v2 = vld [vmem:[#allocation2 + $0x2] ss:$4 sm:$0xf] }
 0x125   : > { %1179 = vrot.lane.b32.xlu2 %v1177_v58, %s1678_s21  ;;  %v1217_v3 = vld [vmem:[#allocation2 + $0x2] ss:$4 sm:$0xf]  ;;  %v802_v58 = vld [vmem:[#allocation2 + $0x1] ss:$4 sm:$0xf] }
 0x126   : > { %1169 = vrot.lane.b32.xlu1 %v1167_v59, %s1679_s12  ;;  %v548_v61 = vpop.permute.xlu2 %547  ;;  %v1237_v4 = vld [vmem:[#allocation2 + $0x2] ss:$4 sm:$0xf] }
 0x127   : > { %1189 = vrot.lane.b32.xlu0 %v1187_v60, %s1680_s22  ;;  %v549_v62 = vrot.slane %v548_v61, 1  ;;  %v1227_v5 = vld [vmem:[#allocation2 + $0x2] ss:$4 sm:$0xf] }
 0x128   : > { %v1087_v6 = vld [vmem:[#allocation2 + $0x2] ss:$4 sm:$0xf] }
 0x129   : > { %v551_v63 = vsel %vm550_vm10, %v548_v61, %v549_v62  ;;  %v1107_v7 = vld [vmem:[#allocation2 + $0x2] ss:$4 sm:$0xf] }
 0x12a   : > { %554 = vst.msk [vmem:[#allocation3 + $0x3] ss:$8 sm:$0x7] %vm1919_vm11, %v551_v63  ;;  %v1097_v8 = vld [vmem:[#allocation2 + $0x2] ss:$4 sm:$0xf] }
 0x12b   : > { %v1117_v9 = vld [vmem:[#allocation2 + $0x2] ss:$4 sm:$0xf] }
 0x12c   : > { %v1137_v15 = vld [vmem:[#allocation2 + $0x2] ss:$4 sm:$0xf] }
 0x12d   : > { %1209 = vrot.lane.b32.xlu2 %v1207_v1, %s1681_s18  ;;  %v1127_v17 = vld [vmem:[#allocation2 + $0x2] ss:$4 sm:$0xf] }
 0x12e   : > { %1199 = vrot.lane.b32.xlu1 %v1197_v2, %s1669_s6  ;;  %v1147_v18 = vld [vmem:[#allocation2 + $0x2] ss:$4 sm:$0xf] }
 0x12f   : > { %1219 = vrot.lane.b32.xlu0 %v1217_v3, %s1682_s23  ;;  %v1157_v23 = vld [vmem:[#allocation2 + $0x2] ss:$4 sm:$0xf] }
 0x130   : > { %v1047_v25 = vld [vmem:[#allocation2 + $0x2] ss:$4 sm:$0xf] }
 0x131   : > { %v1037_v26 = vld [vmem:[#allocation2 + $0x2] ss:$4 sm:$0xf] }
 0x132   : > { %v1057_v27 = vld [vmem:[#allocation2 + $0x2] ss:$4 sm:$0xf] }
 0x133   : > { %v1077_v28 = vld [vmem:[#allocation2 + $0x2] ss:$4 sm:$0xf] }
 0x134   : > { %v1067_v30 = vld [vmem:[#allocation2 + $0x2] ss:$4 sm:$0xf] }
 0x135   : > { %1239 = vrot.lane.b32.xlu2 %v1237_v4, %s1683_s24  ;;  %v822_v4 = vld [vmem:[#allocation2 + $0x1] ss:$4 sm:$0xf] }
 0x136   : > { %1229 = vrot.lane.b32.xlu1 %v1227_v5, %s1684_s25  ;;  %v812_v5 = vld [vmem:[#allocation2 + $0x1] ss:$4 sm:$0xf] }
 0x137   : > { %1089 = vrot.lane.b32.xlu0 %v1087_v6, %s2270_s26  ;;  %s1692_s26 = smov 108   ;;  %v832_v6 = vld [vmem:[#allocation2 + $0x1] ss:$4 sm:$0xf] }
 0x13d   : > { %1109 = vrot.lane.b32.xlu2 %v1107_v7, %s1686_s27 }
 0x13e   : > { %1099 = vrot.lane.b32.xlu1 %v1097_v8, %s1687_s28 }
 0x13f   : > { %1119 = vrot.lane.b32.xlu0 %v1117_v9, %s1688_s29  ;;  %v537_v10 = vpop.permute.xlu1 %536 }
 0x140   : > { %v538_v11 = vrot.slane %v537_v10, 1  ;;  %v526_v12 = vpop.permute.xlu0 %525 }
 0x141   : > { %v527_v13 = vrot.slane %v526_v12, 1 }
 0x142   : > { %v540_v14 = vsel %vm2277_vm12, %v537_v10, %v538_v11 }
 0x143   : > { %543 = vst.msk [vmem:[#allocation3 + $0x2] ss:$8 sm:$0x7] %vm1919_vm11, %v540_v14  ;;  %v529_v16 = vsel %vm528_vm13, %v526_v12, %v527_v13 }
 0x144   : > { %532 = vst.msk [vmem:[#allocation3 + $0x1] ss:$8 sm:$0x7] %vm1919_vm11, %v529_v16 }
 0x145   : > { %1139 = vrot.lane.b32.xlu2 %v1137_v15, %s1689_s30 }
 0x146   : > { %1129 = vrot.lane.b32.xlu1 %v1127_v17, %s1690_s3 }
 0x147   : > { %1149 = vrot.lane.b32.xlu0 %v1147_v18, %s1670_s7 }
 0x148   : > { %v559_v19 = vpop.permute.xlu0 %558 }
 0x149   : > { %v560_v20 = vrot.slane %v559_v19, 1 }
 0x14b   : > { %v562_v21 = vsel %vm561_vm14, %v559_v19, %v560_v20  ;;  %v688_v19 = vld [vmem:[#allocation2] ss:$4 sm:$0xf]  ;;  %v842_v20 = vld [vmem:[#allocation2 + $0x1] ss:$4 sm:$0xf] }
 0x14c   : > { %565 = vst.msk [vmem:[#allocation3 + $0x4] ss:$8 sm:$0x7] %vm1919_vm11, %v562_v21  ;;  %v699_v21 = vld [vmem:[#allocation2] ss:$4 sm:$0xf] }
 0x14d   : > { %1014 = vrot.lane.b32.xlu2 %v1012_v22, %s1676_s19 }
 0x14e   : > { %1159 = vrot.lane.b32.xlu1 %v1157_v23, %s1691_s5 }
 0x14f   : > { %1024 = vrot.lane.b32.xlu0 %v1022_v24, %s1677_s20 }
 0x155   : > { %1049 = vrot.lane.b32.xlu2 %v1047_v25, %s1673_s9 }
 0x156   : > { %1039 = vrot.lane.b32.xlu1 %v1037_v26, %s1674_s15 }
 0x157   : > { %1059 = vrot.lane.b32.xlu0 %v1057_v27, %s1672_s8 }
 0x15d   : > { %1079 = vrot.lane.b32.xlu2 %v1077_v28, %s1692_s26 }
 0x15e   : > { %1069 = vrot.lane.b32.xlu1 %v1067_v30, %s1675_s16 }
 0x15f   : > { %934 = vrot.lane.b32.xlu0 %v932_v31, %s1678_s21 }
 0x165   : > { %954 = vrot.lane.b32.xlu2 %v952_v32, %s1669_s6  ;;  %v721_v32 = vld [vmem:[#allocation2] ss:$4 sm:$0xf] }
 0x166   : > { %944 = vrot.lane.b32.xlu1 %v942_v33, %s1680_s22  ;;  %v710_v33 = vld [vmem:[#allocation2] ss:$4 sm:$0xf] }
 0x167   : > { %964 = vrot.lane.b32.xlu0 %v962_v34, %s1681_s18  ;;  %v732_v34 = vld [vmem:[#allocation2] ss:$4 sm:$0xf] }
 0x16d   : > { %984 = vrot.lane.b32.xlu2 %v982_v35, %s1684_s25 }
 0x16e   : > { %974 = vrot.lane.b32.xlu1 %v972_v36, %s1682_s23 }
 0x16f   : > { %994 = vrot.lane.b32.xlu0 %v992_v37, %s1683_s24 }
 0x175   : > { %854 = vrot.lane.b32.xlu2 %v852_v38, %s1687_s28 }
 0x176   : > { %1004 = vrot.lane.b32.xlu1 %v1002_v39, %s1667_s4 }
 0x177   : > { %864 = vrot.lane.b32.xlu0 %v862_v40, %s1686_s27  ;;  %v1260_v41 = vpop.permute.xlu2 %1259 }
 0x178   : > { %v1261_v42 = vrot.slane %v1260_v41, 1 }
 0x17a   : > { %v1262_v43 = vsel %vm2275_vm15, %v1260_v41, %v1261_v42 }
 0x17b   : > { %1265 = vst.msk [vmem:[#allocation3 + $0xd9] ss:$8 sm:$0x7] %vm1919_vm11, %v1262_v43 }
 0x17d   : > { %884 = vrot.lane.b32.xlu2 %v882_v44, %s1690_s3  ;;  %v754_v44 = vld [vmem:[#allocation2] ss:$4 sm:$0xf] }
 0x17e   : > { %874 = vrot.lane.b32.xlu1 %v872_v45, %s1688_s29  ;;  %v743_v45 = vld [vmem:[#allocation2] ss:$4 sm:$0xf] }
 0x17f   : > { %894 = vrot.lane.b32.xlu0 %v892_v46, %s1689_s30  ;;  %v1180_v47 = vpop.permute.xlu2 %1179  ;;  %v765_v46 = vld [vmem:[#allocation2] ss:$4 sm:$0xf] }
 0x180   : > { %v1181_v48 = vrot.slane %v1180_v47, 1 }
 0x182   : > { %v1182_v49 = vsel %vm682_vm2, %v1180_v47, %v1181_v48 }
 0x183   : > { %1185 = vst.msk [vmem:[#allocation3 + $0xc1] ss:$8 sm:$0x7] %vm1919_vm11, %v1182_v49 }
 0x185   : > { %914 = vrot.lane.b32.xlu2 %v912_v50, %s1691_s5 }
 0x186   : > { %904 = vrot.lane.b32.xlu1 %v902_v51, %s1670_s7 }
 0x187   : > { %924 = vrot.lane.b32.xlu0 %v922_v52, %s1679_s12  ;;  %v1210_v53 = vpop.permute.xlu2 %1209 }
 0x188   : > { %v1211_v54 = vrot.slane %v1210_v53, 1 }
 0x18a   : > { %v1212_v55 = vsel %vm715_vm5, %v1210_v53, %v1211_v54 }
 0x18b   : > { %1215 = vst.msk [vmem:[#allocation3 + $0xc4] ss:$8 sm:$0x7] %vm1919_vm11, %v1212_v55 }
 0x18d   : > { %794 = vrot.lane.b32.xlu2 %v792_v56, %s1674_s15 }
 0x18e   : > { %778 = vrot.lane.b32.xlu1 %v776_v57, %s1677_s20 }
 0x18f   : > { %804 = vrot.lane.b32.xlu0 %v802_v58, %s1673_s9  ;;  %v1240_v59 = vpop.permute.xlu2 %1239 }
 0x190   : > { %v1250_v60 = vpop.permute.xlu1 %1249  ;;  %v1241_v61 = vrot.slane %v1240_v59, 1 }
 0x191   : > { %v1251_v62 = vrot.slane %v1250_v60, 1  ;;  %v1270_v63 = vpop.permute.xlu0 %1269 }
 0x192   : > { %v1271_v0 = vrot.slane %v1270_v63, 1  ;;  %v1242_v1 = vsel %vm748_vm6, %v1240_v59, %v1241_v61  ;;  %v611_v59 = vld [vmem:[#allocation2] ss:$4 sm:$0xf] }
 0x193   : > { %v1252_v2 = vsel %vm2279_vm0, %v1250_v60, %v1251_v62  ;;  %1245 = vst.msk [vmem:[#allocation3 + $0xc7] ss:$8 sm:$0x7] %vm1919_vm11, %v1242_v1  ;;  %v600_v60 = vld [vmem:[#allocation2] ss:$4 sm:$0xf] }
 0x194   : > { %v1272_v3 = vsel %vm781_vm3, %v1270_v63, %v1271_v0  ;;  %1255 = vst.msk [vmem:[#allocation3 + $0xd8] ss:$8 sm:$0x7] %vm1919_vm11, %v1252_v2  ;;  %v622_v61 = vld [vmem:[#allocation2] ss:$4 sm:$0xf] }
 0x195   : > { %1275 = vst.msk [vmem:[#allocation3 + $0xda] ss:$8 sm:$0x7] %vm1919_vm11, %v1272_v3  ;;  %824 = vrot.lane.b32.xlu2 %v822_v4, %s1675_s16  ;;  %vm649_vm0 = vcmask 703488  }
 0x196   : > { %814 = vrot.lane.b32.xlu1 %v812_v5, %s1672_s8  ;;  %s2299_s8 = smov 107  }
 0x197   : > { %834 = vrot.lane.b32.xlu0 %v832_v6, %s1692_s26  ;;  %v1110_v7 = vpop.permute.xlu2 %1109 }
 0x198   : > { %v1170_v8 = vpop.permute.xlu1 %1169  ;;  %v1111_v9 = vrot.slane %v1110_v7, 1 }
 0x199   : > { %v1171_v10 = vrot.slane %v1170_v8, 1  ;;  %v1190_v11 = vpop.permute.xlu0 %1189 }
 0x19a   : > { %v1191_v12 = vrot.slane %v1190_v11, 1  ;;  %v1112_v13 = vsel %vm2274_vm8, %v1110_v7, %v1111_v9  ;;  %vm2276_vm8 = vcmask 875520   ;;  %v644_v7 = vld [vmem:[#allocation2] ss:$4 sm:$0xf] }
 0x19b   : > { %v1172_v14 = vsel %vm2272_vm9, %v1170_v8, %v1171_v10  ;;  %1115 = vst.msk [vmem:[#allocation3 + $0xaa] ss:$8 sm:$0x7] %vm1919_vm11, %v1112_v13  ;;  %vm726_vm9 = vcmask 523264  }
 0x19c   : > { %v1192_v15 = vsel %vm693_vm1, %v1190_v11, %v1191_v12  ;;  %1175 = vst.msk [vmem:[#allocation3 + $0xc0] ss:$8 sm:$0x7] %vm1919_vm11, %v1172_v14  ;;  %v1305_v16 = vld [vmem:[#allocation3 + $0xd8] sm:$0xff]  ;;  %v1306_v17 = vld [vmem:[#allocation3 + $0xe0] sm:$0xff]  ;;  %v1307_v18 = vld [vmem:[#allocation3 + $0xe8] sm:$0xff] }
 0x19d   : > { %1195 = vst.msk [vmem:[#allocation3 + $0xc2] ss:$8 sm:$0x7] %vm1919_vm11, %v1192_v15  ;;  %1332 = vmatpush.msra.mxu0 %v1305_v16  ;;  %1352 = vmatpush.msra.mxu1 %v1306_v17  ;;  %v633_v8 = vld [vmem:[#allocation2] ss:$4 sm:$0xf] }
 0x19e   : > { %1372 = vmatpush.msra.mxu2 %v1307_v18  ;;  %690 = vrot.lane.b32.xlu2 %v688_v19, %s1680_s22  ;;  %v655_v9 = vld [vmem:[#allocation2] ss:$4 sm:$0xf] }
 0x19f   : > { %844 = vrot.lane.b32.xlu1 %v842_v20, %s2299_s8  ;;  %701 = vrot.lane.b32.xlu0 %v699_v21, %s1669_s6  ;;  %v1140_v22 = vpop.permute.xlu2 %1139  ;;  %v677_v19 = vld [vmem:[#allocation2] ss:$4 sm:$0xf] }
 0x1a0   : > { %v1200_v23 = vpop.permute.xlu1 %1199  ;;  %v1141_v24 = vrot.slane %v1140_v22, 1  ;;  %v666_v20 = vld [vmem:[#allocation2] ss:$4 sm:$0xf] }
 0x1a1   : > { %v1201_v25 = vrot.slane %v1200_v23, 1  ;;  %v1220_v26 = vpop.permute.xlu0 %1219  ;;  %v567_v21 = vld [vmem:[#allocation2] ss:$4 sm:$0xf] }
 0x1a2   : > { %v1221_v27 = vrot.slane %v1220_v26, 1  ;;  %v1142_v28 = vsel %vm2273_vm4, %v1140_v22, %v1141_v24  ;;  %vm737_vm4 = vcmask 392192  }
 0x1a3   : > { %v1202_v30 = vsel %vm704_vm7, %v1200_v23, %v1201_v25  ;;  %1145 = vst.msk [vmem:[#allocation3 + $0xad] ss:$8 sm:$0x7] %vm1919_vm11, %v1142_v28 }
 0x1a4   : > { %v1222_v31 = vsel %vm726_vm9, %v1220_v26, %v1221_v27  ;;  %1205 = vst.msk [vmem:[#allocation3 + $0xc3] ss:$8 sm:$0x7] %vm1919_vm11, %v1202_v30 }
 0x1a5   : > { %1225 = vst.msk [vmem:[#allocation3 + $0xc5] ss:$8 sm:$0x7] %vm1919_vm11, %v1222_v31 }
 0x1a6   : > { %723 = vrot.lane.b32.xlu2 %v721_v32, %s1682_s23 }
 0x1a7   : > { %712 = vrot.lane.b32.xlu1 %v710_v33, %s1681_s18  ;;  %734 = vrot.lane.b32.xlu0 %v732_v34, %s1684_s25  ;;  %v1015_v35 = vpop.permute.xlu2 %1014 }
 0x1a8   : > { %v1230_v36 = vpop.permute.xlu1 %1229  ;;  %v1016_v37 = vrot.slane %v1015_v35, 1 }
 0x1a9   : > { %v1231_v38 = vrot.slane %v1230_v36, 1  ;;  %v1090_v39 = vpop.permute.xlu0 %1089 }
 0x1aa   : > { %v1091_v40 = vrot.slane %v1090_v39, 1  ;;  %v1017_v41 = vsel %vm2275_vm15, %v1015_v35, %v1016_v37  ;;  %vm594_vm15 = vcmask 867328   ;;  %v589_v35 = vld [vmem:[#allocation2] ss:$4 sm:$0xf] }
 0x1ab   : > { %v1232_v42 = vsel %vm737_vm4, %v1230_v36, %v1231_v38  ;;  %1020 = vst.msk [vmem:[#allocation3 + $0x90] ss:$8 sm:$0x7] %vm1919_vm11, %v1017_v41  ;;  %v578_v36 = vld [vmem:[#allocation2] ss:$4 sm:$0xf] }
 0x1ac   : > { %v1092_v43 = vsel %vm2276_vm8, %v1090_v39, %v1091_v40  ;;  %1235 = vst.msk [vmem:[#allocation3 + $0xc6] ss:$8 sm:$0x7] %vm1919_vm11, %v1232_v42  ;;  %vm2278_vm8 = vcmask 850944  }
 0x1ad   : > { %1095 = vst.msk [vmem:[#allocation3 + $0xa8] ss:$8 sm:$0x7] %vm1919_vm11, %v1092_v43 }
 0x1ae   : > { %756 = vrot.lane.b32.xlu2 %v754_v44, %s1667_s4 }
 0x1af   : > { %745 = vrot.lane.b32.xlu1 %v743_v45, %s1683_s24  ;;  %767 = vrot.lane.b32.xlu0 %v765_v46, %s1676_s19  ;;  %v1050_v47 = vpop.permute.xlu2 %1049 }
 0x1b0   : > { %v1100_v48 = vpop.permute.xlu1 %1099  ;;  %v1051_v49 = vrot.slane %v1050_v47, 1 }
 0x1b1   : > { %v1101_v50 = vrot.slane %v1100_v48, 1  ;;  %v1120_v51 = vpop.permute.xlu0 %1119 }
 0x1b2   : > { %v1121_v52 = vrot.slane %v1120_v51, 1  ;;  %v1052_v53 = vsel %vm2277_vm12, %v1050_v47, %v1051_v49  ;;  %vm2280_vm12 = vcmask 883712  }
 0x1b3   : > { %v1102_v54 = vsel %vm594_vm15, %v1100_v48, %v1101_v50  ;;  %1055 = vst.msk [vmem:[#allocation3 + $0x94] ss:$8 sm:$0x7] %vm1919_vm11, %v1052_v53  ;;  %v1302_v56 = vld [vmem:[#allocation3 + $0xc0] sm:$0xff]  ;;  %v1303_v57 = vld [vmem:[#allocation3 + $0xc8] sm:$0xff]  ;;  %v1304_v58 = vld [vmem:[#allocation3 + $0xd0] sm:$0xff] }
 0x1b4   : > { %v1122_v55 = vsel %vm2278_vm8, %v1120_v51, %v1121_v52  ;;  %1105 = vst.msk [vmem:[#allocation3 + $0xa9] ss:$8 sm:$0x7] %vm1919_vm11, %v1102_v54  ;;  %1333 = vmatpush.msra.mxu0 %v1302_v56  ;;  %1353 = vmatpush.msra.mxu1 %v1303_v57  ;;  %vm2282_vm8 = vcmask 719872  }
 0x1b5   : > { %1125 = vst.msk [vmem:[#allocation3 + $0xab] ss:$8 sm:$0x7] %vm1919_vm11, %v1122_v55  ;;  %1373 = vmatpush.msra.mxu2 %v1304_v58 }
 0x1b6   : > { %613 = vrot.lane.b32.xlu2 %v611_v59, %s1688_s29 }
 0x1b7   : > { %602 = vrot.lane.b32.xlu1 %v600_v60, %s1686_s27  ;;  %624 = vrot.lane.b32.xlu0 %v622_v61, %s1690_s3  ;;  %v1080_v62 = vpop.permute.xlu2 %1079 }
 0x1b8   : > { %v1130_v63 = vpop.permute.xlu1 %1129  ;;  %v1081_v0 = vrot.slane %v1080_v62, 1 }
 0x1b9   : > { %v1131_v1 = vrot.slane %v1130_v63, 1  ;;  %v1150_v2 = vpop.permute.xlu0 %1149 }
 0x1ba   : > { %v1151_v3 = vrot.slane %v1150_v2, 1  ;;  %v1082_v4 = vsel %vm2280_vm12, %v1080_v62, %v1081_v0  ;;  %vm2281_vm12 = vcmask 695296  }
 0x1bb   : > { %v1132_v5 = vsel %vm2282_vm8, %v1130_v63, %v1131_v1  ;;  %1085 = vst.msk [vmem:[#allocation3 + $0x97] ss:$8 sm:$0x7] %vm1919_vm11, %v1082_v4 }
 0x1bc   : > { %v1152_v6 = vsel %vm649_vm0, %v1150_v2, %v1151_v3  ;;  %1135 = vst.msk [vmem:[#allocation3 + $0xac] ss:$8 sm:$0x7] %vm1919_vm11, %v1132_v5 }
 0x1bd   : > { %1155 = vst.msk [vmem:[#allocation3 + $0xae] ss:$8 sm:$0x7] %vm1919_vm11, %v1152_v6 }
 0x1be   : > { %646 = vrot.lane.b32.xlu2 %v644_v7, %s1670_s7  ;;  %s1507_s7 = smul.u32 6, %s2323_s13 }
 0x1bf   : > { %635 = vrot.lane.b32.xlu1 %v633_v8, %s1689_s30  ;;  %657 = vrot.lane.b32.xlu0 %v655_v9, %s1691_s5  ;;  %v955_v10 = vpop.permute.xlu2 %954 }
 0x1c0   : > { %v1160_v11 = vpop.permute.xlu1 %1159  ;;  %v956_v12 = vrot.slane %v955_v10, 1  ;;  %s165_s16 = scalar_lea.vmem %s2263_s2, %s1507_s7 }
 0x1c1   : > { %v1161_v13 = vrot.slane %v1160_v11, 1  ;;  %v1025_v14 = vpop.permute.xlu0 %1024 }
 0x1c2   : > { %v1026_v15 = vrot.slane %v1025_v14, 1  ;;  %v957_v16 = vsel %vm704_vm7, %v955_v10, %v956_v12 }
 0x1c3   : > { %v1162_v17 = vsel %vm2281_vm12, %v1160_v11, %v1161_v13  ;;  %960 = vst.msk [vmem:[#allocation3 + $0x7a] ss:$8 sm:$0x7] %vm1919_vm11, %v957_v16 }
 0x1c4   : > { %v1027_v18 = vsel %vm781_vm3, %v1025_v14, %v1026_v15  ;;  %1165 = vst.msk [vmem:[#allocation3 + $0xaf] ss:$8 sm:$0x7] %vm1919_vm11, %v1162_v17 }
 0x1c5   : > { %1030 = vst.msk [vmem:[#allocation3 + $0x91] ss:$8 sm:$0x7] %vm1919_vm11, %v1027_v18 }
 0x1c6   : > { %679 = vrot.lane.b32.xlu2 %v677_v19, %s1678_s21 }
 0x1c7   : > { %668 = vrot.lane.b32.xlu1 %v666_v20, %s1679_s12  ;;  %569 = vrot.lane.b32.xlu0 %v567_v21, %s1692_s26  ;;  %v985_v22 = vpop.permute.xlu2 %984 }
 0x1c8   : > { %v1040_v23 = vpop.permute.xlu1 %1039  ;;  %v986_v24 = vrot.slane %v985_v22, 1 }
 0x1c9   : > { %v1041_v25 = vrot.slane %v1040_v23, 1  ;;  %v1060_v26 = vpop.permute.xlu0 %1059 }
 0x1ca   : > { %v1061_v27 = vrot.slane %v1060_v26, 1  ;;  %v987_v28 = vsel %vm737_vm4, %v985_v22, %v986_v24 }
 0x1cb   : > { %v1042_v30 = vsel %vm528_vm13, %v1040_v23, %v1041_v25  ;;  %990 = vst.msk [vmem:[#allocation3 + $0x7d] ss:$8 sm:$0x7] %vm1919_vm11, %v987_v28  ;;  %v1299_v32 = vld [vmem:[#allocation3 + $0xa8] sm:$0xff]  ;;  %v1300_v33 = vld [vmem:[#allocation3 + $0xb0] sm:$0xff]  ;;  %v1301_v34 = vld [vmem:[#allocation3 + $0xb8] sm:$0xff] }
 0x1cc   : > { %v1062_v31 = vsel %vm550_vm10, %v1060_v26, %v1061_v27  ;;  %1045 = vst.msk [vmem:[#allocation3 + $0x93] ss:$8 sm:$0x7] %vm1919_vm11, %v1042_v30  ;;  %1334 = vmatpush.msra.mxu0 %v1299_v32  ;;  %1354 = vmatpush.msra.mxu1 %v1300_v33 }
 0x1cd   : > { %1065 = vst.msk [vmem:[#allocation3 + $0x95] ss:$8 sm:$0x7] %vm1919_vm11, %v1062_v31  ;;  %1374 = vmatpush.msra.mxu2 %v1301_v34 }
 0x1ce   : > { %591 = vrot.lane.b32.xlu2 %v589_v35, %s1687_s28 }
 0x1cf   : > { %580 = vrot.lane.b32.xlu1 %v578_v36, %s2299_s8  ;;  %v855_v37 = vpop.permute.xlu2 %854 }
 0x1d0   : > { %v1070_v38 = vpop.permute.xlu1 %1069  ;;  %v856_v39 = vrot.slane %v855_v37, 1 }
 0x1d1   : > { %v1071_v40 = vrot.slane %v1070_v38, 1  ;;  %v935_v41 = vpop.permute.xlu0 %934 }
 0x1d2   : > { %v936_v42 = vrot.slane %v935_v41, 1  ;;  %v857_v43 = vsel %vm594_vm15, %v855_v37, %v856_v39 }
 0x1d3   : > { %v1072_v44 = vsel %vm561_vm14, %v1070_v38, %v1071_v40  ;;  %860 = vst.msk [vmem:[#allocation3 + $0x60] ss:$8 sm:$0x7] %vm1919_vm11, %v857_v43 }
 0x1d4   : > { %v937_v45 = vsel %vm682_vm2, %v935_v41, %v936_v42  ;;  %1075 = vst.msk [vmem:[#allocation3 + $0x96] ss:$8 sm:$0x7] %vm1919_vm11, %v1072_v44 }
 0x1d5   : > { %940 = vst.msk [vmem:[#allocation3 + $0x78] ss:$8 sm:$0x7] %vm1919_vm11, %v937_v45 }
 0x1d7   : > { %v885_v46 = vpop.permute.xlu2 %884 }
 0x1d8   : > { %v945_v47 = vpop.permute.xlu1 %944  ;;  %v886_v48 = vrot.slane %v885_v46, 1 }
 0x1d9   : > { %v946_v49 = vrot.slane %v945_v47, 1  ;;  %v965_v50 = vpop.permute.xlu0 %964 }
 0x1da   : > { %v966_v51 = vrot.slane %v965_v50, 1  ;;  %v887_v52 = vsel %vm2282_vm8, %v885_v46, %v886_v48  ;;  %vm2301_vm8 = vcmask 859136  }
 0x1db   : > { %v947_v53 = vsel %vm693_vm1, %v945_v47, %v946_v49  ;;  %890 = vst.msk [vmem:[#allocation3 + $0x63] ss:$8 sm:$0x7] %vm1919_vm11, %v887_v52  ;;  %v1296_v55 = vld [vmem:[#allocation3 + $0x90] sm:$0xff]  ;;  %v1297_v56 = vld [vmem:[#allocation3 + $0x98] sm:$0xff]  ;;  %v1298_v57 = vld [vmem:[#allocation3 + $0xa0] sm:$0xff] }
 0x1dc   : > { %v967_v54 = vsel %vm715_vm5, %v965_v50, %v966_v51  ;;  %950 = vst.msk [vmem:[#allocation3 + $0x79] ss:$8 sm:$0x7] %vm1919_vm11, %v947_v53  ;;  %1335 = vmatpush.msra.mxu0 %v1296_v55  ;;  %1355 = vmatpush.msra.mxu1 %v1297_v56 }
 0x1dd   : > { %970 = vst.msk [vmem:[#allocation3 + $0x7b] ss:$8 sm:$0x7] %vm1919_vm11, %v967_v54  ;;  %1375 = vmatpush.msra.mxu2 %v1298_v57 }
 0x1df   : > { %v915_v58 = vpop.permute.xlu2 %914 }
 0x1e0   : > { %v975_v59 = vpop.permute.xlu1 %974  ;;  %v916_v60 = vrot.slane %v915_v58, 1 }
 0x1e1   : > { %v976_v61 = vrot.slane %v975_v59, 1  ;;  %v995_v62 = vpop.permute.xlu0 %994 }
 0x1e2   : > { %v996_v63 = vrot.slane %v995_v62, 1  ;;  %v917_v0 = vsel %vm2281_vm12, %v915_v58, %v916_v60  ;;  %vm2300_vm12 = vcmask 375808  }
 0x1e3   : > { %v977_v1 = vsel %vm726_vm9, %v975_v59, %v976_v61  ;;  %920 = vst.msk [vmem:[#allocation3 + $0x66] ss:$8 sm:$0x7] %vm1919_vm11, %v917_v0 }
 0x1e4   : > { %v997_v2 = vsel %vm748_vm6, %v995_v62, %v996_v63  ;;  %980 = vst.msk [vmem:[#allocation3 + $0x7c] ss:$8 sm:$0x7] %vm1919_vm11, %v977_v1 }
 0x1e5   : > { %1000 = vst.msk [vmem:[#allocation3 + $0x7e] ss:$8 sm:$0x7] %vm1919_vm11, %v997_v2 }
 0x1e7   : > { %v795_v3 = vpop.permute.xlu2 %794 }
 0x1e8   : > { %v1005_v4 = vpop.permute.xlu1 %1004  ;;  %v796_v5 = vrot.slane %v795_v3, 1 }
 0x1e9   : > { %v1006_v6 = vrot.slane %v1005_v4, 1  ;;  %v865_v7 = vpop.permute.xlu0 %864 }
 0x1ea   : > { %v866_v8 = vrot.slane %v865_v7, 1  ;;  %v797_v9 = vsel %vm528_vm13, %v795_v3, %v796_v5  ;;  %vm2303_vm13 = vcmask 711680  }
 0x1eb   : > { %v1007_v10 = vsel %vm2300_vm12, %v1005_v4, %v1006_v6  ;;  %800 = vst.msk [vmem:[#allocation3 + $0x4a] ss:$8 sm:$0x7] %vm1919_vm11, %v797_v9  ;;  %vm2302_vm12 = vcmask 850944  }
 0x1ec   : > { %v867_v11 = vsel %vm2301_vm8, %v865_v7, %v866_v8  ;;  %1010 = vst.msk [vmem:[#allocation3 + $0x7f] ss:$8 sm:$0x7] %vm1919_vm11, %v1007_v10  ;;  %vm2305_vm8 = vcmask 1031168  }
 0x1ed   : > { %870 = vst.msk [vmem:[#allocation3 + $0x61] ss:$8 sm:$0x7] %vm1919_vm11, %v867_v11 }
 0x1ef   : > { %v825_v12 = vpop.permute.xlu2 %824 }
 0x1f0   : > { %v875_v13 = vpop.permute.xlu1 %874  ;;  %v826_v14 = vrot.slane %v825_v12, 1 }
 0x1f1   : > { %v876_v15 = vrot.slane %v875_v13, 1  ;;  %v895_v16 = vpop.permute.xlu0 %894 }
 0x1f2   : > { %v896_v17 = vrot.slane %v895_v16, 1  ;;  %v827_v18 = vsel %vm561_vm14, %v825_v12, %v826_v14  ;;  %vm2304_vm14 = vcmask 687104  }
 0x1f3   : > { %v877_v19 = vsel %vm2302_vm12, %v875_v13, %v876_v15  ;;  %830 = vst.msk [vmem:[#allocation3 + $0x4d] ss:$8 sm:$0x7] %vm1919_vm11, %v827_v18  ;;  %v1293_v21 = vld [vmem:[#allocation3 + $0x78] sm:$0xff]  ;;  %v1294_v22 = vld [vmem:[#allocation3 + $0x80] sm:$0xff]  ;;  %v1295_v23 = vld [vmem:[#allocation3 + $0x88] sm:$0xff] }
 0x1f4   : > { %v897_v20 = vsel %vm2303_vm13, %v895_v16, %v896_v17  ;;  %880 = vst.msk [vmem:[#allocation3 + $0x62] ss:$8 sm:$0x7] %vm1919_vm11, %v877_v19  ;;  %1336 = vmatpush.msra.mxu0 %v1293_v21  ;;  %1356 = vmatpush.msra.mxu1 %v1294_v22 }
 0x1f5   : > { %900 = vst.msk [vmem:[#allocation3 + $0x64] ss:$8 sm:$0x7] %vm1919_vm11, %v897_v20  ;;  %1376 = vmatpush.msra.mxu2 %v1295_v23 }
 0x1f8   : > { %v905_v24 = vpop.permute.xlu1 %904  ;;  %v691_v25 = vpop.permute.xlu2 %690 }
 0x1f9   : > { %v906_v26 = vrot.slane %v905_v24, 1  ;;  %v925_v27 = vpop.permute.xlu0 %924  ;;  %v692_v28 = vrot.slane %v691_v25, 1 }
 0x1fa   : > { %v926_v30 = vrot.slane %v925_v27, 1 }
 0x1fb   : > { %v907_v31 = vsel %vm649_vm0, %v905_v24, %v906_v26  ;;  %v694_v32 = vsel %vm693_vm1, %v691_v25, %v692_v28  ;;  %vm2309_vm1 = vcmask 875520  }
 0x1fc   : > { %910 = vst.msk [vmem:[#allocation3 + $0x65] ss:$8 sm:$0x7] %vm1919_vm11, %v907_v31  ;;  %v927_v33 = vsel %vm2304_vm14, %v925_v27, %v926_v30 }
 0x1fd   : > { %697 = vst.msk [vmem:[#allocation3 + $0x30] ss:$8 sm:$0x7] %vm1919_vm11, %v694_v32 }
 0x1fe   : > { %930 = vst.msk [vmem:[#allocation3 + $0x67] ss:$8 sm:$0x7] %vm1919_vm11, %v927_v33 }
 0x200   : > { %v779_v34 = vpop.permute.xlu1 %778  ;;  %v724_v35 = vpop.permute.xlu2 %723 }
 0x201   : > { %v780_v36 = vrot.slane %v779_v34, 1  ;;  %v805_v37 = vpop.permute.xlu0 %804  ;;  %v725_v38 = vrot.slane %v724_v35, 1 }
 0x202   : > { %v806_v39 = vrot.slane %v805_v37, 1 }
 0x203   : > { %v782_v40 = vsel %vm781_vm3, %v779_v34, %v780_v36  ;;  %v727_v41 = vsel %vm726_vm9, %v724_v35, %v725_v38  ;;  %vm2306_vm3 = vcmask 375808   ;;  %vm2307_vm9 = vcmask 883712  }
 0x204   : > { %785 = vst.msk [vmem:[#allocation3 + $0x48] ss:$8 sm:$0x7] %vm1919_vm11, %v782_v40  ;;  %v807_v42 = vsel %vm2305_vm8, %v805_v37, %v806_v39 }
 0x205   : > { %730 = vst.msk [vmem:[#allocation3 + $0x33] ss:$8 sm:$0x7] %vm1919_vm11, %v727_v41  ;;  %v1290_v43 = vld [vmem:[#allocation3 + $0x60] sm:$0xff]  ;;  %v1291_v44 = vld [vmem:[#allocation3 + $0x68] sm:$0xff]  ;;  %v1292_v45 = vld [vmem:[#allocation3 + $0x70] sm:$0xff] }
 0x206   : > { %810 = vst.msk [vmem:[#allocation3 + $0x4b] ss:$8 sm:$0x7] %vm1919_vm11, %v807_v42  ;;  %1337 = vmatpush.msra.mxu0 %v1290_v43  ;;  %1357 = vmatpush.msra.mxu1 %v1291_v44 }
 0x207   : > { %1377 = vmatpush.msra.mxu2 %v1292_v45 }
 0x208   : > { %v815_v46 = vpop.permute.xlu1 %814  ;;  %v757_v47 = vpop.permute.xlu2 %756 }
 0x209   : > { %v816_v48 = vrot.slane %v815_v46, 1  ;;  %v835_v49 = vpop.permute.xlu0 %834  ;;  %v758_v50 = vrot.slane %v757_v47, 1 }
 0x20a   : > { %v836_v51 = vrot.slane %v835_v49, 1 }
 0x20b   : > { %v817_v52 = vsel %vm550_vm10, %v815_v46, %v816_v48  ;;  %v760_v53 = vsel %vm2306_vm3, %v757_v47, %v758_v50  ;;  %vm2308_vm10 = vmmov %vm2302_vm12 }
 0x20c   : > { %820 = vst.msk [vmem:[#allocation3 + $0x4c] ss:$8 sm:$0x7] %vm1919_vm11, %v817_v52  ;;  %v837_v54 = vsel %vm2307_vm9, %v835_v49, %v836_v51  ;;  %vm2317_vm12 = vmmov %vm2309_vm1  ;;  %v1277_v52 = vld [vmem:[%s2262_s1] sm:$0x3] }
 0x20d   : > { %763 = vst.msk [vmem:[#allocation3 + $0x36] ss:$8 sm:$0x7] %vm1919_vm11, %v760_v53 }
 0x20e   : > { %840 = vst.msk [vmem:[#allocation3 + $0x4e] ss:$8 sm:$0x7] %vm1919_vm11, %v837_v54 }
 0x210   : > { %v614_v55 = vpop.permute.xlu2 %613 }
 0x211   : > { %v615_v56 = vrot.slane %v614_v55, 1  ;;  %v845_v57 = vpop.permute.xlu1 %844  ;;  %v702_v58 = vpop.permute.xlu0 %701 }
 0x212   : > { %v846_v59 = vrot.slane %v845_v57, 1  ;;  %v703_v60 = vrot.slane %v702_v58, 1 }
 0x213   : > { %v617_v61 = vsel %vm2308_vm10, %v614_v55, %v615_v56 }
 0x214   : > { %620 = vst.msk [vmem:[#allocation3 + $0x19] ss:$8 sm:$0x7] %vm1919_vm11, %v617_v61  ;;  %v847_v62 = vsel %vm2309_vm1, %v845_v57, %v846_v59  ;;  %v705_v63 = vsel %vm704_vm7, %v702_v58, %v703_v60  ;;  %vm2316_vm7 = vmmov %vm2307_vm9 }
 0x215   : > { %850 = vst.msk [vmem:[#allocation3 + $0x4f] ss:$8 sm:$0x7] %vm1919_vm11, %v847_v62 }
 0x216   : > { %708 = vst.msk [vmem:[#allocation3 + $0x31] ss:$8 sm:$0x7] %vm1919_vm11, %v705_v63 }
 0x218   : > { %v647_v0 = vpop.permute.xlu2 %646 }
 0x219   : > { %v648_v1 = vrot.slane %v647_v0, 1  ;;  %v713_v2 = vpop.permute.xlu1 %712  ;;  %v735_v3 = vpop.permute.xlu0 %734 }
 0x21a   : > { %v714_v4 = vrot.slane %v713_v2, 1  ;;  %v736_v5 = vrot.slane %v735_v3, 1 }
 0x21b   : > { %v650_v6 = vsel %vm649_vm0, %v647_v0, %v648_v1  ;;  %vm2314_vm0 = vcmask 695296  }
 0x21c   : > { %653 = vst.msk [vmem:[#allocation3 + $0x1c] ss:$8 sm:$0x7] %vm1919_vm11, %v650_v6  ;;  %v716_v7 = vsel %vm715_vm5, %v713_v2, %v714_v4  ;;  %v738_v8 = vsel %vm737_vm4, %v735_v3, %v736_v5  ;;  %v1287_v9 = vld [vmem:[#allocation3 + $0x48] sm:$0xff]  ;;  %v1288_v10 = vld [vmem:[#allocation3 + $0x50] sm:$0xff]  ;;  %v1289_v11 = vld [vmem:[#allocation3 + $0x58] sm:$0xff] }
 0x21d   : > { %719 = vst.msk [vmem:[#allocation3 + $0x32] ss:$8 sm:$0x7] %vm1919_vm11, %v716_v7  ;;  %1338 = vmatpush.msra.mxu0 %v1287_v9  ;;  %1358 = vmatpush.msra.mxu1 %v1288_v10  ;;  %vm2310_vm5 = vcmask 367616   ;;  %vm2315_vm4 = vmmov %vm2304_vm14 }
 0x21e   : > { %741 = vst.msk [vmem:[#allocation3 + $0x34] ss:$8 sm:$0x7] %vm1919_vm11, %v738_v8  ;;  %1378 = vmatpush.msra.mxu2 %v1289_v11 }
 0x220   : > { %v680_v12 = vpop.permute.xlu2 %679 }
 0x221   : > { %v681_v13 = vrot.slane %v680_v12, 1  ;;  %v746_v14 = vpop.permute.xlu1 %745  ;;  %v768_v15 = vpop.permute.xlu0 %767 }
 0x222   : > { %v747_v16 = vrot.slane %v746_v14, 1  ;;  %v769_v17 = vrot.slane %v768_v15, 1 }
 0x223   : > { %v683_v18 = vsel %vm682_vm2, %v680_v12, %v681_v13  ;;  %vm2311_vm2 = vcmask 859136  }
 0x224   : > { %686 = vst.msk [vmem:[#allocation3 + $0x1f] ss:$8 sm:$0x7] %vm1919_vm11, %v683_v18  ;;  %v749_v19 = vsel %vm748_vm6, %v746_v14, %v747_v16  ;;  %v771_v20 = vsel %vm2310_vm5, %v768_v15, %v769_v17  ;;  %vm2312_vm6 = vcmask 719872  }
 0x225   : > { %752 = vst.msk [vmem:[#allocation3 + $0x35] ss:$8 sm:$0x7] %vm1919_vm11, %v749_v19 }
 0x226   : > { %774 = vst.msk [vmem:[#allocation3 + $0x37] ss:$8 sm:$0x7] %vm1919_vm11, %v771_v20 }
 0x228   : > { %v592_v21 = vpop.permute.xlu2 %591 }
 0x229   : > { %v593_v22 = vrot.slane %v592_v21, 1  ;;  %v603_v23 = vpop.permute.xlu1 %602  ;;  %v625_v24 = vpop.permute.xlu0 %624 }
 0x22a   : > { %v604_v25 = vrot.slane %v603_v23, 1  ;;  %v626_v26 = vrot.slane %v625_v24, 1 }
 0x22b   : > { %v595_v27 = vsel %vm594_vm15, %v592_v21, %v593_v22  ;;  %vm2313_vm15 = vmmov %vm2303_vm13  ;;  %vm1393_vm13 = vcmask 1043456  }
 0x22c   : > { %598 = vst.msk [vmem:[#allocation3 + $0x7] ss:$8 sm:$0x7] %vm1919_vm11, %v595_v27  ;;  %v606_v28 = vsel %vm2311_vm2, %v603_v23, %v604_v25  ;;  %v628_v30 = vsel %vm2312_vm6, %v625_v24, %v626_v26 }
 0x22d   : > { %609 = vst.msk [vmem:[#allocation3 + $0x18] ss:$8 sm:$0x7] %vm1919_vm11, %v606_v28  ;;  %v1284_v31 = vld [vmem:[#allocation3 + $0x30] sm:$0xff]  ;;  %v1285_v32 = vld [vmem:[#allocation3 + $0x38] sm:$0xff]  ;;  %v1286_v33 = vld [vmem:[#allocation3 + $0x40] sm:$0xff] }
 0x22e   : > { %631 = vst.msk [vmem:[#allocation3 + $0x1a] ss:$8 sm:$0x7] %vm1919_vm11, %v628_v30  ;;  %1339 = vmatpush.msra.mxu0 %v1284_v31  ;;  %1359 = vmatpush.msra.mxu1 %v1285_v32 }
 0x22f   : > { %1379 = vmatpush.msra.mxu2 %v1286_v33 }
 0x231   : > { %v636_v34 = vpop.permute.xlu1 %635  ;;  %v658_v35 = vpop.permute.xlu0 %657 }
 0x232   : > { %v637_v36 = vrot.slane %v636_v34, 1  ;;  %v659_v37 = vrot.slane %v658_v35, 1 }
 0x234   : > { %v639_v38 = vsel %vm2313_vm15, %v636_v34, %v637_v36  ;;  %v661_v39 = vsel %vm2314_vm0, %v658_v35, %v659_v37 }
 0x235   : > { %642 = vst.msk [vmem:[#allocation3 + $0x1b] ss:$8 sm:$0x7] %vm1919_vm11, %v639_v38 }
 0x236   : > { %664 = vst.msk [vmem:[#allocation3 + $0x1d] ss:$8 sm:$0x7] %vm1919_vm11, %v661_v39 }
 0x239   : > { %v669_v40 = vpop.permute.xlu1 %668  ;;  %v570_v41 = vpop.permute.xlu0 %569 }
 0x23a   : > { %v670_v42 = vrot.slane %v669_v40, 1  ;;  %v571_v43 = vrot.slane %v570_v41, 1 }
 0x23c   : > { %v672_v44 = vsel %vm2315_vm4, %v669_v40, %v670_v42  ;;  %v573_v45 = vsel %vm2316_vm7, %v570_v41, %v571_v43 }
 0x23d   : > { %675 = vst.msk [vmem:[#allocation3 + $0x1e] ss:$8 sm:$0x7] %vm1919_vm11, %v672_v44 }
 0x23e   : > { %576 = vst.msk [vmem:[#allocation3 + $0x5] ss:$8 sm:$0x7] %vm1919_vm11, %v573_v45 }
 0x241   : > { %v581_v46 = vpop.permute.xlu1 %580 }
 0x242   : > { %v582_v47 = vrot.slane %v581_v46, 1 }
 0x244   : > { %v584_v48 = vsel %vm2317_vm12, %v581_v46, %v582_v47  ;;  %v1281_v49 = vld [vmem:[#allocation3 + $0x18] sm:$0xff]  ;;  %v1282_v50 = vld [vmem:[#allocation3 + $0x20] sm:$0xff]  ;;  %v1283_v51 = vld [vmem:[#allocation3 + $0x28] sm:$0xff] }
 0x245   : > { %587 = vst.msk [vmem:[#allocation3 + $0x6] ss:$8 sm:$0x7] %vm1919_vm11, %v584_v48  ;;  %1340 = vmatpush.msra.mxu0 %v1281_v49  ;;  %1360 = vmatpush.msra.mxu1 %v1282_v50  ;;  %vm1391_vm11 = vcmask 1041408  }
 0x246   : > { %1380 = vmatpush.msra.mxu2 %v1283_v51 }
 0x24c   : > { %v1278_v53 = vld [vmem:[#allocation3] sm:$0xff]  ;;  %v1279_v54 = vld [vmem:[#allocation3 + $0x8] sm:$0xff]  ;;  %v1280_v55 = vld [vmem:[#allocation3 + $0x10] sm:$0xff] }
 0x24d   : > { %1341 = vmatpush.msra.mxu0 %v1278_v53  ;;  %1361 = vmatpush.msra.mxu1 %v1279_v54 }
 0x24e   : > { %1381 = vmatpush.msra.mxu2 %v1280_v55  ;;  %1362 = vmatmul.f32.vlgmr.msra.gmra.mxu1 %v1277_v52 }
 0x24f   : > { %1382 = vmatmul.f32.vlgmr.msra.gmra.mxu2 %v1277_v52  ;;  %1342 = vmatmul.f32.vlgmr.msra.gmra.mxu0 %v1277_v52 }
 0x2cb   : > { %v1363_v29 = vpop.f32.mrf.mxu1 }
 0x2cc   : > { %v1389_v56 = vrot.slane %v1363_v29, 6  ;;  %v1343_v57 = vpop.f32.mrf.mxu0 }
 0x2ce   : > { %v1392_v59 = vsel %vm1391_vm11, %v1343_v57, %v1389_v56 }
 0x2d2   : > { %v1383_v58 = vpop.f32.mrf.mxu2 }
 0x2d3   : > { %v1390_v60 = vrot.slane %v1383_v58, 4 }
 0x2d5   : > { %v1394_v61 = vsel %vm1393_vm13, %v1392_v59, %v1390_v60 }
 0x2d6   : > { %1396 = vst [vmem:[%s165_s16] sm:$0x3f] %v1394_v61 }
 0x2d7 PF: > { %p12_p7 = scmp.ge.s32.totalorder %s1730_s14, 4   ;;  %s2318_s9 = smov %s1643_s10 }
 0x2d8   : > { %s2319_s10 = smov %s1647_s11  ;;  %s2320_s11 = smov %s1740_s17 }
 0x2d9   : > { %s2321_s12 = smov %s1730_s14  ;;  %14 = sbr.rel (!%p12_p7) target bundleno = 3 (0x3), region = 146 }
 0x2de   :  { %1418 = vsyncpa [#allocation5], 1 }
 0x2df   :  { %1420 = vsyncpa [#allocation5 + $0x1], 1 }

</bundles_post_ra>
